<compile_context>
chip_gen: v7x
topology: tpu7x:2x2x1
jax: 0.10.0
libtpu: 0.0.40
codegen_flags: <defaults>
</compile_context>

<pallas_src>
import numpy as np
import jax
import jax.numpy as jnp
from jax import lax
from jax.experimental import pallas as pl
from jax.experimental.pallas import tpu as pltpu


def _round_up(x, m):
    return ((x + m - 1) // m) * m


# ----------------------------------------------------------------------------
# Fused Pallas kernel: all layers, both directions, whole sequence.
# ----------------------------------------------------------------------------
def make_bigru_kernel(T, Bp, Din, H, L, GW, mxu_dtype):
    """Static-shape kernel factory. Time-major, batch-padded rows (T*Bp)."""
    H2 = 2 * H
    NG = 3 * GW                      # gate groups: [r_f r_b pad | z_f z_b pad | n_f n_b pad]

    def kernel(x_ref,     # (T*Bp, Din)   patch embeddings, time-major, batch padded to Bp
               wih_ref,   # (L, Kmax, NG) fused input-proj weights (both dirs), mxu_dtype
               whh_ref,   # (L, H2,  NG)  block-diagonal recurrent weights (both dirs)
               bi_ref,    # (L, 1,   NG)  b_i* (+ folded b_hr / b_hz), f32
               bhn_ref,   # (L, 1,   H2)  b_hn (must stay inside r*(...)), f32
               o_ref,     # (T*Bp, H2)    last-layer output, [fwd | bwd] per time row-block
               xp_sc):    # (T*Bp, NG)    VMEM staging for the hoisted input projection
        # Hoisted lane masks (built once, reused by every layer / step).
        lane = jax.lax.broadcasted_iota(jnp.int32, (1, NG), 1)
        fwd_lanes = (lane % GW) < H                       # fwd half of every gate group
        out_lane = jax.lax.broadcasted_iota(jnp.int32, (1, H2), 1)
        fwd_cols = out_lane < H                           # fwd half of the (.., 2H) state

        x_next = None
        for layer in range(L):                            # static python loop over layers
            k_l = Din if layer == 0 else H2
            wih_l = wih_ref[layer][:k_l, :]               # (k_l, NG)
            whh_l = whh_ref[layer]                        # (H2,  NG)
            bi_l = bi_ref[layer]                          # (1,   NG)
            bhn_l = jnp.broadcast_to(bhn_ref[layer], (Bp, H2))    # hoisted broadcast

            x_in = x_ref[...] if layer == 0 else x_next   # (T*Bp, k_l), f32
            # ---- Hoisted fused input projection: ONE matmul for all timesteps & both dirs.
            xp_sc[...] = jnp.dot(x_in.astype(mxu_dtype), wih_l,
                                 preferred_element_type=jnp.float32) + bi_l

            h = jnp.zeros((Bp, H2), jnp.float32)          # [h_fwd | h_bwd]
            h_steps = []
            for t in range(T):                            # fully unrolled serial chain
                rf = t * Bp                               # fwd direction reads time t
                rb = (T - 1 - t) * Bp                     # bwd direction reads time T-1-t
                xp_t = jnp.where(fwd_lanes,
                                 xp_sc[rf:rf + Bp, :],
                                 xp_sc[rb:rb + Bp, :])    # (Bp, NG), off the h-chain
                # Single fused recurrent matmul per step (both directions at once).
                hp = jnp.dot(h.astype(mxu_dtype), whh_l,
                             preferred_element_type=jnp.float32)   # (Bp, NG)
                g = xp_t + hp
                r = jax.nn.sigmoid(g[:, 0:H2])                     # r_f | r_b
                z = jax.nn.sigmoid(g[:, GW:GW + H2])               # z_f | z_b
                n = jnp.tanh(xp_t[:, 2 * GW:2 * GW + H2]
                             + r * (hp[:, 2 * GW:2 * GW + H2] + bhn_l))
                h = (1.0 - z) * n + z * h
                h_steps.append(h)

            # ---- Un-interleave directions in registers; ONE coalesced store per layer.
            # Output time s: fwd half from fused step s, bwd half from fused step T-1-s.
            rows = [jnp.where(fwd_cols, h_steps[s], h_steps[T - 1 - s]) for s in range(T)]
            out_seq = jnp.concatenate(rows, axis=0)       # (T*Bp, H2)
            if layer == L - 1:
                o_ref[...] = out_seq
            else:
                x_next = out_seq                          # stays in registers (no scratch)

    return kernel


# ----------------------------------------------------------------------------
# Parameter handling
# ----------------------------------------------------------------------------
def init_bigru_params(key, patch_dim, hidden, depth):
    # PyTorch nn.GRU default init: U(-1/sqrt(H), 1/sqrt(H)); gate order [r, z, n].
    kinit = 1.0 / np.sqrt(hidden)
    H = hidden
    params = []
    for layer in range(depth):
        din = patch_dim if layer == 0 else 2 * hidden
        dirs = []
        for _ in range(2):                          # forward, backward
            key, k1, k2, k3, k4 = jax.random.split(key, 5)
            wih = jax.random.uniform(k1, (3 * H, din), jnp.float32, -kinit, kinit)
            whh = jax.random.uniform(k2, (3 * H, H), jnp.float32, -kinit, kinit)
            bih = jax.random.uniform(k3, (3 * H,), jnp.float32, -kinit, kinit)
            bhh = jax.random.uniform(k4, (3 * H,), jnp.float32, -kinit, kinit)
            p = {
                "wir": wih[0:H].T,      "wiz": wih[H:2 * H].T,      "win": wih[2 * H:3 * H].T,
                "whr": whh[0:H].T,      "whz": whh[H:2 * H].T,      "whn": whh[2 * H:3 * H].T,
                "bir": bih[0:H][None],  "biz": bih[H:2 * H][None],  "bin": bih[2 * H:3 * H][None],
                "bhr": bhh[0:H][None],  "bhz": bhh[H:2 * H][None],  "bhn": bhh[2 * H:3 * H][None],
            }
            dirs.append(p)
        params.append(tuple(dirs))
    return params


def pack_bigru_params(params, patch_dim, hidden, mxu_dtype=jnp.bfloat16):
    """Fuse both directions + all 3 gates into block-diagonal, 128-lane-aligned arrays."""
    L = len(params)
    H = hidden
    H2 = 2 * H
    GW = _round_up(H2, 128)                     # lanes per gate group (both directions)
    NG = 3 * GW
    Kmax = max(patch_dim, H2)
    wih = np.zeros((L, Kmax, NG), np.float32)
    whh = np.zeros((L, H2, NG), np.float32)
    bi = np.zeros((L, 1, NG), np.float32)
    bhn = np.zeros((L, 1, H2), np.float32)
    for l, dirs in enumerate(params):
        din = patch_dim if l == 0 else H2
        for d, p in enumerate(dirs):            # d=0 forward, d=1 backward
            c = d * H                           # per-direction offset inside a gate group
            wih[l, :din, 0 * GW + c:0 * GW + c + H] = np.asarray(p["wir"])
            wih[l, :din, 1 * GW + c:1 * GW + c + H] = np.asarray(p["wiz"])
            wih[l, :din, 2 * GW + c:2 * GW + c + H] = np.asarray(p["win"])
            whh[l, c:c + H, 0 * GW + c:0 * GW + c + H] = np.asarray(p["whr"])
            whh[l, c:c + H, 1 * GW + c:1 * GW + c + H] = np.asarray(p["whz"])
            whh[l, c:c + H, 2 * GW + c:2 * GW + c + H] = np.asarray(p["whn"])
            bi[l, 0, 0 * GW + c:0 * GW + c + H] = np.asarray(p["bir"] + p["bhr"])[0]  # fold b_hr
            bi[l, 0, 1 * GW + c:1 * GW + c + H] = np.asarray(p["biz"] + p["bhz"])[0]  # fold b_hz
            bi[l, 0, 2 * GW + c:2 * GW + c + H] = np.asarray(p["bin"])[0]
            bhn[l, 0, c:c + H] = np.asarray(p["bhn"])[0]
    return (jnp.asarray(wih).astype(mxu_dtype), jnp.asarray(whh).astype(mxu_dtype),
            jnp.asarray(bi), jnp.asarray(bhn))


# ----------------------------------------------------------------------------
# Model glue (patch embedding is pure layout work; stays in XLA)
# ----------------------------------------------------------------------------
def patch_embed(x, patch_size):
    # einops: 'b c (w p1) (h p2) -> b (w h) (p1 p2 c)'
    pw, ph = patch_size
    B, C, D2, D3 = x.shape
    w, h = D2 // pw, D3 // ph
    xp = x.reshape(B, C, w, pw, h, ph)
    xp = jnp.transpose(xp, (0, 2, 4, 3, 5, 1))      # b, w, h, p1, p2, c
    return xp.reshape(B, w * h, pw * ph * C)


def bigru_forward_pallas(x, packed, patch_size, hidden, depth, mxu_dtype=jnp.bfloat16):
    xe = patch_embed(x, patch_size)                          # (B, T, Din)
    B0, T, Din = xe.shape
    H = hidden
    wih, whh, bi, bhn = packed
    GW = whh.shape[-1] // 3
    Bp = _round_up(max(B0, 8), 8)                            # fill / align sublanes

    seq = jnp.transpose(xe, (1, 0, 2))                       # time-major (T, B, Din)
    if Bp != B0:
        seq = jnp.pad(seq, ((0, 0), (0, Bp - B0), (0, 0)))
    seq2d = seq.reshape(T * Bp, Din)

    kernel = make_bigru_kernel(T, Bp, Din, H, depth, GW, mxu_dtype)
    args = (seq2d, wih, whh, bi, bhn)

    def full_spec(a):
        nd = a.ndim
        return pl.BlockSpec(a.shape, lambda i, _nd=nd: (0,) * _nd)

    out2d = pl.pallas_call(
        kernel,
        out_shape=jax.ShapeDtypeStruct((T * Bp, 2 * H), jnp.float32),
        grid=(1,),
        in_specs=[full_spec(a) for a in args],
        out_specs=pl.BlockSpec((T * Bp, 2 * H), lambda i: (0, 0)),
        scratch_shapes=[pltpu.VMEM((T * Bp, 3 * GW), jnp.float32)],
        compiler_params=pltpu.CompilerParams(dimension_semantics=("arbitrary",)),
    )(*args)

    out = out2d.reshape(T, Bp, 2 * H)[:, :B0]                # drop batch-pad rows
    return jnp.transpose(out, (1, 0, 2))                     # (B, T, 2H)


# ----------------------------------------------------------------------------
# Pure-JAX reference (lax.scan per direction), optionally precision-matched.
# ----------------------------------------------------------------------------
def gru_dir_ref(x_tbd, p, dot_dtype=jnp.float32):
    H = p["whr"].shape[1]
    B = x_tbd.shape[1]

    def mm(a, w):
        return jnp.dot(a.astype(dot_dtype), w.astype(dot_dtype),
                       preferred_element_type=jnp.float32)

    def step(h, x_t):
        r = jax.nn.sigmoid(mm(x_t, p["wir"]) + p["bir"] + mm(h, p["whr"]) + p["bhr"])
        z = jax.nn.sigmoid(mm(x_t, p["wiz"]) + p["biz"] + mm(h, p["whz"]) + p["bhz"])
        n = jnp.tanh(mm(x_t, p["win"]) + p["bin"] + r * (mm(h, p["whn"]) + p["bhn"]))
        h_new = (1.0 - z) * n + z * h
        return h_new, h_new

    h0 = jnp.zeros((B, H), jnp.float32)
    _, ys = lax.scan(step, h0, x_tbd)
    return ys


def bigru_forward_ref(x, params, patch_size, dot_dtype=jnp.float32):
    xp = patch_embed(x, patch_size)                 # (B, T, patch_dim)
    seq = jnp.transpose(xp, (1, 0, 2))              # (T, B, patch_dim)
    for fwd_p, bwd_p in params:
        out_f = gru_dir_ref(seq, fwd_p, dot_dtype)
        out_b = gru_dir_ref(seq[::-1], bwd_p, dot_dtype)[::-1]
        seq = jnp.concatenate([out_f, out_b], axis=-1)
    return jnp.transpose(seq, (1, 0, 2))            # (B, T, 2H)


if __name__ == "__main__":
    # Small, consistent shapes: image 16x16, patch 4x4, 4 channels, depth 2, batch 2.
    image_size = (16, 16)
    patch_size = (4, 4)
    channels = 4
    depth = 2
    batch = 2

    patch_dim = channels * patch_size[0] * patch_size[1]   # 64
    hidden = patch_dim // 2                                 # 32
    num_patches = (image_size[0] // patch_size[0]) * (image_size[1] // patch_size[1])  # 16

    key = jax.random.PRNGKey(0)
    kx, kp = jax.random.split(key)
    x = jax.random.normal(kx, (batch, channels, image_size[0], image_size[1]), jnp.float32)
    params = init_bigru_params(kp, patch_dim, hidden, depth)

    # --- f32-MXU validation run: exact nn.GRU semantics vs. f32 reference. ---
    packed_f32 = pack_bigru_params(params, patch_dim, hidden, jnp.float32)
    out_f32 = jax.block_until_ready(
        bigru_forward_pallas(x, packed_f32, patch_size, hidden, depth, jnp.float32))
    assert out_f32.shape == (batch, num_patches, patch_dim), out_f32.shape
    ref_f32 = jax.block_until_ready(bigru_forward_ref(x, params, patch_size, jnp.float32))
    np.testing.assert_allclose(np.asarray(out_f32), np.asarray(ref_f32), atol=1e-2, rtol=1e-2)

    # --- bf16-MXU perf run (review item): validated vs. a precision-matched reference. ---
    packed_bf16 = pack_bigru_params(params, patch_dim, hidden, jnp.bfloat16)
    out_bf16 = jax.block_until_ready(
        bigru_forward_pallas(x, packed_bf16, patch_size, hidden, depth, jnp.bfloat16))
    assert out_bf16.shape == (batch, num_patches, patch_dim), out_bf16.shape
    ref_bf16 = jax.block_until_ready(bigru_forward_ref(x, params, patch_size, jnp.bfloat16))
    np.testing.assert_allclose(np.asarray(out_bf16), np.asarray(ref_bf16), atol=1e-2, rtol=1e-2)

    print("KERNEL_OK")
</pallas_src>

<mosaic_0001>
module attributes {stable_mosaic.version = 11 : i64} {
  func.func @kernel(%arg0: i32, %arg1: memref<128x64xf32, #tpu.memory_space<vmem>>, %arg2: memref<2x64x384xf32, #tpu.memory_space<vmem>>, %arg3: memref<2x64x384xf32, #tpu.memory_space<vmem>>, %arg4: memref<2x1x384xf32, #tpu.memory_space<vmem>>, %arg5: memref<2x1x64xf32, #tpu.memory_space<vmem>>, %arg6: memref<128x64xf32, #tpu.memory_space<vmem>>, %arg7: memref<128x384xf32, #tpu.memory_space<vmem>>) attributes {dimension_semantics = [#tpu.dimension_semantics<arbitrary>], iteration_bounds = array<i64: 1>, scalar_prefetch = 0 : i64, scratch_operands = 1 : i64, tpu.core_type = #tpu.core_type<tc>, window_params = [{pipeline_mode = #tpu.pipeline_mode<synchronous>, transform_indices = @transform_0, window_bounds = array<i64: 128, 64>}, {pipeline_mode = #tpu.pipeline_mode<synchronous>, transform_indices = @transform_1, window_bounds = array<i64: 2, 64, 384>}, {pipeline_mode = #tpu.pipeline_mode<synchronous>, transform_indices = @transform_2, window_bounds = array<i64: 2, 64, 384>}, {pipeline_mode = #tpu.pipeline_mode<synchronous>, transform_indices = @transform_3, window_bounds = array<i64: 2, 1, 384>}, {pipeline_mode = #tpu.pipeline_mode<synchronous>, transform_indices = @transform_4, window_bounds = array<i64: 2, 1, 64>}, {pipeline_mode = #tpu.pipeline_mode<synchronous>, transform_indices = @transform_5, window_bounds = array<i64: 128, 64>}]} {
    %0 = tpu.iota {dimensions = array<i32: 1>} : vector<1x384xi32>
    %c128_i32 = arith.constant 128 : i32
    %c0_i32 = arith.constant 0 : i32
    %1 = arith.cmpi eq, %c128_i32, %c0_i32 : i32
    %c1_i32 = arith.constant 1 : i32
    %2 = arith.select %1, %c1_i32, %c128_i32 : i32
    %3 = vector.broadcast %2 : i32 to vector<1x384xi32>
    %4 = arith.remsi %0, %3 : vector<1x384xi32>
    %c0_i32_0 = arith.constant 0 : i32
    %5 = vector.broadcast %c0_i32_0 : i32 to vector<1x384xi32>
    %6 = arith.cmpi ne, %4, %5 : vector<1x384xi32>
    %c0_i32_1 = arith.constant 0 : i32
    %7 = vector.broadcast %c0_i32_1 : i32 to vector<1x384xi32>
    %8 = arith.cmpi slt, %4, %7 : vector<1x384xi32>
    %c0_i32_2 = arith.constant 0 : i32
    %9 = arith.cmpi slt, %2, %c0_i32_2 : i32
    %10 = vector.broadcast %9 : i1 to vector<1x384xi1>
    %11 = vector.broadcast %10 : vector<1x384xi1> to vector<1x384xi1>
    %12 = arith.xori %8, %11 : vector<1x384xi1>
    %13 = arith.andi %12, %6 : vector<1x384xi1>
    %14 = vector.broadcast %2 : i32 to vector<1x384xi32>
    %15 = arith.addi %4, %14 : vector<1x384xi32>
    %16 = arith.select %13, %15, %4 : vector<1x384xi1>, vector<1x384xi32>
    %c32_i32 = arith.constant 32 : i32
    %17 = vector.broadcast %c32_i32 : i32 to vector<1x384xi32>
    %18 = arith.cmpi slt, %16, %17 : vector<1x384xi32>
    %19 = tpu.iota {dimensions = array<i32: 1>} : vector<1x64xi32>
    %c32_i32_3 = arith.constant 32 : i32
    %20 = vector.broadcast %c32_i32_3 : i32 to vector<1x64xi32>
    %21 = arith.cmpi slt, %19, %20 : vector<1x64xi32>
    %c0 = arith.constant 0 : index
    %c0_4 = arith.constant 0 : index
    %c0_5 = arith.constant 0 : index
    %22 = vector.load %arg2[%c0, %c0_4, %c0_5] : memref<2x64x384xf32, #tpu.memory_space<vmem>>, vector<1x64x384xf32>
    %23 = vector.shape_cast %22 : vector<1x64x384xf32> to vector<64x384xf32>
    %c0_6 = arith.constant 0 : index
    %c0_7 = arith.constant 0 : index
    %c0_8 = arith.constant 0 : index
    %24 = vector.load %arg3[%c0_6, %c0_7, %c0_8] : memref<2x64x384xf32, #tpu.memory_space<vmem>>, vector<1x64x384xf32>
    %25 = vector.shape_cast %24 : vector<1x64x384xf32> to vector<64x384xf32>
    %c0_9 = arith.constant 0 : index
    %c0_10 = arith.constant 0 : index
    %c0_11 = arith.constant 0 : index
    %26 = vector.load %arg4[%c0_9, %c0_10, %c0_11] : memref<2x1x384xf32, #tpu.memory_space<vmem>>, vector<1x1x384xf32>
    %27 = vector.shape_cast %26 : vector<1x1x384xf32> to vector<1x384xf32>
    %c0_12 = arith.constant 0 : index
    %c0_13 = arith.constant 0 : index
    %c0_14 = arith.constant 0 : index
    %28 = vector.load %arg5[%c0_12, %c0_13, %c0_14] : memref<2x1x64xf32, #tpu.memory_space<vmem>>, vector<1x1x64xf32>
    %29 = vector.shape_cast %28 : vector<1x1x64xf32> to vector<1x64xf32>
    %30 = vector.shape_cast %29 : vector<1x64xf32> to vector<1x64xf32>
    %31 = vector.broadcast %30 : vector<1x64xf32> to vector<8x64xf32>
    %c0_15 = arith.constant 0 : index
    %c0_16 = arith.constant 0 : index
    %32 = vector.load %arg1[%c0_15, %c0_16] : memref<128x64xf32, #tpu.memory_space<vmem>>, vector<128x64xf32>
    %cst = arith.constant dense<0.000000e+00> : vector<128x384xf32>
    %33 = tpu.matmul %32, %23, %cst {dimension_numbers = #tpu.dot_dimension_numbers<[1], [0], [0], [1], [0, 0, 1, 1], [], []>} : vector<128x64xf32>, vector<64x384xf32>, vector<128x384xf32> -> vector<128x384xf32>
    %34 = vector.broadcast %27 : vector<1x384xf32> to vector<128x384xf32>
    %35 = arith.addf %33, %34 : vector<128x384xf32>
    %c0_17 = arith.constant 0 : index
    %c0_18 = arith.constant 0 : index
    %36 = vector.load %arg7[%c0_17, %c0_18] : memref<128x384xf32, #tpu.memory_space<vmem>>, vector<128x384xf32>
    tpu.vector_store %arg7[%c0_17, %c0_18], %35 {strides = array<i32>} : memref<128x384xf32, #tpu.memory_space<vmem>>, vector<128x384xf32>,
    %cst_19 = arith.constant 0.000000e+00 : f32
    %37 = vector.broadcast %cst_19 : f32 to vector<8x64xf32>
    %c0_20 = arith.constant 0 : index
    %c0_21 = arith.constant 0 : index
    %38 = vector.load %arg7[%c0_20, %c0_21] : memref<128x384xf32, #tpu.memory_space<vmem>>, vector<8x384xf32>
    %c120 = arith.constant 120 : index
    %c0_22 = arith.constant 0 : index
    %39 = vector.load %arg7[%c120, %c0_22] : memref<128x384xf32, #tpu.memory_space<vmem>>, vector<8x384xf32>
    %40 = vector.shape_cast %18 : vector<1x384xi1> to vector<1x384xi1>
    %41 = vector.broadcast %40 : vector<1x384xi1> to vector<8x384xi1>
    %42 = arith.select %41, %38, %39 : vector<8x384xi1>, vector<8x384xf32>
    %cst_23 = arith.constant dense<0.000000e+00> : vector<8x384xf32>
    %43 = tpu.matmul %37, %25, %cst_23 {dimension_numbers = #tpu.dot_dimension_numbers<[1], [0], [0], [1], [0, 0, 1, 1], [], []>} : vector<8x64xf32>, vector<64x384xf32>, vector<8x384xf32> -> vector<8x384xf32>
    %44 = arith.addf %42, %43 : vector<8x384xf32>
    %45 = vector.extract_strided_slice %44 {offsets = [0, 0], sizes = [8, 64], strides = [1, 1]} : vector<8x384xf32> to vector<8x64xf32>
    %46 = arith.negf %45 : vector<8x64xf32>
    %47 = math.exp %46 : vector<8x64xf32>
    %cst_24 = arith.constant 1.000000e+00 : f32
    %48 = vector.broadcast %cst_24 : f32 to vector<8x64xf32>
    %49 = arith.addf %48, %47 : vector<8x64xf32>
    %50 = arith.divf %48, %49 : vector<8x64xf32>
    %51 = vector.extract_strided_slice %44 {offsets = [0, 128], sizes = [8, 64], strides = [1, 1]} : vector<8x384xf32> to vector<8x64xf32>
    %52 = arith.negf %51 : vector<8x64xf32>
    %53 = math.exp %52 : vector<8x64xf32>
    %cst_25 = arith.constant 1.000000e+00 : f32
    %54 = vector.broadcast %cst_25 : f32 to vector<8x64xf32>
    %55 = arith.addf %54, %53 : vector<8x64xf32>
    %56 = arith.divf %54, %55 : vector<8x64xf32>
    %57 = vector.extract_strided_slice %42 {offsets = [0, 256], sizes = [8, 64], strides = [1, 1]} : vector<8x384xf32> to vector<8x64xf32>
    %58 = vector.extract_strided_slice %43 {offsets = [0, 256], sizes = [8, 64], strides = [1, 1]} : vector<8x384xf32> to vector<8x64xf32>
    %59 = arith.addf %58, %31 : vector<8x64xf32>
    %60 = arith.mulf %50, %59 : vector<8x64xf32>
    %61 = arith.addf %57, %60 : vector<8x64xf32>
    %62 = math.tanh %61 : vector<8x64xf32>
    %cst_26 = arith.constant 1.000000e+00 : f32
    %63 = vector.broadcast %cst_26 : f32 to vector<8x64xf32>
    %64 = arith.subf %63, %56 : vector<8x64xf32>
    %65 = arith.mulf %64, %62 : vector<8x64xf32>
    %66 = arith.mulf %56, %37 : vector<8x64xf32>
    %67 = arith.addf %65, %66 : vector<8x64xf32>
    %c8 = arith.constant 8 : index
    %c0_27 = arith.constant 0 : index
    %68 = vector.load %arg7[%c8, %c0_27] : memref<128x384xf32, #tpu.memory_space<vmem>>, vector<8x384xf32>
    %c112 = arith.constant 112 : index
    %c0_28 = arith.constant 0 : index
    %69 = vector.load %arg7[%c112, %c0_28] : memref<128x384xf32, #tpu.memory_space<vmem>>, vector<8x384xf32>
    %70 = vector.shape_cast %18 : vector<1x384xi1> to vector<1x384xi1>
    %71 = vector.broadcast %70 : vector<1x384xi1> to vector<8x384xi1>
    %72 = arith.select %71, %68, %69 : vector<8x384xi1>, vector<8x384xf32>
    %cst_29 = arith.constant dense<0.000000e+00> : vector<8x384xf32>
    %73 = tpu.matmul %67, %25, %cst_29 {dimension_numbers = #tpu.dot_dimension_numbers<[1], [0], [0], [1], [0, 0, 1, 1], [], []>} : vector<8x64xf32>, vector<64x384xf32>, vector<8x384xf32> -> vector<8x384xf32>
    %74 = arith.addf %72, %73 : vector<8x384xf32>
    %75 = vector.extract_strided_slice %74 {offsets = [0, 0], sizes = [8, 64], strides = [1, 1]} : vector<8x384xf32> to vector<8x64xf32>
    %76 = arith.negf %75 : vector<8x64xf32>
    %77 = math.exp %76 : vector<8x64xf32>
    %cst_30 = arith.constant 1.000000e+00 : f32
    %78 = vector.broadcast %cst_30 : f32 to vector<8x64xf32>
    %79 = arith.addf %78, %77 : vector<8x64xf32>
    %80 = arith.divf %78, %79 : vector<8x64xf32>
    %81 = vector.extract_strided_slice %74 {offsets = [0, 128], sizes = [8, 64], strides = [1, 1]} : vector<8x384xf32> to vector<8x64xf32>
    %82 = arith.negf %81 : vector<8x64xf32>
    %83 = math.exp %82 : vector<8x64xf32>
    %cst_31 = arith.constant 1.000000e+00 : f32
    %84 = vector.broadcast %cst_31 : f32 to vector<8x64xf32>
    %85 = arith.addf %84, %83 : vector<8x64xf32>
    %86 = arith.divf %84, %85 : vector<8x64xf32>
    %87 = vector.extract_strided_slice %72 {offsets = [0, 256], sizes = [8, 64], strides = [1, 1]} : vector<8x384xf32> to vector<8x64xf32>
    %88 = vector.extract_strided_slice %73 {offsets = [0, 256], sizes = [8, 64], strides = [1, 1]} : vector<8x384xf32> to vector<8x64xf32>
    %89 = arith.addf %88, %31 : vector<8x64xf32>
    %90 = arith.mulf %80, %89 : vector<8x64xf32>
    %91 = arith.addf %87, %90 : vector<8x64xf32>
    %92 = math.tanh %91 : vector<8x64xf32>
    %cst_32 = arith.constant 1.000000e+00 : f32
    %93 = vector.broadcast %cst_32 : f32 to vector<8x64xf32>
    %94 = arith.subf %93, %86 : vector<8x64xf32>
    %95 = arith.mulf %94, %92 : vector<8x64xf32>
    %96 = arith.mulf %86, %67 : vector<8x64xf32>
    %97 = arith.addf %95, %96 : vector<8x64xf32>
    %c16 = arith.constant 16 : index
    %c0_33 = arith.constant 0 : index
    %98 = vector.load %arg7[%c16, %c0_33] : memref<128x384xf32, #tpu.memory_space<vmem>>, vector<8x384xf32>
    %c104 = arith.constant 104 : index
    %c0_34 = arith.constant 0 : index
    %99 = vector.load %arg7[%c104, %c0_34] : memref<128x384xf32, #tpu.memory_space<vmem>>, vector<8x384xf32>
    %100 = vector.shape_cast %18 : vector<1x384xi1> to vector<1x384xi1>
    %101 = vector.broadcast %100 : vector<1x384xi1> to vector<8x384xi1>
    %102 = arith.select %101, %98, %99 : vector<8x384xi1>, vector<8x384xf32>
    %cst_35 = arith.constant dense<0.000000e+00> : vector<8x384xf32>
    %103 = tpu.matmul %97, %25, %cst_35 {dimension_numbers = #tpu.dot_dimension_numbers<[1], [0], [0], [1], [0, 0, 1, 1], [], []>} : vector<8x64xf32>, vector<64x384xf32>, vector<8x384xf32> -> vector<8x384xf32>
    %104 = arith.addf %102, %103 : vector<8x384xf32>
    %105 = vector.extract_strided_slice %104 {offsets = [0, 0], sizes = [8, 64], strides = [1, 1]} : vector<8x384xf32> to vector<8x64xf32>
    %106 = arith.negf %105 : vector<8x64xf32>
    %107 = math.exp %106 : vector<8x64xf32>
    %cst_36 = arith.constant 1.000000e+00 : f32
    %108 = vector.broadcast %cst_36 : f32 to vector<8x64xf32>
    %109 = arith.addf %108, %107 : vector<8x64xf32>
    %110 = arith.divf %108, %109 : vector<8x64xf32>
    %111 = vector.extract_strided_slice %104 {offsets = [0, 128], sizes = [8, 64], strides = [1, 1]} : vector<8x384xf32> to vector<8x64xf32>
    %112 = arith.negf %111 : vector<8x64xf32>
    %113 = math.exp %112 : vector<8x64xf32>
    %cst_37 = arith.constant 1.000000e+00 : f32
    %114 = vector.broadcast %cst_37 : f32 to vector<8x64xf32>
    %115 = arith.addf %114, %113 : vector<8x64xf32>
    %116 = arith.divf %114, %115 : vector<8x64xf32>
    %117 = vector.extract_strided_slice %102 {offsets = [0, 256], sizes = [8, 64], strides = [1, 1]} : vector<8x384xf32> to vector<8x64xf32>
    %118 = vector.extract_strided_slice %103 {offsets = [0, 256], sizes = [8, 64], strides = [1, 1]} : vector<8x384xf32> to vector<8x64xf32>
    %119 = arith.addf %118, %31 : vector<8x64xf32>
    %120 = arith.mulf %110, %119 : vector<8x64xf32>
    %121 = arith.addf %117, %120 : vector<8x64xf32>
    %122 = math.tanh %121 : vector<8x64xf32>
    %cst_38 = arith.constant 1.000000e+00 : f32
    %123 = vector.broadcast %cst_38 : f32 to vector<8x64xf32>
    %124 = arith.subf %123, %116 : vector<8x64xf32>
    %125 = arith.mulf %124, %122 : vector<8x64xf32>
    %126 = arith.mulf %116, %97 : vector<8x64xf32>
    %127 = arith.addf %125, %126 : vector<8x64xf32>
    %c24 = arith.constant 24 : index
    %c0_39 = arith.constant 0 : index
    %128 = vector.load %arg7[%c24, %c0_39] : memref<128x384xf32, #tpu.memory_space<vmem>>, vector<8x384xf32>
    %c96 = arith.constant 96 : index
    %c0_40 = arith.constant 0 : index
    %129 = vector.load %arg7[%c96, %c0_40] : memref<128x384xf32, #tpu.memory_space<vmem>>, vector<8x384xf32>
    %130 = vector.shape_cast %18 : vector<1x384xi1> to vector<1x384xi1>
    %131 = vector.broadcast %130 : vector<1x384xi1> to vector<8x384xi1>
    %132 = arith.select %131, %128, %129 : vector<8x384xi1>, vector<8x384xf32>
    %cst_41 = arith.constant dense<0.000000e+00> : vector<8x384xf32>
    %133 = tpu.matmul %127, %25, %cst_41 {dimension_numbers = #tpu.dot_dimension_numbers<[1], [0], [0], [1], [0, 0, 1, 1], [], []>} : vector<8x64xf32>, vector<64x384xf32>, vector<8x384xf32> -> vector<8x384xf32>
    %134 = arith.addf %132, %133 : vector<8x384xf32>
    %135 = vector.extract_strided_slice %134 {offsets = [0, 0], sizes = [8, 64], strides = [1, 1]} : vector<8x384xf32> to vector<8x64xf32>
    %136 = arith.negf %135 : vector<8x64xf32>
    %137 = math.exp %136 : vector<8x64xf32>
    %cst_42 = arith.constant 1.000000e+00 : f32
    %138 = vector.broadcast %cst_42 : f32 to vector<8x64xf32>
    %139 = arith.addf %138, %137 : vector<8x64xf32>
    %140 = arith.divf %138, %139 : vector<8x64xf32>
    %141 = vector.extract_strided_slice %134 {offsets = [0, 128], sizes = [8, 64], strides = [1, 1]} : vector<8x384xf32> to vector<8x64xf32>
    %142 = arith.negf %141 : vector<8x64xf32>
    %143 = math.exp %142 : vector<8x64xf32>
    %cst_43 = arith.constant 1.000000e+00 : f32
    %144 = vector.broadcast %cst_43 : f32 to vector<8x64xf32>
    %145 = arith.addf %144, %143 : vector<8x64xf32>
    %146 = arith.divf %144, %145 : vector<8x64xf32>
    %147 = vector.extract_strided_slice %132 {offsets = [0, 256], sizes = [8, 64], strides = [1, 1]} : vector<8x384xf32> to vector<8x64xf32>
    %148 = vector.extract_strided_slice %133 {offsets = [0, 256], sizes = [8, 64], strides = [1, 1]} : vector<8x384xf32> to vector<8x64xf32>
    %149 = arith.addf %148, %31 : vector<8x64xf32>
    %150 = arith.mulf %140, %149 : vector<8x64xf32>
    %151 = arith.addf %147, %150 : vector<8x64xf32>
    %152 = math.tanh %151 : vector<8x64xf32>
    %cst_44 = arith.constant 1.000000e+00 : f32
    %153 = vector.broadcast %cst_44 : f32 to vector<8x64xf32>
    %154 = arith.subf %153, %146 : vector<8x64xf32>
    %155 = arith.mulf %154, %152 : vector<8x64xf32>
    %156 = arith.mulf %146, %127 : vector<8x64xf32>
    %157 = arith.addf %155, %156 : vector<8x64xf32>
    %c32 = arith.constant 32 : index
    %c0_45 = arith.constant 0 : index
    %158 = vector.load %arg7[%c32, %c0_45] : memref<128x384xf32, #tpu.memory_space<vmem>>, vector<8x384xf32>
    %c88 = arith.constant 88 : index
    %c0_46 = arith.constant 0 : index
    %159 = vector.load %arg7[%c88, %c0_46] : memref<128x384xf32, #tpu.memory_space<vmem>>, vector<8x384xf32>
    %160 = vector.shape_cast %18 : vector<1x384xi1> to vector<1x384xi1>
    %161 = vector.broadcast %160 : vector<1x384xi1> to vector<8x384xi1>
    %162 = arith.select %161, %158, %159 : vector<8x384xi1>, vector<8x384xf32>
    %cst_47 = arith.constant dense<0.000000e+00> : vector<8x384xf32>
    %163 = tpu.matmul %157, %25, %cst_47 {dimension_numbers = #tpu.dot_dimension_numbers<[1], [0], [0], [1], [0, 0, 1, 1], [], []>} : vector<8x64xf32>, vector<64x384xf32>, vector<8x384xf32> -> vector<8x384xf32>
    %164 = arith.addf %162, %163 : vector<8x384xf32>
    %165 = vector.extract_strided_slice %164 {offsets = [0, 0], sizes = [8, 64], strides = [1, 1]} : vector<8x384xf32> to vector<8x64xf32>
    %166 = arith.negf %165 : vector<8x64xf32>
    %167 = math.exp %166 : vector<8x64xf32>
    %cst_48 = arith.constant 1.000000e+00 : f32
    %168 = vector.broadcast %cst_48 : f32 to vector<8x64xf32>
    %169 = arith.addf %168, %167 : vector<8x64xf32>
    %170 = arith.divf %168, %169 : vector<8x64xf32>
    %171 = vector.extract_strided_slice %164 {offsets = [0, 128], sizes = [8, 64], strides = [1, 1]} : vector<8x384xf32> to vector<8x64xf32>
    %172 = arith.negf %171 : vector<8x64xf32>
    %173 = math.exp %172 : vector<8x64xf32>
    %cst_49 = arith.constant 1.000000e+00 : f32
    %174 = vector.broadcast %cst_49 : f32 to vector<8x64xf32>
    %175 = arith.addf %174, %173 : vector<8x64xf32>
    %176 = arith.divf %174, %175 : vector<8x64xf32>
    %177 = vector.extract_strided_slice %162 {offsets = [0, 256], sizes = [8, 64], strides = [1, 1]} : vector<8x384xf32> to vector<8x64xf32>
    %178 = vector.extract_strided_slice %163 {offsets = [0, 256], sizes = [8, 64], strides = [1, 1]} : vector<8x384xf32> to vector<8x64xf32>
    %179 = arith.addf %178, %31 : vector<8x64xf32>
    %180 = arith.mulf %170, %179 : vector<8x64xf32>
    %181 = arith.addf %177, %180 : vector<8x64xf32>
    %182 = math.tanh %181 : vector<8x64xf32>
    %cst_50 = arith.constant 1.000000e+00 : f32
    %183 = vector.broadcast %cst_50 : f32 to vector<8x64xf32>
    %184 = arith.subf %183, %176 : vector<8x64xf32>
    %185 = arith.mulf %184, %182 : vector<8x64xf32>
    %186 = arith.mulf %176, %157 : vector<8x64xf32>
    %187 = arith.addf %185, %186 : vector<8x64xf32>
    %c40 = arith.constant 40 : index
    %c0_51 = arith.constant 0 : index
    %188 = vector.load %arg7[%c40, %c0_51] : memref<128x384xf32, #tpu.memory_space<vmem>>, vector<8x384xf32>
    %c80 = arith.constant 80 : index
    %c0_52 = arith.constant 0 : index
    %189 = vector.load %arg7[%c80, %c0_52] : memref<128x384xf32, #tpu.memory_space<vmem>>, vector<8x384xf32>
    %190 = vector.shape_cast %18 : vector<1x384xi1> to vector<1x384xi1>
    %191 = vector.broadcast %190 : vector<1x384xi1> to vector<8x384xi1>
    %192 = arith.select %191, %188, %189 : vector<8x384xi1>, vector<8x384xf32>
    %cst_53 = arith.constant dense<0.000000e+00> : vector<8x384xf32>
    %193 = tpu.matmul %187, %25, %cst_53 {dimension_numbers = #tpu.dot_dimension_numbers<[1], [0], [0], [1], [0, 0, 1, 1], [], []>} : vector<8x64xf32>, vector<64x384xf32>, vector<8x384xf32> -> vector<8x384xf32>
    %194 = arith.addf %192, %193 : vector<8x384xf32>
    %195 = vector.extract_strided_slice %194 {offsets = [0, 0], sizes = [8, 64], strides = [1, 1]} : vector<8x384xf32> to vector<8x64xf32>
    %196 = arith.negf %195 : vector<8x64xf32>
    %197 = math.exp %196 : vector<8x64xf32>
    %cst_54 = arith.constant 1.000000e+00 : f32
    %198 = vector.broadcast %cst_54 : f32 to vector<8x64xf32>
    %199 = arith.addf %198, %197 : vector<8x64xf32>
    %200 = arith.divf %198, %199 : vector<8x64xf32>
    %201 = vector.extract_strided_slice %194 {offsets = [0, 128], sizes = [8, 64], strides = [1, 1]} : vector<8x384xf32> to vector<8x64xf32>
    %202 = arith.negf %201 : vector<8x64xf32>
    %203 = math.exp %202 : vector<8x64xf32>
    %cst_55 = arith.constant 1.000000e+00 : f32
    %204 = vector.broadcast %cst_55 : f32 to vector<8x64xf32>
    %205 = arith.addf %204, %203 : vector<8x64xf32>
    %206 = arith.divf %204, %205 : vector<8x64xf32>
    %207 = vector.extract_strided_slice %192 {offsets = [0, 256], sizes = [8, 64], strides = [1, 1]} : vector<8x384xf32> to vector<8x64xf32>
    %208 = vector.extract_strided_slice %193 {offsets = [0, 256], sizes = [8, 64], strides = [1, 1]} : vector<8x384xf32> to vector<8x64xf32>
    %209 = arith.addf %208, %31 : vector<8x64xf32>
    %210 = arith.mulf %200, %209 : vector<8x64xf32>
    %211 = arith.addf %207, %210 : vector<8x64xf32>
    %212 = math.tanh %211 : vector<8x64xf32>
    %cst_56 = arith.constant 1.000000e+00 : f32
    %213 = vector.broadcast %cst_56 : f32 to vector<8x64xf32>
    %214 = arith.subf %213, %206 : vector<8x64xf32>
    %215 = arith.mulf %214, %212 : vector<8x64xf32>
    %216 = arith.mulf %206, %187 : vector<8x64xf32>
    %217 = arith.addf %215, %216 : vector<8x64xf32>
    %c48 = arith.constant 48 : index
    %c0_57 = arith.constant 0 : index
    %218 = vector.load %arg7[%c48, %c0_57] : memref<128x384xf32, #tpu.memory_space<vmem>>, vector<8x384xf32>
    %c72 = arith.constant 72 : index
    %c0_58 = arith.constant 0 : index
    %219 = vector.load %arg7[%c72, %c0_58] : memref<128x384xf32, #tpu.memory_space<vmem>>, vector<8x384xf32>
    %220 = vector.shape_cast %18 : vector<1x384xi1> to vector<1x384xi1>
    %221 = vector.broadcast %220 : vector<1x384xi1> to vector<8x384xi1>
    %222 = arith.select %221, %218, %219 : vector<8x384xi1>, vector<8x384xf32>
    %cst_59 = arith.constant dense<0.000000e+00> : vector<8x384xf32>
    %223 = tpu.matmul %217, %25, %cst_59 {dimension_numbers = #tpu.dot_dimension_numbers<[1], [0], [0], [1], [0, 0, 1, 1], [], []>} : vector<8x64xf32>, vector<64x384xf32>, vector<8x384xf32> -> vector<8x384xf32>
    %224 = arith.addf %222, %223 : vector<8x384xf32>
    %225 = vector.extract_strided_slice %224 {offsets = [0, 0], sizes = [8, 64], strides = [1, 1]} : vector<8x384xf32> to vector<8x64xf32>
    %226 = arith.negf %225 : vector<8x64xf32>
    %227 = math.exp %226 : vector<8x64xf32>
    %cst_60 = arith.constant 1.000000e+00 : f32
    %228 = vector.broadcast %cst_60 : f32 to vector<8x64xf32>
    %229 = arith.addf %228, %227 : vector<8x64xf32>
    %230 = arith.divf %228, %229 : vector<8x64xf32>
    %231 = vector.extract_strided_slice %224 {offsets = [0, 128], sizes = [8, 64], strides = [1, 1]} : vector<8x384xf32> to vector<8x64xf32>
    %232 = arith.negf %231 : vector<8x64xf32>
    %233 = math.exp %232 : vector<8x64xf32>
    %cst_61 = arith.constant 1.000000e+00 : f32
    %234 = vector.broadcast %cst_61 : f32 to vector<8x64xf32>
    %235 = arith.addf %234, %233 : vector<8x64xf32>
    %236 = arith.divf %234, %235 : vector<8x64xf32>
    %237 = vector.extract_strided_slice %222 {offsets = [0, 256], sizes = [8, 64], strides = [1, 1]} : vector<8x384xf32> to vector<8x64xf32>
    %238 = vector.extract_strided_slice %223 {offsets = [0, 256], sizes = [8, 64], strides = [1, 1]} : vector<8x384xf32> to vector<8x64xf32>
    %239 = arith.addf %238, %31 : vector<8x64xf32>
    %240 = arith.mulf %230, %239 : vector<8x64xf32>
    %241 = arith.addf %237, %240 : vector<8x64xf32>
    %242 = math.tanh %241 : vector<8x64xf32>
    %cst_62 = arith.constant 1.000000e+00 : f32
    %243 = vector.broadcast %cst_62 : f32 to vector<8x64xf32>
    %244 = arith.subf %243, %236 : vector<8x64xf32>
    %245 = arith.mulf %244, %242 : vector<8x64xf32>
    %246 = arith.mulf %236, %217 : vector<8x64xf32>
    %247 = arith.addf %245, %246 : vector<8x64xf32>
    %c56 = arith.constant 56 : index
    %c0_63 = arith.constant 0 : index
    %248 = vector.load %arg7[%c56, %c0_63] : memref<128x384xf32, #tpu.memory_space<vmem>>, vector<8x384xf32>
    %c64 = arith.constant 64 : index
    %c0_64 = arith.constant 0 : index
    %249 = vector.load %arg7[%c64, %c0_64] : memref<128x384xf32, #tpu.memory_space<vmem>>, vector<8x384xf32>
    %250 = vector.shape_cast %18 : vector<1x384xi1> to vector<1x384xi1>
    %251 = vector.broadcast %250 : vector<1x384xi1> to vector<8x384xi1>
    %252 = arith.select %251, %248, %249 : vector<8x384xi1>, vector<8x384xf32>
    %cst_65 = arith.constant dense<0.000000e+00> : vector<8x384xf32>
    %253 = tpu.matmul %247, %25, %cst_65 {dimension_numbers = #tpu.dot_dimension_numbers<[1], [0], [0], [1], [0, 0, 1, 1], [], []>} : vector<8x64xf32>, vector<64x384xf32>, vector<8x384xf32> -> vector<8x384xf32>
    %254 = arith.addf %252, %253 : vector<8x384xf32>
    %255 = vector.extract_strided_slice %254 {offsets = [0, 0], sizes = [8, 64], strides = [1, 1]} : vector<8x384xf32> to vector<8x64xf32>
    %256 = arith.negf %255 : vector<8x64xf32>
    %257 = math.exp %256 : vector<8x64xf32>
    %cst_66 = arith.constant 1.000000e+00 : f32
    %258 = vector.broadcast %cst_66 : f32 to vector<8x64xf32>
    %259 = arith.addf %258, %257 : vector<8x64xf32>
    %260 = arith.divf %258, %259 : vector<8x64xf32>
    %261 = vector.extract_strided_slice %254 {offsets = [0, 128], sizes = [8, 64], strides = [1, 1]} : vector<8x384xf32> to vector<8x64xf32>
    %262 = arith.negf %261 : vector<8x64xf32>
    %263 = math.exp %262 : vector<8x64xf32>
    %cst_67 = arith.constant 1.000000e+00 : f32
    %264 = vector.broadcast %cst_67 : f32 to vector<8x64xf32>
    %265 = arith.addf %264, %263 : vector<8x64xf32>
    %266 = arith.divf %264, %265 : vector<8x64xf32>
    %267 = vector.extract_strided_slice %252 {offsets = [0, 256], sizes = [8, 64], strides = [1, 1]} : vector<8x384xf32> to vector<8x64xf32>
    %268 = vector.extract_strided_slice %253 {offsets = [0, 256], sizes = [8, 64], strides = [1, 1]} : vector<8x384xf32> to vector<8x64xf32>
    %269 = arith.addf %268, %31 : vector<8x64xf32>
    %270 = arith.mulf %260, %269 : vector<8x64xf32>
    %271 = arith.addf %267, %270 : vector<8x64xf32>
    %272 = math.tanh %271 : vector<8x64xf32>
    %cst_68 = arith.constant 1.000000e+00 : f32
    %273 = vector.broadcast %cst_68 : f32 to vector<8x64xf32>
    %274 = arith.subf %273, %266 : vector<8x64xf32>
    %275 = arith.mulf %274, %272 : vector<8x64xf32>
    %276 = arith.mulf %266, %247 : vector<8x64xf32>
    %277 = arith.addf %275, %276 : vector<8x64xf32>
    %c64_69 = arith.constant 64 : index
    %c0_70 = arith.constant 0 : index
    %278 = vector.load %arg7[%c64_69, %c0_70] : memref<128x384xf32, #tpu.memory_space<vmem>>, vector<8x384xf32>
    %c56_71 = arith.constant 56 : index
    %c0_72 = arith.constant 0 : index
    %279 = vector.load %arg7[%c56_71, %c0_72] : memref<128x384xf32, #tpu.memory_space<vmem>>, vector<8x384xf32>
    %280 = vector.shape_cast %18 : vector<1x384xi1> to vector<1x384xi1>
    %281 = vector.broadcast %280 : vector<1x384xi1> to vector<8x384xi1>
    %282 = arith.select %281, %278, %279 : vector<8x384xi1>, vector<8x384xf32>
    %cst_73 = arith.constant dense<0.000000e+00> : vector<8x384xf32>
    %283 = tpu.matmul %277, %25, %cst_73 {dimension_numbers = #tpu.dot_dimension_numbers<[1], [0], [0], [1], [0, 0, 1, 1], [], []>} : vector<8x64xf32>, vector<64x384xf32>, vector<8x384xf32> -> vector<8x384xf32>
    %284 = arith.addf %282, %283 : vector<8x384xf32>
    %285 = vector.extract_strided_slice %284 {offsets = [0, 0], sizes = [8, 64], strides = [1, 1]} : vector<8x384xf32> to vector<8x64xf32>
    %286 = arith.negf %285 : vector<8x64xf32>
    %287 = math.exp %286 : vector<8x64xf32>
    %cst_74 = arith.constant 1.000000e+00 : f32
    %288 = vector.broadcast %cst_74 : f32 to vector<8x64xf32>
    %289 = arith.addf %288, %287 : vector<8x64xf32>
    %290 = arith.divf %288, %289 : vector<8x64xf32>
    %291 = vector.extract_strided_slice %284 {offsets = [0, 128], sizes = [8, 64], strides = [1, 1]} : vector<8x384xf32> to vector<8x64xf32>
    %292 = arith.negf %291 : vector<8x64xf32>
    %293 = math.exp %292 : vector<8x64xf32>
    %cst_75 = arith.constant 1.000000e+00 : f32
    %294 = vector.broadcast %cst_75 : f32 to vector<8x64xf32>
    %295 = arith.addf %294, %293 : vector<8x64xf32>
    %296 = arith.divf %294, %295 : vector<8x64xf32>
    %297 = vector.extract_strided_slice %282 {offsets = [0, 256], sizes = [8, 64], strides = [1, 1]} : vector<8x384xf32> to vector<8x64xf32>
    %298 = vector.extract_strided_slice %283 {offsets = [0, 256], sizes = [8, 64], strides = [1, 1]} : vector<8x384xf32> to vector<8x64xf32>
    %299 = arith.addf %298, %31 : vector<8x64xf32>
    %300 = arith.mulf %290, %299 : vector<8x64xf32>
    %301 = arith.addf %297, %300 : vector<8x64xf32>
    %302 = math.tanh %301 : vector<8x64xf32>
    %cst_76 = arith.constant 1.000000e+00 : f32
    %303 = vector.broadcast %cst_76 : f32 to vector<8x64xf32>
    %304 = arith.subf %303, %296 : vector<8x64xf32>
    %305 = arith.mulf %304, %302 : vector<8x64xf32>
    %306 = arith.mulf %296, %277 : vector<8x64xf32>
    %307 = arith.addf %305, %306 : vector<8x64xf32>
    %c72_77 = arith.constant 72 : index
    %c0_78 = arith.constant 0 : index
    %308 = vector.load %arg7[%c72_77, %c0_78] : memref<128x384xf32, #tpu.memory_space<vmem>>, vector<8x384xf32>
    %c48_79 = arith.constant 48 : index
    %c0_80 = arith.constant 0 : index
    %309 = vector.load %arg7[%c48_79, %c0_80] : memref<128x384xf32, #tpu.memory_space<vmem>>, vector<8x384xf32>
    %310 = vector.shape_cast %18 : vector<1x384xi1> to vector<1x384xi1>
    %311 = vector.broadcast %310 : vector<1x384xi1> to vector<8x384xi1>
    %312 = arith.select %311, %308, %309 : vector<8x384xi1>, vector<8x384xf32>
    %cst_81 = arith.constant dense<0.000000e+00> : vector<8x384xf32>
    %313 = tpu.matmul %307, %25, %cst_81 {dimension_numbers = #tpu.dot_dimension_numbers<[1], [0], [0], [1], [0, 0, 1, 1], [], []>} : vector<8x64xf32>, vector<64x384xf32>, vector<8x384xf32> -> vector<8x384xf32>
    %314 = arith.addf %312, %313 : vector<8x384xf32>
    %315 = vector.extract_strided_slice %314 {offsets = [0, 0], sizes = [8, 64], strides = [1, 1]} : vector<8x384xf32> to vector<8x64xf32>
    %316 = arith.negf %315 : vector<8x64xf32>
    %317 = math.exp %316 : vector<8x64xf32>
    %cst_82 = arith.constant 1.000000e+00 : f32
    %318 = vector.broadcast %cst_82 : f32 to vector<8x64xf32>
    %319 = arith.addf %318, %317 : vector<8x64xf32>
    %320 = arith.divf %318, %319 : vector<8x64xf32>
    %321 = vector.extract_strided_slice %314 {offsets = [0, 128], sizes = [8, 64], strides = [1, 1]} : vector<8x384xf32> to vector<8x64xf32>
    %322 = arith.negf %321 : vector<8x64xf32>
    %323 = math.exp %322 : vector<8x64xf32>
    %cst_83 = arith.constant 1.000000e+00 : f32
    %324 = vector.broadcast %cst_83 : f32 to vector<8x64xf32>
    %325 = arith.addf %324, %323 : vector<8x64xf32>
    %326 = arith.divf %324, %325 : vector<8x64xf32>
    %327 = vector.extract_strided_slice %312 {offsets = [0, 256], sizes = [8, 64], strides = [1, 1]} : vector<8x384xf32> to vector<8x64xf32>
    %328 = vector.extract_strided_slice %313 {offsets = [0, 256], sizes = [8, 64], strides = [1, 1]} : vector<8x384xf32> to vector<8x64xf32>
    %329 = arith.addf %328, %31 : vector<8x64xf32>
    %330 = arith.mulf %320, %329 : vector<8x64xf32>
    %331 = arith.addf %327, %330 : vector<8x64xf32>
    %332 = math.tanh %331 : vector<8x64xf32>
    %cst_84 = arith.constant 1.000000e+00 : f32
    %333 = vector.broadcast %cst_84 : f32 to vector<8x64xf32>
    %334 = arith.subf %333, %326 : vector<8x64xf32>
    %335 = arith.mulf %334, %332 : vector<8x64xf32>
    %336 = arith.mulf %326, %307 : vector<8x64xf32>
    %337 = arith.addf %335, %336 : vector<8x64xf32>
    %c80_85 = arith.constant 80 : index
    %c0_86 = arith.constant 0 : index
    %338 = vector.load %arg7[%c80_85, %c0_86] : memref<128x384xf32, #tpu.memory_space<vmem>>, vector<8x384xf32>
    %c40_87 = arith.constant 40 : index
    %c0_88 = arith.constant 0 : index
    %339 = vector.load %arg7[%c40_87, %c0_88] : memref<128x384xf32, #tpu.memory_space<vmem>>, vector<8x384xf32>
    %340 = vector.shape_cast %18 : vector<1x384xi1> to vector<1x384xi1>
    %341 = vector.broadcast %340 : vector<1x384xi1> to vector<8x384xi1>
    %342 = arith.select %341, %338, %339 : vector<8x384xi1>, vector<8x384xf32>
    %cst_89 = arith.constant dense<0.000000e+00> : vector<8x384xf32>
    %343 = tpu.matmul %337, %25, %cst_89 {dimension_numbers = #tpu.dot_dimension_numbers<[1], [0], [0], [1], [0, 0, 1, 1], [], []>} : vector<8x64xf32>, vector<64x384xf32>, vector<8x384xf32> -> vector<8x384xf32>
    %344 = arith.addf %342, %343 : vector<8x384xf32>
    %345 = vector.extract_strided_slice %344 {offsets = [0, 0], sizes = [8, 64], strides = [1, 1]} : vector<8x384xf32> to vector<8x64xf32>
    %346 = arith.negf %345 : vector<8x64xf32>
    %347 = math.exp %346 : vector<8x64xf32>
    %cst_90 = arith.constant 1.000000e+00 : f32
    %348 = vector.broadcast %cst_90 : f32 to vector<8x64xf32>
    %349 = arith.addf %348, %347 : vector<8x64xf32>
    %350 = arith.divf %348, %349 : vector<8x64xf32>
    %351 = vector.extract_strided_slice %344 {offsets = [0, 128], sizes = [8, 64], strides = [1, 1]} : vector<8x384xf32> to vector<8x64xf32>
    %352 = arith.negf %351 : vector<8x64xf32>
    %353 = math.exp %352 : vector<8x64xf32>
    %cst_91 = arith.constant 1.000000e+00 : f32
    %354 = vector.broadcast %cst_91 : f32 to vector<8x64xf32>
    %355 = arith.addf %354, %353 : vector<8x64xf32>
    %356 = arith.divf %354, %355 : vector<8x64xf32>
    %357 = vector.extract_strided_slice %342 {offsets = [0, 256], sizes = [8, 64], strides = [1, 1]} : vector<8x384xf32> to vector<8x64xf32>
    %358 = vector.extract_strided_slice %343 {offsets = [0, 256], sizes = [8, 64], strides = [1, 1]} : vector<8x384xf32> to vector<8x64xf32>
    %359 = arith.addf %358, %31 : vector<8x64xf32>
    %360 = arith.mulf %350, %359 : vector<8x64xf32>
    %361 = arith.addf %357, %360 : vector<8x64xf32>
    %362 = math.tanh %361 : vector<8x64xf32>
    %cst_92 = arith.constant 1.000000e+00 : f32
    %363 = vector.broadcast %cst_92 : f32 to vector<8x64xf32>
    %364 = arith.subf %363, %356 : vector<8x64xf32>
    %365 = arith.mulf %364, %362 : vector<8x64xf32>
    %366 = arith.mulf %356, %337 : vector<8x64xf32>
    %367 = arith.addf %365, %366 : vector<8x64xf32>
    %c88_93 = arith.constant 88 : index
    %c0_94 = arith.constant 0 : index
    %368 = vector.load %arg7[%c88_93, %c0_94] : memref<128x384xf32, #tpu.memory_space<vmem>>, vector<8x384xf32>
    %c32_95 = arith.constant 32 : index
    %c0_96 = arith.constant 0 : index
    %369 = vector.load %arg7[%c32_95, %c0_96] : memref<128x384xf32, #tpu.memory_space<vmem>>, vector<8x384xf32>
    %370 = vector.shape_cast %18 : vector<1x384xi1> to vector<1x384xi1>
    %371 = vector.broadcast %370 : vector<1x384xi1> to vector<8x384xi1>
    %372 = arith.select %371, %368, %369 : vector<8x384xi1>, vector<8x384xf32>
    %cst_97 = arith.constant dense<0.000000e+00> : vector<8x384xf32>
    %373 = tpu.matmul %367, %25, %cst_97 {dimension_numbers = #tpu.dot_dimension_numbers<[1], [0], [0], [1], [0, 0, 1, 1], [], []>} : vector<8x64xf32>, vector<64x384xf32>, vector<8x384xf32> -> vector<8x384xf32>
    %374 = arith.addf %372, %373 : vector<8x384xf32>
    %375 = vector.extract_strided_slice %374 {offsets = [0, 0], sizes = [8, 64], strides = [1, 1]} : vector<8x384xf32> to vector<8x64xf32>
    %376 = arith.negf %375 : vector<8x64xf32>
    %377 = math.exp %376 : vector<8x64xf32>
    %cst_98 = arith.constant 1.000000e+00 : f32
    %378 = vector.broadcast %cst_98 : f32 to vector<8x64xf32>
    %379 = arith.addf %378, %377 : vector<8x64xf32>
    %380 = arith.divf %378, %379 : vector<8x64xf32>
    %381 = vector.extract_strided_slice %374 {offsets = [0, 128], sizes = [8, 64], strides = [1, 1]} : vector<8x384xf32> to vector<8x64xf32>
    %382 = arith.negf %381 : vector<8x64xf32>
    %383 = math.exp %382 : vector<8x64xf32>
    %cst_99 = arith.constant 1.000000e+00 : f32
    %384 = vector.broadcast %cst_99 : f32 to vector<8x64xf32>
    %385 = arith.addf %384, %383 : vector<8x64xf32>
    %386 = arith.divf %384, %385 : vector<8x64xf32>
    %387 = vector.extract_strided_slice %372 {offsets = [0, 256], sizes = [8, 64], strides = [1, 1]} : vector<8x384xf32> to vector<8x64xf32>
    %388 = vector.extract_strided_slice %373 {offsets = [0, 256], sizes = [8, 64], strides = [1, 1]} : vector<8x384xf32> to vector<8x64xf32>
    %389 = arith.addf %388, %31 : vector<8x64xf32>
    %390 = arith.mulf %380, %389 : vector<8x64xf32>
    %391 = arith.addf %387, %390 : vector<8x64xf32>
    %392 = math.tanh %391 : vector<8x64xf32>
    %cst_100 = arith.constant 1.000000e+00 : f32
    %393 = vector.broadcast %cst_100 : f32 to vector<8x64xf32>
    %394 = arith.subf %393, %386 : vector<8x64xf32>
    %395 = arith.mulf %394, %392 : vector<8x64xf32>
    %396 = arith.mulf %386, %367 : vector<8x64xf32>
    %397 = arith.addf %395, %396 : vector<8x64xf32>
    %c96_101 = arith.constant 96 : index
    %c0_102 = arith.constant 0 : index
    %398 = vector.load %arg7[%c96_101, %c0_102] : memref<128x384xf32, #tpu.memory_space<vmem>>, vector<8x384xf32>
    %c24_103 = arith.constant 24 : index
    %c0_104 = arith.constant 0 : index
    %399 = vector.load %arg7[%c24_103, %c0_104] : memref<128x384xf32, #tpu.memory_space<vmem>>, vector<8x384xf32>
    %400 = vector.shape_cast %18 : vector<1x384xi1> to vector<1x384xi1>
    %401 = vector.broadcast %400 : vector<1x384xi1> to vector<8x384xi1>
    %402 = arith.select %401, %398, %399 : vector<8x384xi1>, vector<8x384xf32>
    %cst_105 = arith.constant dense<0.000000e+00> : vector<8x384xf32>
    %403 = tpu.matmul %397, %25, %cst_105 {dimension_numbers = #tpu.dot_dimension_numbers<[1], [0], [0], [1], [0, 0, 1, 1], [], []>} : vector<8x64xf32>, vector<64x384xf32>, vector<8x384xf32> -> vector<8x384xf32>
    %404 = arith.addf %402, %403 : vector<8x384xf32>
    %405 = vector.extract_strided_slice %404 {offsets = [0, 0], sizes = [8, 64], strides = [1, 1]} : vector<8x384xf32> to vector<8x64xf32>
    %406 = arith.negf %405 : vector<8x64xf32>
    %407 = math.exp %406 : vector<8x64xf32>
    %cst_106 = arith.constant 1.000000e+00 : f32
    %408 = vector.broadcast %cst_106 : f32 to vector<8x64xf32>
    %409 = arith.addf %408, %407 : vector<8x64xf32>
    %410 = arith.divf %408, %409 : vector<8x64xf32>
    %411 = vector.extract_strided_slice %404 {offsets = [0, 128], sizes = [8, 64], strides = [1, 1]} : vector<8x384xf32> to vector<8x64xf32>
    %412 = arith.negf %411 : vector<8x64xf32>
    %413 = math.exp %412 : vector<8x64xf32>
    %cst_107 = arith.constant 1.000000e+00 : f32
    %414 = vector.broadcast %cst_107 : f32 to vector<8x64xf32>
    %415 = arith.addf %414, %413 : vector<8x64xf32>
    %416 = arith.divf %414, %415 : vector<8x64xf32>
    %417 = vector.extract_strided_slice %402 {offsets = [0, 256], sizes = [8, 64], strides = [1, 1]} : vector<8x384xf32> to vector<8x64xf32>
    %418 = vector.extract_strided_slice %403 {offsets = [0, 256], sizes = [8, 64], strides = [1, 1]} : vector<8x384xf32> to vector<8x64xf32>
    %419 = arith.addf %418, %31 : vector<8x64xf32>
    %420 = arith.mulf %410, %419 : vector<8x64xf32>
    %421 = arith.addf %417, %420 : vector<8x64xf32>
    %422 = math.tanh %421 : vector<8x64xf32>
    %cst_108 = arith.constant 1.000000e+00 : f32
    %423 = vector.broadcast %cst_108 : f32 to vector<8x64xf32>
    %424 = arith.subf %423, %416 : vector<8x64xf32>
    %425 = arith.mulf %424, %422 : vector<8x64xf32>
    %426 = arith.mulf %416, %397 : vector<8x64xf32>
    %427 = arith.addf %425, %426 : vector<8x64xf32>
    %c104_109 = arith.constant 104 : index
    %c0_110 = arith.constant 0 : index
    %428 = vector.load %arg7[%c104_109, %c0_110] : memref<128x384xf32, #tpu.memory_space<vmem>>, vector<8x384xf32>
    %c16_111 = arith.constant 16 : index
    %c0_112 = arith.constant 0 : index
    %429 = vector.load %arg7[%c16_111, %c0_112] : memref<128x384xf32, #tpu.memory_space<vmem>>, vector<8x384xf32>
    %430 = vector.shape_cast %18 : vector<1x384xi1> to vector<1x384xi1>
    %431 = vector.broadcast %430 : vector<1x384xi1> to vector<8x384xi1>
    %432 = arith.select %431, %428, %429 : vector<8x384xi1>, vector<8x384xf32>
    %cst_113 = arith.constant dense<0.000000e+00> : vector<8x384xf32>
    %433 = tpu.matmul %427, %25, %cst_113 {dimension_numbers = #tpu.dot_dimension_numbers<[1], [0], [0], [1], [0, 0, 1, 1], [], []>} : vector<8x64xf32>, vector<64x384xf32>, vector<8x384xf32> -> vector<8x384xf32>
    %434 = arith.addf %432, %433 : vector<8x384xf32>
    %435 = vector.extract_strided_slice %434 {offsets = [0, 0], sizes = [8, 64], strides = [1, 1]} : vector<8x384xf32> to vector<8x64xf32>
    %436 = arith.negf %435 : vector<8x64xf32>
    %437 = math.exp %436 : vector<8x64xf32>
    %cst_114 = arith.constant 1.000000e+00 : f32
    %438 = vector.broadcast %cst_114 : f32 to vector<8x64xf32>
    %439 = arith.addf %438, %437 : vector<8x64xf32>
    %440 = arith.divf %438, %439 : vector<8x64xf32>
    %441 = vector.extract_strided_slice %434 {offsets = [0, 128], sizes = [8, 64], strides = [1, 1]} : vector<8x384xf32> to vector<8x64xf32>
    %442 = arith.negf %441 : vector<8x64xf32>
    %443 = math.exp %442 : vector<8x64xf32>
    %cst_115 = arith.constant 1.000000e+00 : f32
    %444 = vector.broadcast %cst_115 : f32 to vector<8x64xf32>
    %445 = arith.addf %444, %443 : vector<8x64xf32>
    %446 = arith.divf %444, %445 : vector<8x64xf32>
    %447 = vector.extract_strided_slice %432 {offsets = [0, 256], sizes = [8, 64], strides = [1, 1]} : vector<8x384xf32> to vector<8x64xf32>
    %448 = vector.extract_strided_slice %433 {offsets = [0, 256], sizes = [8, 64], strides = [1, 1]} : vector<8x384xf32> to vector<8x64xf32>
    %449 = arith.addf %448, %31 : vector<8x64xf32>
    %450 = arith.mulf %440, %449 : vector<8x64xf32>
    %451 = arith.addf %447, %450 : vector<8x64xf32>
    %452 = math.tanh %451 : vector<8x64xf32>
    %cst_116 = arith.constant 1.000000e+00 : f32
    %453 = vector.broadcast %cst_116 : f32 to vector<8x64xf32>
    %454 = arith.subf %453, %446 : vector<8x64xf32>
    %455 = arith.mulf %454, %452 : vector<8x64xf32>
    %456 = arith.mulf %446, %427 : vector<8x64xf32>
    %457 = arith.addf %455, %456 : vector<8x64xf32>
    %c112_117 = arith.constant 112 : index
    %c0_118 = arith.constant 0 : index
    %458 = vector.load %arg7[%c112_117, %c0_118] : memref<128x384xf32, #tpu.memory_space<vmem>>, vector<8x384xf32>
    %c8_119 = arith.constant 8 : index
    %c0_120 = arith.constant 0 : index
    %459 = vector.load %arg7[%c8_119, %c0_120] : memref<128x384xf32, #tpu.memory_space<vmem>>, vector<8x384xf32>
    %460 = vector.shape_cast %18 : vector<1x384xi1> to vector<1x384xi1>
    %461 = vector.broadcast %460 : vector<1x384xi1> to vector<8x384xi1>
    %462 = arith.select %461, %458, %459 : vector<8x384xi1>, vector<8x384xf32>
    %cst_121 = arith.constant dense<0.000000e+00> : vector<8x384xf32>
    %463 = tpu.matmul %457, %25, %cst_121 {dimension_numbers = #tpu.dot_dimension_numbers<[1], [0], [0], [1], [0, 0, 1, 1], [], []>} : vector<8x64xf32>, vector<64x384xf32>, vector<8x384xf32> -> vector<8x384xf32>
    %464 = arith.addf %462, %463 : vector<8x384xf32>
    %465 = vector.extract_strided_slice %464 {offsets = [0, 0], sizes = [8, 64], strides = [1, 1]} : vector<8x384xf32> to vector<8x64xf32>
    %466 = arith.negf %465 : vector<8x64xf32>
    %467 = math.exp %466 : vector<8x64xf32>
    %cst_122 = arith.constant 1.000000e+00 : f32
    %468 = vector.broadcast %cst_122 : f32 to vector<8x64xf32>
    %469 = arith.addf %468, %467 : vector<8x64xf32>
    %470 = arith.divf %468, %469 : vector<8x64xf32>
    %471 = vector.extract_strided_slice %464 {offsets = [0, 128], sizes = [8, 64], strides = [1, 1]} : vector<8x384xf32> to vector<8x64xf32>
    %472 = arith.negf %471 : vector<8x64xf32>
    %473 = math.exp %472 : vector<8x64xf32>
    %cst_123 = arith.constant 1.000000e+00 : f32
    %474 = vector.broadcast %cst_123 : f32 to vector<8x64xf32>
    %475 = arith.addf %474, %473 : vector<8x64xf32>
    %476 = arith.divf %474, %475 : vector<8x64xf32>
    %477 = vector.extract_strided_slice %462 {offsets = [0, 256], sizes = [8, 64], strides = [1, 1]} : vector<8x384xf32> to vector<8x64xf32>
    %478 = vector.extract_strided_slice %463 {offsets = [0, 256], sizes = [8, 64], strides = [1, 1]} : vector<8x384xf32> to vector<8x64xf32>
    %479 = arith.addf %478, %31 : vector<8x64xf32>
    %480 = arith.mulf %470, %479 : vector<8x64xf32>
    %481 = arith.addf %477, %480 : vector<8x64xf32>
    %482 = math.tanh %481 : vector<8x64xf32>
    %cst_124 = arith.constant 1.000000e+00 : f32
    %483 = vector.broadcast %cst_124 : f32 to vector<8x64xf32>
    %484 = arith.subf %483, %476 : vector<8x64xf32>
    %485 = arith.mulf %484, %482 : vector<8x64xf32>
    %486 = arith.mulf %476, %457 : vector<8x64xf32>
    %487 = arith.addf %485, %486 : vector<8x64xf32>
    %c120_125 = arith.constant 120 : index
    %c0_126 = arith.constant 0 : index
    %488 = vector.load %arg7[%c120_125, %c0_126] : memref<128x384xf32, #tpu.memory_space<vmem>>, vector<8x384xf32>
    %c0_127 = arith.constant 0 : index
    %c0_128 = arith.constant 0 : index
    %489 = vector.load %arg7[%c0_127, %c0_128] : memref<128x384xf32, #tpu.memory_space<vmem>>, vector<8x384xf32>
    %490 = vector.shape_cast %18 : vector<1x384xi1> to vector<1x384xi1>
    %491 = vector.broadcast %490 : vector<1x384xi1> to vector<8x384xi1>
    %492 = arith.select %491, %488, %489 : vector<8x384xi1>, vector<8x384xf32>
    %cst_129 = arith.constant dense<0.000000e+00> : vector<8x384xf32>
    %493 = tpu.matmul %487, %25, %cst_129 {dimension_numbers = #tpu.dot_dimension_numbers<[1], [0], [0], [1], [0, 0, 1, 1], [], []>} : vector<8x64xf32>, vector<64x384xf32>, vector<8x384xf32> -> vector<8x384xf32>
    %494 = arith.addf %492, %493 : vector<8x384xf32>
    %495 = vector.extract_strided_slice %494 {offsets = [0, 0], sizes = [8, 64], strides = [1, 1]} : vector<8x384xf32> to vector<8x64xf32>
    %496 = arith.negf %495 : vector<8x64xf32>
    %497 = math.exp %496 : vector<8x64xf32>
    %cst_130 = arith.constant 1.000000e+00 : f32
    %498 = vector.broadcast %cst_130 : f32 to vector<8x64xf32>
    %499 = arith.addf %498, %497 : vector<8x64xf32>
    %500 = arith.divf %498, %499 : vector<8x64xf32>
    %501 = vector.extract_strided_slice %494 {offsets = [0, 128], sizes = [8, 64], strides = [1, 1]} : vector<8x384xf32> to vector<8x64xf32>
    %502 = arith.negf %501 : vector<8x64xf32>
    %503 = math.exp %502 : vector<8x64xf32>
    %cst_131 = arith.constant 1.000000e+00 : f32
    %504 = vector.broadcast %cst_131 : f32 to vector<8x64xf32>
    %505 = arith.addf %504, %503 : vector<8x64xf32>
    %506 = arith.divf %504, %505 : vector<8x64xf32>
    %507 = vector.extract_strided_slice %492 {offsets = [0, 256], sizes = [8, 64], strides = [1, 1]} : vector<8x384xf32> to vector<8x64xf32>
    %508 = vector.extract_strided_slice %493 {offsets = [0, 256], sizes = [8, 64], strides = [1, 1]} : vector<8x384xf32> to vector<8x64xf32>
    %509 = arith.addf %508, %31 : vector<8x64xf32>
    %510 = arith.mulf %500, %509 : vector<8x64xf32>
    %511 = arith.addf %507, %510 : vector<8x64xf32>
    %512 = math.tanh %511 : vector<8x64xf32>
    %cst_132 = arith.constant 1.000000e+00 : f32
    %513 = vector.broadcast %cst_132 : f32 to vector<8x64xf32>
    %514 = arith.subf %513, %506 : vector<8x64xf32>
    %515 = arith.mulf %514, %512 : vector<8x64xf32>
    %516 = arith.mulf %506, %487 : vector<8x64xf32>
    %517 = arith.addf %515, %516 : vector<8x64xf32>
    %518 = vector.shape_cast %21 : vector<1x64xi1> to vector<1x64xi1>
    %519 = vector.broadcast %518 : vector<1x64xi1> to vector<8x64xi1>
    %520 = arith.select %519, %67, %517 : vector<8x64xi1>, vector<8x64xf32>
    %521 = vector.shape_cast %21 : vector<1x64xi1> to vector<1x64xi1>
    %522 = vector.broadcast %521 : vector<1x64xi1> to vector<8x64xi1>
    %523 = arith.select %522, %97, %487 : vector<8x64xi1>, vector<8x64xf32>
    %524 = vector.shape_cast %21 : vector<1x64xi1> to vector<1x64xi1>
    %525 = vector.broadcast %524 : vector<1x64xi1> to vector<8x64xi1>
    %526 = arith.select %525, %127, %457 : vector<8x64xi1>, vector<8x64xf32>
    %527 = vector.shape_cast %21 : vector<1x64xi1> to vector<1x64xi1>
    %528 = vector.broadcast %527 : vector<1x64xi1> to vector<8x64xi1>
    %529 = arith.select %528, %157, %427 : vector<8x64xi1>, vector<8x64xf32>
    %530 = vector.shape_cast %21 : vector<1x64xi1> to vector<1x64xi1>
    %531 = vector.broadcast %530 : vector<1x64xi1> to vector<8x64xi1>
    %532 = arith.select %531, %187, %397 : vector<8x64xi1>, vector<8x64xf32>
    %533 = vector.shape_cast %21 : vector<1x64xi1> to vector<1x64xi1>
    %534 = vector.broadcast %533 : vector<1x64xi1> to vector<8x64xi1>
    %535 = arith.select %534, %217, %367 : vector<8x64xi1>, vector<8x64xf32>
    %536 = vector.shape_cast %21 : vector<1x64xi1> to vector<1x64xi1>
    %537 = vector.broadcast %536 : vector<1x64xi1> to vector<8x64xi1>
    %538 = arith.select %537, %247, %337 : vector<8x64xi1>, vector<8x64xf32>
    %539 = vector.shape_cast %21 : vector<1x64xi1> to vector<1x64xi1>
    %540 = vector.broadcast %539 : vector<1x64xi1> to vector<8x64xi1>
    %541 = arith.select %540, %277, %307 : vector<8x64xi1>, vector<8x64xf32>
    %542 = vector.shape_cast %21 : vector<1x64xi1> to vector<1x64xi1>
    %543 = vector.broadcast %542 : vector<1x64xi1> to vector<8x64xi1>
    %544 = arith.select %543, %307, %277 : vector<8x64xi1>, vector<8x64xf32>
    %545 = vector.shape_cast %21 : vector<1x64xi1> to vector<1x64xi1>
    %546 = vector.broadcast %545 : vector<1x64xi1> to vector<8x64xi1>
    %547 = arith.select %546, %337, %247 : vector<8x64xi1>, vector<8x64xf32>
    %548 = vector.shape_cast %21 : vector<1x64xi1> to vector<1x64xi1>
    %549 = vector.broadcast %548 : vector<1x64xi1> to vector<8x64xi1>
    %550 = arith.select %549, %367, %217 : vector<8x64xi1>, vector<8x64xf32>
    %551 = vector.shape_cast %21 : vector<1x64xi1> to vector<1x64xi1>
    %552 = vector.broadcast %551 : vector<1x64xi1> to vector<8x64xi1>
    %553 = arith.select %552, %397, %187 : vector<8x64xi1>, vector<8x64xf32>
    %554 = vector.shape_cast %21 : vector<1x64xi1> to vector<1x64xi1>
    %555 = vector.broadcast %554 : vector<1x64xi1> to vector<8x64xi1>
    %556 = arith.select %555, %427, %157 : vector<8x64xi1>, vector<8x64xf32>
    %557 = vector.shape_cast %21 : vector<1x64xi1> to vector<1x64xi1>
    %558 = vector.broadcast %557 : vector<1x64xi1> to vector<8x64xi1>
    %559 = arith.select %558, %457, %127 : vector<8x64xi1>, vector<8x64xf32>
    %560 = vector.shape_cast %21 : vector<1x64xi1> to vector<1x64xi1>
    %561 = vector.broadcast %560 : vector<1x64xi1> to vector<8x64xi1>
    %562 = arith.select %561, %487, %97 : vector<8x64xi1>, vector<8x64xf32>
    %563 = vector.shape_cast %21 : vector<1x64xi1> to vector<1x64xi1>
    %564 = vector.broadcast %563 : vector<1x64xi1> to vector<8x64xi1>
    %565 = arith.select %564, %517, %67 : vector<8x64xi1>, vector<8x64xf32>
    %566 = tpu.concatenate %520, %523, %526, %529, %532, %535, %538, %541, %544, %547, %550, %553, %556, %559, %562, %565 in 0 : vector<8x64xf32>, vector<8x64xf32>, vector<8x64xf32>, vector<8x64xf32>, vector<8x64xf32>, vector<8x64xf32>, vector<8x64xf32>, vector<8x64xf32>, vector<8x64xf32>, vector<8x64xf32>, vector<8x64xf32>, vector<8x64xf32>, vector<8x64xf32>, vector<8x64xf32>, vector<8x64xf32>, vector<8x64xf32> -> vector<128x64xf32>
    %c1 = arith.constant 1 : index
    %c0_133 = arith.constant 0 : index
    %c0_134 = arith.constant 0 : index
    %567 = vector.load %arg2[%c1, %c0_133, %c0_134] : memref<2x64x384xf32, #tpu.memory_space<vmem>>, vector<1x64x384xf32>
    %568 = vector.shape_cast %567 : vector<1x64x384xf32> to vector<64x384xf32>
    %c1_135 = arith.constant 1 : index
    %c0_136 = arith.constant 0 : index
    %c0_137 = arith.constant 0 : index
    %569 = vector.load %arg3[%c1_135, %c0_136, %c0_137] : memref<2x64x384xf32, #tpu.memory_space<vmem>>, vector<1x64x384xf32>
    %570 = vector.shape_cast %569 : vector<1x64x384xf32> to vector<64x384xf32>
    %c1_138 = arith.constant 1 : index
    %c0_139 = arith.constant 0 : index
    %c0_140 = arith.constant 0 : index
    %571 = vector.load %arg4[%c1_138, %c0_139, %c0_140] : memref<2x1x384xf32, #tpu.memory_space<vmem>>, vector<1x1x384xf32>
    %572 = vector.shape_cast %571 : vector<1x1x384xf32> to vector<1x384xf32>
    %c1_141 = arith.constant 1 : index
    %c0_142 = arith.constant 0 : index
    %c0_143 = arith.constant 0 : index
    %573 = vector.load %arg5[%c1_141, %c0_142, %c0_143] : memref<2x1x64xf32, #tpu.memory_space<vmem>>, vector<1x1x64xf32>
    %574 = vector.shape_cast %573 : vector<1x1x64xf32> to vector<1x64xf32>
    %575 = vector.shape_cast %574 : vector<1x64xf32> to vector<1x64xf32>
    %576 = vector.broadcast %575 : vector<1x64xf32> to vector<8x64xf32>
    %cst_144 = arith.constant dense<0.000000e+00> : vector<128x384xf32>
    %577 = tpu.matmul %566, %568, %cst_144 {dimension_numbers = #tpu.dot_dimension_numbers<[1], [0], [0], [1], [0, 0, 1, 1], [], []>} : vector<128x64xf32>, vector<64x384xf32>, vector<128x384xf32> -> vector<128x384xf32>
    %578 = vector.broadcast %572 : vector<1x384xf32> to vector<128x384xf32>
    %579 = arith.addf %577, %578 : vector<128x384xf32>
    %c0_145 = arith.constant 0 : index
    %c0_146 = arith.constant 0 : index
    %580 = vector.load %arg7[%c0_145, %c0_146] : memref<128x384xf32, #tpu.memory_space<vmem>>, vector<128x384xf32>
    tpu.vector_store %arg7[%c0_145, %c0_146], %579 {strides = array<i32>} : memref<128x384xf32, #tpu.memory_space<vmem>>, vector<128x384xf32>,
    %cst_147 = arith.constant 0.000000e+00 : f32
    %581 = vector.broadcast %cst_147 : f32 to vector<8x64xf32>
    %c0_148 = arith.constant 0 : index
    %c0_149 = arith.constant 0 : index
    %582 = vector.load %arg7[%c0_148, %c0_149] : memref<128x384xf32, #tpu.memory_space<vmem>>, vector<8x384xf32>
    %c120_150 = arith.constant 120 : index
    %c0_151 = arith.constant 0 : index
    %583 = vector.load %arg7[%c120_150, %c0_151] : memref<128x384xf32, #tpu.memory_space<vmem>>, vector<8x384xf32>
    %584 = vector.shape_cast %18 : vector<1x384xi1> to vector<1x384xi1>
    %585 = vector.broadcast %584 : vector<1x384xi1> to vector<8x384xi1>
    %586 = arith.select %585, %582, %583 : vector<8x384xi1>, vector<8x384xf32>
    %cst_152 = arith.constant dense<0.000000e+00> : vector<8x384xf32>
    %587 = tpu.matmul %581, %570, %cst_152 {dimension_numbers = #tpu.dot_dimension_numbers<[1], [0], [0], [1], [0, 0, 1, 1], [], []>} : vector<8x64xf32>, vector<64x384xf32>, vector<8x384xf32> -> vector<8x384xf32>
    %588 = arith.addf %586, %587 : vector<8x384xf32>
    %589 = vector.extract_strided_slice %588 {offsets = [0, 0], sizes = [8, 64], strides = [1, 1]} : vector<8x384xf32> to vector<8x64xf32>
    %590 = arith.negf %589 : vector<8x64xf32>
    %591 = math.exp %590 : vector<8x64xf32>
    %cst_153 = arith.constant 1.000000e+00 : f32
    %592 = vector.broadcast %cst_153 : f32 to vector<8x64xf32>
    %593 = arith.addf %592, %591 : vector<8x64xf32>
    %594 = arith.divf %592, %593 : vector<8x64xf32>
    %595 = vector.extract_strided_slice %588 {offsets = [0, 128], sizes = [8, 64], strides = [1, 1]} : vector<8x384xf32> to vector<8x64xf32>
    %596 = arith.negf %595 : vector<8x64xf32>
    %597 = math.exp %596 : vector<8x64xf32>
    %cst_154 = arith.constant 1.000000e+00 : f32
    %598 = vector.broadcast %cst_154 : f32 to vector<8x64xf32>
    %599 = arith.addf %598, %597 : vector<8x64xf32>
    %600 = arith.divf %598, %599 : vector<8x64xf32>
    %601 = vector.extract_strided_slice %586 {offsets = [0, 256], sizes = [8, 64], strides = [1, 1]} : vector<8x384xf32> to vector<8x64xf32>
    %602 = vector.extract_strided_slice %587 {offsets = [0, 256], sizes = [8, 64], strides = [1, 1]} : vector<8x384xf32> to vector<8x64xf32>
    %603 = arith.addf %602, %576 : vector<8x64xf32>
    %604 = arith.mulf %594, %603 : vector<8x64xf32>
    %605 = arith.addf %601, %604 : vector<8x64xf32>
    %606 = math.tanh %605 : vector<8x64xf32>
    %cst_155 = arith.constant 1.000000e+00 : f32
    %607 = vector.broadcast %cst_155 : f32 to vector<8x64xf32>
    %608 = arith.subf %607, %600 : vector<8x64xf32>
    %609 = arith.mulf %608, %606 : vector<8x64xf32>
    %610 = arith.mulf %600, %581 : vector<8x64xf32>
    %611 = arith.addf %609, %610 : vector<8x64xf32>
    %c8_156 = arith.constant 8 : index
    %c0_157 = arith.constant 0 : index
    %612 = vector.load %arg7[%c8_156, %c0_157] : memref<128x384xf32, #tpu.memory_space<vmem>>, vector<8x384xf32>
    %c112_158 = arith.constant 112 : index
    %c0_159 = arith.constant 0 : index
    %613 = vector.load %arg7[%c112_158, %c0_159] : memref<128x384xf32, #tpu.memory_space<vmem>>, vector<8x384xf32>
    %614 = vector.shape_cast %18 : vector<1x384xi1> to vector<1x384xi1>
    %615 = vector.broadcast %614 : vector<1x384xi1> to vector<8x384xi1>
    %616 = arith.select %615, %612, %613 : vector<8x384xi1>, vector<8x384xf32>
    %cst_160 = arith.constant dense<0.000000e+00> : vector<8x384xf32>
    %617 = tpu.matmul %611, %570, %cst_160 {dimension_numbers = #tpu.dot_dimension_numbers<[1], [0], [0], [1], [0, 0, 1, 1], [], []>} : vector<8x64xf32>, vector<64x384xf32>, vector<8x384xf32> -> vector<8x384xf32>
    %618 = arith.addf %616, %617 : vector<8x384xf32>
    %619 = vector.extract_strided_slice %618 {offsets = [0, 0], sizes = [8, 64], strides = [1, 1]} : vector<8x384xf32> to vector<8x64xf32>
    %620 = arith.negf %619 : vector<8x64xf32>
    %621 = math.exp %620 : vector<8x64xf32>
    %cst_161 = arith.constant 1.000000e+00 : f32
    %622 = vector.broadcast %cst_161 : f32 to vector<8x64xf32>
    %623 = arith.addf %622, %621 : vector<8x64xf32>
    %624 = arith.divf %622, %623 : vector<8x64xf32>
    %625 = vector.extract_strided_slice %618 {offsets = [0, 128], sizes = [8, 64], strides = [1, 1]} : vector<8x384xf32> to vector<8x64xf32>
    %626 = arith.negf %625 : vector<8x64xf32>
    %627 = math.exp %626 : vector<8x64xf32>
    %cst_162 = arith.constant 1.000000e+00 : f32
    %628 = vector.broadcast %cst_162 : f32 to vector<8x64xf32>
    %629 = arith.addf %628, %627 : vector<8x64xf32>
    %630 = arith.divf %628, %629 : vector<8x64xf32>
    %631 = vector.extract_strided_slice %616 {offsets = [0, 256], sizes = [8, 64], strides = [1, 1]} : vector<8x384xf32> to vector<8x64xf32>
    %632 = vector.extract_strided_slice %617 {offsets = [0, 256], sizes = [8, 64], strides = [1, 1]} : vector<8x384xf32> to vector<8x64xf32>
    %633 = arith.addf %632, %576 : vector<8x64xf32>
    %634 = arith.mulf %624, %633 : vector<8x64xf32>
    %635 = arith.addf %631, %634 : vector<8x64xf32>
    %636 = math.tanh %635 : vector<8x64xf32>
    %cst_163 = arith.constant 1.000000e+00 : f32
    %637 = vector.broadcast %cst_163 : f32 to vector<8x64xf32>
    %638 = arith.subf %637, %630 : vector<8x64xf32>
    %639 = arith.mulf %638, %636 : vector<8x64xf32>
    %640 = arith.mulf %630, %611 : vector<8x64xf32>
    %641 = arith.addf %639, %640 : vector<8x64xf32>
    %c16_164 = arith.constant 16 : index
    %c0_165 = arith.constant 0 : index
    %642 = vector.load %arg7[%c16_164, %c0_165] : memref<128x384xf32, #tpu.memory_space<vmem>>, vector<8x384xf32>
    %c104_166 = arith.constant 104 : index
    %c0_167 = arith.constant 0 : index
    %643 = vector.load %arg7[%c104_166, %c0_167] : memref<128x384xf32, #tpu.memory_space<vmem>>, vector<8x384xf32>
    %644 = vector.shape_cast %18 : vector<1x384xi1> to vector<1x384xi1>
    %645 = vector.broadcast %644 : vector<1x384xi1> to vector<8x384xi1>
    %646 = arith.select %645, %642, %643 : vector<8x384xi1>, vector<8x384xf32>
    %cst_168 = arith.constant dense<0.000000e+00> : vector<8x384xf32>
    %647 = tpu.matmul %641, %570, %cst_168 {dimension_numbers = #tpu.dot_dimension_numbers<[1], [0], [0], [1], [0, 0, 1, 1], [], []>} : vector<8x64xf32>, vector<64x384xf32>, vector<8x384xf32> -> vector<8x384xf32>
    %648 = arith.addf %646, %647 : vector<8x384xf32>
    %649 = vector.extract_strided_slice %648 {offsets = [0, 0], sizes = [8, 64], strides = [1, 1]} : vector<8x384xf32> to vector<8x64xf32>
    %650 = arith.negf %649 : vector<8x64xf32>
    %651 = math.exp %650 : vector<8x64xf32>
    %cst_169 = arith.constant 1.000000e+00 : f32
    %652 = vector.broadcast %cst_169 : f32 to vector<8x64xf32>
    %653 = arith.addf %652, %651 : vector<8x64xf32>
    %654 = arith.divf %652, %653 : vector<8x64xf32>
    %655 = vector.extract_strided_slice %648 {offsets = [0, 128], sizes = [8, 64], strides = [1, 1]} : vector<8x384xf32> to vector<8x64xf32>
    %656 = arith.negf %655 : vector<8x64xf32>
    %657 = math.exp %656 : vector<8x64xf32>
    %cst_170 = arith.constant 1.000000e+00 : f32
    %658 = vector.broadcast %cst_170 : f32 to vector<8x64xf32>
    %659 = arith.addf %658, %657 : vector<8x64xf32>
    %660 = arith.divf %658, %659 : vector<8x64xf32>
    %661 = vector.extract_strided_slice %646 {offsets = [0, 256], sizes = [8, 64], strides = [1, 1]} : vector<8x384xf32> to vector<8x64xf32>
    %662 = vector.extract_strided_slice %647 {offsets = [0, 256], sizes = [8, 64], strides = [1, 1]} : vector<8x384xf32> to vector<8x64xf32>
    %663 = arith.addf %662, %576 : vector<8x64xf32>
    %664 = arith.mulf %654, %663 : vector<8x64xf32>
    %665 = arith.addf %661, %664 : vector<8x64xf32>
    %666 = math.tanh %665 : vector<8x64xf32>
    %cst_171 = arith.constant 1.000000e+00 : f32
    %667 = vector.broadcast %cst_171 : f32 to vector<8x64xf32>
    %668 = arith.subf %667, %660 : vector<8x64xf32>
    %669 = arith.mulf %668, %666 : vector<8x64xf32>
    %670 = arith.mulf %660, %641 : vector<8x64xf32>
    %671 = arith.addf %669, %670 : vector<8x64xf32>
    %c24_172 = arith.constant 24 : index
    %c0_173 = arith.constant 0 : index
    %672 = vector.load %arg7[%c24_172, %c0_173] : memref<128x384xf32, #tpu.memory_space<vmem>>, vector<8x384xf32>
    %c96_174 = arith.constant 96 : index
    %c0_175 = arith.constant 0 : index
    %673 = vector.load %arg7[%c96_174, %c0_175] : memref<128x384xf32, #tpu.memory_space<vmem>>, vector<8x384xf32>
    %674 = vector.shape_cast %18 : vector<1x384xi1> to vector<1x384xi1>
    %675 = vector.broadcast %674 : vector<1x384xi1> to vector<8x384xi1>
    %676 = arith.select %675, %672, %673 : vector<8x384xi1>, vector<8x384xf32>
    %cst_176 = arith.constant dense<0.000000e+00> : vector<8x384xf32>
    %677 = tpu.matmul %671, %570, %cst_176 {dimension_numbers = #tpu.dot_dimension_numbers<[1], [0], [0], [1], [0, 0, 1, 1], [], []>} : vector<8x64xf32>, vector<64x384xf32>, vector<8x384xf32> -> vector<8x384xf32>
    %678 = arith.addf %676, %677 : vector<8x384xf32>
    %679 = vector.extract_strided_slice %678 {offsets = [0, 0], sizes = [8, 64], strides = [1, 1]} : vector<8x384xf32> to vector<8x64xf32>
    %680 = arith.negf %679 : vector<8x64xf32>
    %681 = math.exp %680 : vector<8x64xf32>
    %cst_177 = arith.constant 1.000000e+00 : f32
    %682 = vector.broadcast %cst_177 : f32 to vector<8x64xf32>
    %683 = arith.addf %682, %681 : vector<8x64xf32>
    %684 = arith.divf %682, %683 : vector<8x64xf32>
    %685 = vector.extract_strided_slice %678 {offsets = [0, 128], sizes = [8, 64], strides = [1, 1]} : vector<8x384xf32> to vector<8x64xf32>
    %686 = arith.negf %685 : vector<8x64xf32>
    %687 = math.exp %686 : vector<8x64xf32>
    %cst_178 = arith.constant 1.000000e+00 : f32
    %688 = vector.broadcast %cst_178 : f32 to vector<8x64xf32>
    %689 = arith.addf %688, %687 : vector<8x64xf32>
    %690 = arith.divf %688, %689 : vector<8x64xf32>
    %691 = vector.extract_strided_slice %676 {offsets = [0, 256], sizes = [8, 64], strides = [1, 1]} : vector<8x384xf32> to vector<8x64xf32>
    %692 = vector.extract_strided_slice %677 {offsets = [0, 256], sizes = [8, 64], strides = [1, 1]} : vector<8x384xf32> to vector<8x64xf32>
    %693 = arith.addf %692, %576 : vector<8x64xf32>
    %694 = arith.mulf %684, %693 : vector<8x64xf32>
    %695 = arith.addf %691, %694 : vector<8x64xf32>
    %696 = math.tanh %695 : vector<8x64xf32>
    %cst_179 = arith.constant 1.000000e+00 : f32
    %697 = vector.broadcast %cst_179 : f32 to vector<8x64xf32>
    %698 = arith.subf %697, %690 : vector<8x64xf32>
    %699 = arith.mulf %698, %696 : vector<8x64xf32>
    %700 = arith.mulf %690, %671 : vector<8x64xf32>
    %701 = arith.addf %699, %700 : vector<8x64xf32>
    %c32_180 = arith.constant 32 : index
    %c0_181 = arith.constant 0 : index
    %702 = vector.load %arg7[%c32_180, %c0_181] : memref<128x384xf32, #tpu.memory_space<vmem>>, vector<8x384xf32>
    %c88_182 = arith.constant 88 : index
    %c0_183 = arith.constant 0 : index
    %703 = vector.load %arg7[%c88_182, %c0_183] : memref<128x384xf32, #tpu.memory_space<vmem>>, vector<8x384xf32>
    %704 = vector.shape_cast %18 : vector<1x384xi1> to vector<1x384xi1>
    %705 = vector.broadcast %704 : vector<1x384xi1> to vector<8x384xi1>
    %706 = arith.select %705, %702, %703 : vector<8x384xi1>, vector<8x384xf32>
    %cst_184 = arith.constant dense<0.000000e+00> : vector<8x384xf32>
    %707 = tpu.matmul %701, %570, %cst_184 {dimension_numbers = #tpu.dot_dimension_numbers<[1], [0], [0], [1], [0, 0, 1, 1], [], []>} : vector<8x64xf32>, vector<64x384xf32>, vector<8x384xf32> -> vector<8x384xf32>
    %708 = arith.addf %706, %707 : vector<8x384xf32>
    %709 = vector.extract_strided_slice %708 {offsets = [0, 0], sizes = [8, 64], strides = [1, 1]} : vector<8x384xf32> to vector<8x64xf32>
    %710 = arith.negf %709 : vector<8x64xf32>
    %711 = math.exp %710 : vector<8x64xf32>
    %cst_185 = arith.constant 1.000000e+00 : f32
    %712 = vector.broadcast %cst_185 : f32 to vector<8x64xf32>
    %713 = arith.addf %712, %711 : vector<8x64xf32>
    %714 = arith.divf %712, %713 : vector<8x64xf32>
    %715 = vector.extract_strided_slice %708 {offsets = [0, 128], sizes = [8, 64], strides = [1, 1]} : vector<8x384xf32> to vector<8x64xf32>
    %716 = arith.negf %715 : vector<8x64xf32>
    %717 = math.exp %716 : vector<8x64xf32>
    %cst_186 = arith.constant 1.000000e+00 : f32
    %718 = vector.broadcast %cst_186 : f32 to vector<8x64xf32>
    %719 = arith.addf %718, %717 : vector<8x64xf32>
    %720 = arith.divf %718, %719 : vector<8x64xf32>
    %721 = vector.extract_strided_slice %706 {offsets = [0, 256], sizes = [8, 64], strides = [1, 1]} : vector<8x384xf32> to vector<8x64xf32>
    %722 = vector.extract_strided_slice %707 {offsets = [0, 256], sizes = [8, 64], strides = [1, 1]} : vector<8x384xf32> to vector<8x64xf32>
    %723 = arith.addf %722, %576 : vector<8x64xf32>
    %724 = arith.mulf %714, %723 : vector<8x64xf32>
    %725 = arith.addf %721, %724 : vector<8x64xf32>
    %726 = math.tanh %725 : vector<8x64xf32>
    %cst_187 = arith.constant 1.000000e+00 : f32
    %727 = vector.broadcast %cst_187 : f32 to vector<8x64xf32>
    %728 = arith.subf %727, %720 : vector<8x64xf32>
    %729 = arith.mulf %728, %726 : vector<8x64xf32>
    %730 = arith.mulf %720, %701 : vector<8x64xf32>
    %731 = arith.addf %729, %730 : vector<8x64xf32>
    %c40_188 = arith.constant 40 : index
    %c0_189 = arith.constant 0 : index
    %732 = vector.load %arg7[%c40_188, %c0_189] : memref<128x384xf32, #tpu.memory_space<vmem>>, vector<8x384xf32>
    %c80_190 = arith.constant 80 : index
    %c0_191 = arith.constant 0 : index
    %733 = vector.load %arg7[%c80_190, %c0_191] : memref<128x384xf32, #tpu.memory_space<vmem>>, vector<8x384xf32>
    %734 = vector.shape_cast %18 : vector<1x384xi1> to vector<1x384xi1>
    %735 = vector.broadcast %734 : vector<1x384xi1> to vector<8x384xi1>
    %736 = arith.select %735, %732, %733 : vector<8x384xi1>, vector<8x384xf32>
    %cst_192 = arith.constant dense<0.000000e+00> : vector<8x384xf32>
    %737 = tpu.matmul %731, %570, %cst_192 {dimension_numbers = #tpu.dot_dimension_numbers<[1], [0], [0], [1], [0, 0, 1, 1], [], []>} : vector<8x64xf32>, vector<64x384xf32>, vector<8x384xf32> -> vector<8x384xf32>
    %738 = arith.addf %736, %737 : vector<8x384xf32>
    %739 = vector.extract_strided_slice %738 {offsets = [0, 0], sizes = [8, 64], strides = [1, 1]} : vector<8x384xf32> to vector<8x64xf32>
    %740 = arith.negf %739 : vector<8x64xf32>
    %741 = math.exp %740 : vector<8x64xf32>
    %cst_193 = arith.constant 1.000000e+00 : f32
    %742 = vector.broadcast %cst_193 : f32 to vector<8x64xf32>
    %743 = arith.addf %742, %741 : vector<8x64xf32>
    %744 = arith.divf %742, %743 : vector<8x64xf32>
    %745 = vector.extract_strided_slice %738 {offsets = [0, 128], sizes = [8, 64], strides = [1, 1]} : vector<8x384xf32> to vector<8x64xf32>
    %746 = arith.negf %745 : vector<8x64xf32>
    %747 = math.exp %746 : vector<8x64xf32>
    %cst_194 = arith.constant 1.000000e+00 : f32
    %748 = vector.broadcast %cst_194 : f32 to vector<8x64xf32>
    %749 = arith.addf %748, %747 : vector<8x64xf32>
    %750 = arith.divf %748, %749 : vector<8x64xf32>
    %751 = vector.extract_strided_slice %736 {offsets = [0, 256], sizes = [8, 64], strides = [1, 1]} : vector<8x384xf32> to vector<8x64xf32>
    %752 = vector.extract_strided_slice %737 {offsets = [0, 256], sizes = [8, 64], strides = [1, 1]} : vector<8x384xf32> to vector<8x64xf32>
    %753 = arith.addf %752, %576 : vector<8x64xf32>
    %754 = arith.mulf %744, %753 : vector<8x64xf32>
    %755 = arith.addf %751, %754 : vector<8x64xf32>
    %756 = math.tanh %755 : vector<8x64xf32>
    %cst_195 = arith.constant 1.000000e+00 : f32
    %757 = vector.broadcast %cst_195 : f32 to vector<8x64xf32>
    %758 = arith.subf %757, %750 : vector<8x64xf32>
    %759 = arith.mulf %758, %756 : vector<8x64xf32>
    %760 = arith.mulf %750, %731 : vector<8x64xf32>
    %761 = arith.addf %759, %760 : vector<8x64xf32>
    %c48_196 = arith.constant 48 : index
    %c0_197 = arith.constant 0 : index
    %762 = vector.load %arg7[%c48_196, %c0_197] : memref<128x384xf32, #tpu.memory_space<vmem>>, vector<8x384xf32>
    %c72_198 = arith.constant 72 : index
    %c0_199 = arith.constant 0 : index
    %763 = vector.load %arg7[%c72_198, %c0_199] : memref<128x384xf32, #tpu.memory_space<vmem>>, vector<8x384xf32>
    %764 = vector.shape_cast %18 : vector<1x384xi1> to vector<1x384xi1>
    %765 = vector.broadcast %764 : vector<1x384xi1> to vector<8x384xi1>
    %766 = arith.select %765, %762, %763 : vector<8x384xi1>, vector<8x384xf32>
    %cst_200 = arith.constant dense<0.000000e+00> : vector<8x384xf32>
    %767 = tpu.matmul %761, %570, %cst_200 {dimension_numbers = #tpu.dot_dimension_numbers<[1], [0], [0], [1], [0, 0, 1, 1], [], []>} : vector<8x64xf32>, vector<64x384xf32>, vector<8x384xf32> -> vector<8x384xf32>
    %768 = arith.addf %766, %767 : vector<8x384xf32>
    %769 = vector.extract_strided_slice %768 {offsets = [0, 0], sizes = [8, 64], strides = [1, 1]} : vector<8x384xf32> to vector<8x64xf32>
    %770 = arith.negf %769 : vector<8x64xf32>
    %771 = math.exp %770 : vector<8x64xf32>
    %cst_201 = arith.constant 1.000000e+00 : f32
    %772 = vector.broadcast %cst_201 : f32 to vector<8x64xf32>
    %773 = arith.addf %772, %771 : vector<8x64xf32>
    %774 = arith.divf %772, %773 : vector<8x64xf32>
    %775 = vector.extract_strided_slice %768 {offsets = [0, 128], sizes = [8, 64], strides = [1, 1]} : vector<8x384xf32> to vector<8x64xf32>
    %776 = arith.negf %775 : vector<8x64xf32>
    %777 = math.exp %776 : vector<8x64xf32>
    %cst_202 = arith.constant 1.000000e+00 : f32
    %778 = vector.broadcast %cst_202 : f32 to vector<8x64xf32>
    %779 = arith.addf %778, %777 : vector<8x64xf32>
    %780 = arith.divf %778, %779 : vector<8x64xf32>
    %781 = vector.extract_strided_slice %766 {offsets = [0, 256], sizes = [8, 64], strides = [1, 1]} : vector<8x384xf32> to vector<8x64xf32>
    %782 = vector.extract_strided_slice %767 {offsets = [0, 256], sizes = [8, 64], strides = [1, 1]} : vector<8x384xf32> to vector<8x64xf32>
    %783 = arith.addf %782, %576 : vector<8x64xf32>
    %784 = arith.mulf %774, %783 : vector<8x64xf32>
    %785 = arith.addf %781, %784 : vector<8x64xf32>
    %786 = math.tanh %785 : vector<8x64xf32>
    %cst_203 = arith.constant 1.000000e+00 : f32
    %787 = vector.broadcast %cst_203 : f32 to vector<8x64xf32>
    %788 = arith.subf %787, %780 : vector<8x64xf32>
    %789 = arith.mulf %788, %786 : vector<8x64xf32>
    %790 = arith.mulf %780, %761 : vector<8x64xf32>
    %791 = arith.addf %789, %790 : vector<8x64xf32>
    %c56_204 = arith.constant 56 : index
    %c0_205 = arith.constant 0 : index
    %792 = vector.load %arg7[%c56_204, %c0_205] : memref<128x384xf32, #tpu.memory_space<vmem>>, vector<8x384xf32>
    %c64_206 = arith.constant 64 : index
    %c0_207 = arith.constant 0 : index
    %793 = vector.load %arg7[%c64_206, %c0_207] : memref<128x384xf32, #tpu.memory_space<vmem>>, vector<8x384xf32>
    %794 = vector.shape_cast %18 : vector<1x384xi1> to vector<1x384xi1>
    %795 = vector.broadcast %794 : vector<1x384xi1> to vector<8x384xi1>
    %796 = arith.select %795, %792, %793 : vector<8x384xi1>, vector<8x384xf32>
    %cst_208 = arith.constant dense<0.000000e+00> : vector<8x384xf32>
    %797 = tpu.matmul %791, %570, %cst_208 {dimension_numbers = #tpu.dot_dimension_numbers<[1], [0], [0], [1], [0, 0, 1, 1], [], []>} : vector<8x64xf32>, vector<64x384xf32>, vector<8x384xf32> -> vector<8x384xf32>
    %798 = arith.addf %796, %797 : vector<8x384xf32>
    %799 = vector.extract_strided_slice %798 {offsets = [0, 0], sizes = [8, 64], strides = [1, 1]} : vector<8x384xf32> to vector<8x64xf32>
    %800 = arith.negf %799 : vector<8x64xf32>
    %801 = math.exp %800 : vector<8x64xf32>
    %cst_209 = arith.constant 1.000000e+00 : f32
    %802 = vector.broadcast %cst_209 : f32 to vector<8x64xf32>
    %803 = arith.addf %802, %801 : vector<8x64xf32>
    %804 = arith.divf %802, %803 : vector<8x64xf32>
    %805 = vector.extract_strided_slice %798 {offsets = [0, 128], sizes = [8, 64], strides = [1, 1]} : vector<8x384xf32> to vector<8x64xf32>
    %806 = arith.negf %805 : vector<8x64xf32>
    %807 = math.exp %806 : vector<8x64xf32>
    %cst_210 = arith.constant 1.000000e+00 : f32
    %808 = vector.broadcast %cst_210 : f32 to vector<8x64xf32>
    %809 = arith.addf %808, %807 : vector<8x64xf32>
    %810 = arith.divf %808, %809 : vector<8x64xf32>
    %811 = vector.extract_strided_slice %796 {offsets = [0, 256], sizes = [8, 64], strides = [1, 1]} : vector<8x384xf32> to vector<8x64xf32>
    %812 = vector.extract_strided_slice %797 {offsets = [0, 256], sizes = [8, 64], strides = [1, 1]} : vector<8x384xf32> to vector<8x64xf32>
    %813 = arith.addf %812, %576 : vector<8x64xf32>
    %814 = arith.mulf %804, %813 : vector<8x64xf32>
    %815 = arith.addf %811, %814 : vector<8x64xf32>
    %816 = math.tanh %815 : vector<8x64xf32>
    %cst_211 = arith.constant 1.000000e+00 : f32
    %817 = vector.broadcast %cst_211 : f32 to vector<8x64xf32>
    %818 = arith.subf %817, %810 : vector<8x64xf32>
    %819 = arith.mulf %818, %816 : vector<8x64xf32>
    %820 = arith.mulf %810, %791 : vector<8x64xf32>
    %821 = arith.addf %819, %820 : vector<8x64xf32>
    %c64_212 = arith.constant 64 : index
    %c0_213 = arith.constant 0 : index
    %822 = vector.load %arg7[%c64_212, %c0_213] : memref<128x384xf32, #tpu.memory_space<vmem>>, vector<8x384xf32>
    %c56_214 = arith.constant 56 : index
    %c0_215 = arith.constant 0 : index
    %823 = vector.load %arg7[%c56_214, %c0_215] : memref<128x384xf32, #tpu.memory_space<vmem>>, vector<8x384xf32>
    %824 = vector.shape_cast %18 : vector<1x384xi1> to vector<1x384xi1>
    %825 = vector.broadcast %824 : vector<1x384xi1> to vector<8x384xi1>
    %826 = arith.select %825, %822, %823 : vector<8x384xi1>, vector<8x384xf32>
    %cst_216 = arith.constant dense<0.000000e+00> : vector<8x384xf32>
    %827 = tpu.matmul %821, %570, %cst_216 {dimension_numbers = #tpu.dot_dimension_numbers<[1], [0], [0], [1], [0, 0, 1, 1], [], []>} : vector<8x64xf32>, vector<64x384xf32>, vector<8x384xf32> -> vector<8x384xf32>
    %828 = arith.addf %826, %827 : vector<8x384xf32>
    %829 = vector.extract_strided_slice %828 {offsets = [0, 0], sizes = [8, 64], strides = [1, 1]} : vector<8x384xf32> to vector<8x64xf32>
    %830 = arith.negf %829 : vector<8x64xf32>
    %831 = math.exp %830 : vector<8x64xf32>
    %cst_217 = arith.constant 1.000000e+00 : f32
    %832 = vector.broadcast %cst_217 : f32 to vector<8x64xf32>
    %833 = arith.addf %832, %831 : vector<8x64xf32>
    %834 = arith.divf %832, %833 : vector<8x64xf32>
    %835 = vector.extract_strided_slice %828 {offsets = [0, 128], sizes = [8, 64], strides = [1, 1]} : vector<8x384xf32> to vector<8x64xf32>
    %836 = arith.negf %835 : vector<8x64xf32>
    %837 = math.exp %836 : vector<8x64xf32>
    %cst_218 = arith.constant 1.000000e+00 : f32
    %838 = vector.broadcast %cst_218 : f32 to vector<8x64xf32>
    %839 = arith.addf %838, %837 : vector<8x64xf32>
    %840 = arith.divf %838, %839 : vector<8x64xf32>
    %841 = vector.extract_strided_slice %826 {offsets = [0, 256], sizes = [8, 64], strides = [1, 1]} : vector<8x384xf32> to vector<8x64xf32>
    %842 = vector.extract_strided_slice %827 {offsets = [0, 256], sizes = [8, 64], strides = [1, 1]} : vector<8x384xf32> to vector<8x64xf32>
    %843 = arith.addf %842, %576 : vector<8x64xf32>
    %844 = arith.mulf %834, %843 : vector<8x64xf32>
    %845 = arith.addf %841, %844 : vector<8x64xf32>
    %846 = math.tanh %845 : vector<8x64xf32>
    %cst_219 = arith.constant 1.000000e+00 : f32
    %847 = vector.broadcast %cst_219 : f32 to vector<8x64xf32>
    %848 = arith.subf %847, %840 : vector<8x64xf32>
    %849 = arith.mulf %848, %846 : vector<8x64xf32>
    %850 = arith.mulf %840, %821 : vector<8x64xf32>
    %851 = arith.addf %849, %850 : vector<8x64xf32>
    %c72_220 = arith.constant 72 : index
    %c0_221 = arith.constant 0 : index
    %852 = vector.load %arg7[%c72_220, %c0_221] : memref<128x384xf32, #tpu.memory_space<vmem>>, vector<8x384xf32>
    %c48_222 = arith.constant 48 : index
    %c0_223 = arith.constant 0 : index
    %853 = vector.load %arg7[%c48_222, %c0_223] : memref<128x384xf32, #tpu.memory_space<vmem>>, vector<8x384xf32>
    %854 = vector.shape_cast %18 : vector<1x384xi1> to vector<1x384xi1>
    %855 = vector.broadcast %854 : vector<1x384xi1> to vector<8x384xi1>
    %856 = arith.select %855, %852, %853 : vector<8x384xi1>, vector<8x384xf32>
    %cst_224 = arith.constant dense<0.000000e+00> : vector<8x384xf32>
    %857 = tpu.matmul %851, %570, %cst_224 {dimension_numbers = #tpu.dot_dimension_numbers<[1], [0], [0], [1], [0, 0, 1, 1], [], []>} : vector<8x64xf32>, vector<64x384xf32>, vector<8x384xf32> -> vector<8x384xf32>
    %858 = arith.addf %856, %857 : vector<8x384xf32>
    %859 = vector.extract_strided_slice %858 {offsets = [0, 0], sizes = [8, 64], strides = [1, 1]} : vector<8x384xf32> to vector<8x64xf32>
    %860 = arith.negf %859 : vector<8x64xf32>
    %861 = math.exp %860 : vector<8x64xf32>
    %cst_225 = arith.constant 1.000000e+00 : f32
    %862 = vector.broadcast %cst_225 : f32 to vector<8x64xf32>
    %863 = arith.addf %862, %861 : vector<8x64xf32>
    %864 = arith.divf %862, %863 : vector<8x64xf32>
    %865 = vector.extract_strided_slice %858 {offsets = [0, 128], sizes = [8, 64], strides = [1, 1]} : vector<8x384xf32> to vector<8x64xf32>
    %866 = arith.negf %865 : vector<8x64xf32>
    %867 = math.exp %866 : vector<8x64xf32>
    %cst_226 = arith.constant 1.000000e+00 : f32
    %868 = vector.broadcast %cst_226 : f32 to vector<8x64xf32>
    %869 = arith.addf %868, %867 : vector<8x64xf32>
    %870 = arith.divf %868, %869 : vector<8x64xf32>
    %871 = vector.extract_strided_slice %856 {offsets = [0, 256], sizes = [8, 64], strides = [1, 1]} : vector<8x384xf32> to vector<8x64xf32>
    %872 = vector.extract_strided_slice %857 {offsets = [0, 256], sizes = [8, 64], strides = [1, 1]} : vector<8x384xf32> to vector<8x64xf32>
    %873 = arith.addf %872, %576 : vector<8x64xf32>
    %874 = arith.mulf %864, %873 : vector<8x64xf32>
    %875 = arith.addf %871, %874 : vector<8x64xf32>
    %876 = math.tanh %875 : vector<8x64xf32>
    %cst_227 = arith.constant 1.000000e+00 : f32
    %877 = vector.broadcast %cst_227 : f32 to vector<8x64xf32>
    %878 = arith.subf %877, %870 : vector<8x64xf32>
    %879 = arith.mulf %878, %876 : vector<8x64xf32>
    %880 = arith.mulf %870, %851 : vector<8x64xf32>
    %881 = arith.addf %879, %880 : vector<8x64xf32>
    %c80_228 = arith.constant 80 : index
    %c0_229 = arith.constant 0 : index
    %882 = vector.load %arg7[%c80_228, %c0_229] : memref<128x384xf32, #tpu.memory_space<vmem>>, vector<8x384xf32>
    %c40_230 = arith.constant 40 : index
    %c0_231 = arith.constant 0 : index
    %883 = vector.load %arg7[%c40_230, %c0_231] : memref<128x384xf32, #tpu.memory_space<vmem>>, vector<8x384xf32>
    %884 = vector.shape_cast %18 : vector<1x384xi1> to vector<1x384xi1>
    %885 = vector.broadcast %884 : vector<1x384xi1> to vector<8x384xi1>
    %886 = arith.select %885, %882, %883 : vector<8x384xi1>, vector<8x384xf32>
    %cst_232 = arith.constant dense<0.000000e+00> : vector<8x384xf32>
    %887 = tpu.matmul %881, %570, %cst_232 {dimension_numbers = #tpu.dot_dimension_numbers<[1], [0], [0], [1], [0, 0, 1, 1], [], []>} : vector<8x64xf32>, vector<64x384xf32>, vector<8x384xf32> -> vector<8x384xf32>
    %888 = arith.addf %886, %887 : vector<8x384xf32>
    %889 = vector.extract_strided_slice %888 {offsets = [0, 0], sizes = [8, 64], strides = [1, 1]} : vector<8x384xf32> to vector<8x64xf32>
    %890 = arith.negf %889 : vector<8x64xf32>
    %891 = math.exp %890 : vector<8x64xf32>
    %cst_233 = arith.constant 1.000000e+00 : f32
    %892 = vector.broadcast %cst_233 : f32 to vector<8x64xf32>
    %893 = arith.addf %892, %891 : vector<8x64xf32>
    %894 = arith.divf %892, %893 : vector<8x64xf32>
    %895 = vector.extract_strided_slice %888 {offsets = [0, 128], sizes = [8, 64], strides = [1, 1]} : vector<8x384xf32> to vector<8x64xf32>
    %896 = arith.negf %895 : vector<8x64xf32>
    %897 = math.exp %896 : vector<8x64xf32>
    %cst_234 = arith.constant 1.000000e+00 : f32
    %898 = vector.broadcast %cst_234 : f32 to vector<8x64xf32>
    %899 = arith.addf %898, %897 : vector<8x64xf32>
    %900 = arith.divf %898, %899 : vector<8x64xf32>
    %901 = vector.extract_strided_slice %886 {offsets = [0, 256], sizes = [8, 64], strides = [1, 1]} : vector<8x384xf32> to vector<8x64xf32>
    %902 = vector.extract_strided_slice %887 {offsets = [0, 256], sizes = [8, 64], strides = [1, 1]} : vector<8x384xf32> to vector<8x64xf32>
    %903 = arith.addf %902, %576 : vector<8x64xf32>
    %904 = arith.mulf %894, %903 : vector<8x64xf32>
    %905 = arith.addf %901, %904 : vector<8x64xf32>
    %906 = math.tanh %905 : vector<8x64xf32>
    %cst_235 = arith.constant 1.000000e+00 : f32
    %907 = vector.broadcast %cst_235 : f32 to vector<8x64xf32>
    %908 = arith.subf %907, %900 : vector<8x64xf32>
    %909 = arith.mulf %908, %906 : vector<8x64xf32>
    %910 = arith.mulf %900, %881 : vector<8x64xf32>
    %911 = arith.addf %909, %910 : vector<8x64xf32>
    %c88_236 = arith.constant 88 : index
    %c0_237 = arith.constant 0 : index
    %912 = vector.load %arg7[%c88_236, %c0_237] : memref<128x384xf32, #tpu.memory_space<vmem>>, vector<8x384xf32>
    %c32_238 = arith.constant 32 : index
    %c0_239 = arith.constant 0 : index
    %913 = vector.load %arg7[%c32_238, %c0_239] : memref<128x384xf32, #tpu.memory_space<vmem>>, vector<8x384xf32>
    %914 = vector.shape_cast %18 : vector<1x384xi1> to vector<1x384xi1>
    %915 = vector.broadcast %914 : vector<1x384xi1> to vector<8x384xi1>
    %916 = arith.select %915, %912, %913 : vector<8x384xi1>, vector<8x384xf32>
    %cst_240 = arith.constant dense<0.000000e+00> : vector<8x384xf32>
    %917 = tpu.matmul %911, %570, %cst_240 {dimension_numbers = #tpu.dot_dimension_numbers<[1], [0], [0], [1], [0, 0, 1, 1], [], []>} : vector<8x64xf32>, vector<64x384xf32>, vector<8x384xf32> -> vector<8x384xf32>
    %918 = arith.addf %916, %917 : vector<8x384xf32>
    %919 = vector.extract_strided_slice %918 {offsets = [0, 0], sizes = [8, 64], strides = [1, 1]} : vector<8x384xf32> to vector<8x64xf32>
    %920 = arith.negf %919 : vector<8x64xf32>
    %921 = math.exp %920 : vector<8x64xf32>
    %cst_241 = arith.constant 1.000000e+00 : f32
    %922 = vector.broadcast %cst_241 : f32 to vector<8x64xf32>
    %923 = arith.addf %922, %921 : vector<8x64xf32>
    %924 = arith.divf %922, %923 : vector<8x64xf32>
    %925 = vector.extract_strided_slice %918 {offsets = [0, 128], sizes = [8, 64], strides = [1, 1]} : vector<8x384xf32> to vector<8x64xf32>
    %926 = arith.negf %925 : vector<8x64xf32>
    %927 = math.exp %926 : vector<8x64xf32>
    %cst_242 = arith.constant 1.000000e+00 : f32
    %928 = vector.broadcast %cst_242 : f32 to vector<8x64xf32>
    %929 = arith.addf %928, %927 : vector<8x64xf32>
    %930 = arith.divf %928, %929 : vector<8x64xf32>
    %931 = vector.extract_strided_slice %916 {offsets = [0, 256], sizes = [8, 64], strides = [1, 1]} : vector<8x384xf32> to vector<8x64xf32>
    %932 = vector.extract_strided_slice %917 {offsets = [0, 256], sizes = [8, 64], strides = [1, 1]} : vector<8x384xf32> to vector<8x64xf32>
    %933 = arith.addf %932, %576 : vector<8x64xf32>
    %934 = arith.mulf %924, %933 : vector<8x64xf32>
    %935 = arith.addf %931, %934 : vector<8x64xf32>
    %936 = math.tanh %935 : vector<8x64xf32>
    %cst_243 = arith.constant 1.000000e+00 : f32
    %937 = vector.broadcast %cst_243 : f32 to vector<8x64xf32>
    %938 = arith.subf %937, %930 : vector<8x64xf32>
    %939 = arith.mulf %938, %936 : vector<8x64xf32>
    %940 = arith.mulf %930, %911 : vector<8x64xf32>
    %941 = arith.addf %939, %940 : vector<8x64xf32>
    %c96_244 = arith.constant 96 : index
    %c0_245 = arith.constant 0 : index
    %942 = vector.load %arg7[%c96_244, %c0_245] : memref<128x384xf32, #tpu.memory_space<vmem>>, vector<8x384xf32>
    %c24_246 = arith.constant 24 : index
    %c0_247 = arith.constant 0 : index
    %943 = vector.load %arg7[%c24_246, %c0_247] : memref<128x384xf32, #tpu.memory_space<vmem>>, vector<8x384xf32>
    %944 = vector.shape_cast %18 : vector<1x384xi1> to vector<1x384xi1>
    %945 = vector.broadcast %944 : vector<1x384xi1> to vector<8x384xi1>
    %946 = arith.select %945, %942, %943 : vector<8x384xi1>, vector<8x384xf32>
    %cst_248 = arith.constant dense<0.000000e+00> : vector<8x384xf32>
    %947 = tpu.matmul %941, %570, %cst_248 {dimension_numbers = #tpu.dot_dimension_numbers<[1], [0], [0], [1], [0, 0, 1, 1], [], []>} : vector<8x64xf32>, vector<64x384xf32>, vector<8x384xf32> -> vector<8x384xf32>
    %948 = arith.addf %946, %947 : vector<8x384xf32>
    %949 = vector.extract_strided_slice %948 {offsets = [0, 0], sizes = [8, 64], strides = [1, 1]} : vector<8x384xf32> to vector<8x64xf32>
    %950 = arith.negf %949 : vector<8x64xf32>
    %951 = math.exp %950 : vector<8x64xf32>
    %cst_249 = arith.constant 1.000000e+00 : f32
    %952 = vector.broadcast %cst_249 : f32 to vector<8x64xf32>
    %953 = arith.addf %952, %951 : vector<8x64xf32>
    %954 = arith.divf %952, %953 : vector<8x64xf32>
    %955 = vector.extract_strided_slice %948 {offsets = [0, 128], sizes = [8, 64], strides = [1, 1]} : vector<8x384xf32> to vector<8x64xf32>
    %956 = arith.negf %955 : vector<8x64xf32>
    %957 = math.exp %956 : vector<8x64xf32>
    %cst_250 = arith.constant 1.000000e+00 : f32
    %958 = vector.broadcast %cst_250 : f32 to vector<8x64xf32>
    %959 = arith.addf %958, %957 : vector<8x64xf32>
    %960 = arith.divf %958, %959 : vector<8x64xf32>
    %961 = vector.extract_strided_slice %946 {offsets = [0, 256], sizes = [8, 64], strides = [1, 1]} : vector<8x384xf32> to vector<8x64xf32>
    %962 = vector.extract_strided_slice %947 {offsets = [0, 256], sizes = [8, 64], strides = [1, 1]} : vector<8x384xf32> to vector<8x64xf32>
    %963 = arith.addf %962, %576 : vector<8x64xf32>
    %964 = arith.mulf %954, %963 : vector<8x64xf32>
    %965 = arith.addf %961, %964 : vector<8x64xf32>
    %966 = math.tanh %965 : vector<8x64xf32>
    %cst_251 = arith.constant 1.000000e+00 : f32
    %967 = vector.broadcast %cst_251 : f32 to vector<8x64xf32>
    %968 = arith.subf %967, %960 : vector<8x64xf32>
    %969 = arith.mulf %968, %966 : vector<8x64xf32>
    %970 = arith.mulf %960, %941 : vector<8x64xf32>
    %971 = arith.addf %969, %970 : vector<8x64xf32>
    %c104_252 = arith.constant 104 : index
    %c0_253 = arith.constant 0 : index
    %972 = vector.load %arg7[%c104_252, %c0_253] : memref<128x384xf32, #tpu.memory_space<vmem>>, vector<8x384xf32>
    %c16_254 = arith.constant 16 : index
    %c0_255 = arith.constant 0 : index
    %973 = vector.load %arg7[%c16_254, %c0_255] : memref<128x384xf32, #tpu.memory_space<vmem>>, vector<8x384xf32>
    %974 = vector.shape_cast %18 : vector<1x384xi1> to vector<1x384xi1>
    %975 = vector.broadcast %974 : vector<1x384xi1> to vector<8x384xi1>
    %976 = arith.select %975, %972, %973 : vector<8x384xi1>, vector<8x384xf32>
    %cst_256 = arith.constant dense<0.000000e+00> : vector<8x384xf32>
    %977 = tpu.matmul %971, %570, %cst_256 {dimension_numbers = #tpu.dot_dimension_numbers<[1], [0], [0], [1], [0, 0, 1, 1], [], []>} : vector<8x64xf32>, vector<64x384xf32>, vector<8x384xf32> -> vector<8x384xf32>
    %978 = arith.addf %976, %977 : vector<8x384xf32>
    %979 = vector.extract_strided_slice %978 {offsets = [0, 0], sizes = [8, 64], strides = [1, 1]} : vector<8x384xf32> to vector<8x64xf32>
    %980 = arith.negf %979 : vector<8x64xf32>
    %981 = math.exp %980 : vector<8x64xf32>
    %cst_257 = arith.constant 1.000000e+00 : f32
    %982 = vector.broadcast %cst_257 : f32 to vector<8x64xf32>
    %983 = arith.addf %982, %981 : vector<8x64xf32>
    %984 = arith.divf %982, %983 : vector<8x64xf32>
    %985 = vector.extract_strided_slice %978 {offsets = [0, 128], sizes = [8, 64], strides = [1, 1]} : vector<8x384xf32> to vector<8x64xf32>
    %986 = arith.negf %985 : vector<8x64xf32>
    %987 = math.exp %986 : vector<8x64xf32>
    %cst_258 = arith.constant 1.000000e+00 : f32
    %988 = vector.broadcast %cst_258 : f32 to vector<8x64xf32>
    %989 = arith.addf %988, %987 : vector<8x64xf32>
    %990 = arith.divf %988, %989 : vector<8x64xf32>
    %991 = vector.extract_strided_slice %976 {offsets = [0, 256], sizes = [8, 64], strides = [1, 1]} : vector<8x384xf32> to vector<8x64xf32>
    %992 = vector.extract_strided_slice %977 {offsets = [0, 256], sizes = [8, 64], strides = [1, 1]} : vector<8x384xf32> to vector<8x64xf32>
    %993 = arith.addf %992, %576 : vector<8x64xf32>
    %994 = arith.mulf %984, %993 : vector<8x64xf32>
    %995 = arith.addf %991, %994 : vector<8x64xf32>
    %996 = math.tanh %995 : vector<8x64xf32>
    %cst_259 = arith.constant 1.000000e+00 : f32
    %997 = vector.broadcast %cst_259 : f32 to vector<8x64xf32>
    %998 = arith.subf %997, %990 : vector<8x64xf32>
    %999 = arith.mulf %998, %996 : vector<8x64xf32>
    %1000 = arith.mulf %990, %971 : vector<8x64xf32>
    %1001 = arith.addf %999, %1000 : vector<8x64xf32>
    %c112_260 = arith.constant 112 : index
    %c0_261 = arith.constant 0 : index
    %1002 = vector.load %arg7[%c112_260, %c0_261] : memref<128x384xf32, #tpu.memory_space<vmem>>, vector<8x384xf32>
    %c8_262 = arith.constant 8 : index
    %c0_263 = arith.constant 0 : index
    %1003 = vector.load %arg7[%c8_262, %c0_263] : memref<128x384xf32, #tpu.memory_space<vmem>>, vector<8x384xf32>
    %1004 = vector.shape_cast %18 : vector<1x384xi1> to vector<1x384xi1>
    %1005 = vector.broadcast %1004 : vector<1x384xi1> to vector<8x384xi1>
    %1006 = arith.select %1005, %1002, %1003 : vector<8x384xi1>, vector<8x384xf32>
    %cst_264 = arith.constant dense<0.000000e+00> : vector<8x384xf32>
    %1007 = tpu.matmul %1001, %570, %cst_264 {dimension_numbers = #tpu.dot_dimension_numbers<[1], [0], [0], [1], [0, 0, 1, 1], [], []>} : vector<8x64xf32>, vector<64x384xf32>, vector<8x384xf32> -> vector<8x384xf32>
    %1008 = arith.addf %1006, %1007 : vector<8x384xf32>
    %1009 = vector.extract_strided_slice %1008 {offsets = [0, 0], sizes = [8, 64], strides = [1, 1]} : vector<8x384xf32> to vector<8x64xf32>
    %1010 = arith.negf %1009 : vector<8x64xf32>
    %1011 = math.exp %1010 : vector<8x64xf32>
    %cst_265 = arith.constant 1.000000e+00 : f32
    %1012 = vector.broadcast %cst_265 : f32 to vector<8x64xf32>
    %1013 = arith.addf %1012, %1011 : vector<8x64xf32>
    %1014 = arith.divf %1012, %1013 : vector<8x64xf32>
    %1015 = vector.extract_strided_slice %1008 {offsets = [0, 128], sizes = [8, 64], strides = [1, 1]} : vector<8x384xf32> to vector<8x64xf32>
    %1016 = arith.negf %1015 : vector<8x64xf32>
    %1017 = math.exp %1016 : vector<8x64xf32>
    %cst_266 = arith.constant 1.000000e+00 : f32
    %1018 = vector.broadcast %cst_266 : f32 to vector<8x64xf32>
    %1019 = arith.addf %1018, %1017 : vector<8x64xf32>
    %1020 = arith.divf %1018, %1019 : vector<8x64xf32>
    %1021 = vector.extract_strided_slice %1006 {offsets = [0, 256], sizes = [8, 64], strides = [1, 1]} : vector<8x384xf32> to vector<8x64xf32>
    %1022 = vector.extract_strided_slice %1007 {offsets = [0, 256], sizes = [8, 64], strides = [1, 1]} : vector<8x384xf32> to vector<8x64xf32>
    %1023 = arith.addf %1022, %576 : vector<8x64xf32>
    %1024 = arith.mulf %1014, %1023 : vector<8x64xf32>
    %1025 = arith.addf %1021, %1024 : vector<8x64xf32>
    %1026 = math.tanh %1025 : vector<8x64xf32>
    %cst_267 = arith.constant 1.000000e+00 : f32
    %1027 = vector.broadcast %cst_267 : f32 to vector<8x64xf32>
    %1028 = arith.subf %1027, %1020 : vector<8x64xf32>
    %1029 = arith.mulf %1028, %1026 : vector<8x64xf32>
    %1030 = arith.mulf %1020, %1001 : vector<8x64xf32>
    %1031 = arith.addf %1029, %1030 : vector<8x64xf32>
    %c120_268 = arith.constant 120 : index
    %c0_269 = arith.constant 0 : index
    %1032 = vector.load %arg7[%c120_268, %c0_269] : memref<128x384xf32, #tpu.memory_space<vmem>>, vector<8x384xf32>
    %c0_270 = arith.constant 0 : index
    %c0_271 = arith.constant 0 : index
    %1033 = vector.load %arg7[%c0_270, %c0_271] : memref<128x384xf32, #tpu.memory_space<vmem>>, vector<8x384xf32>
    %1034 = vector.shape_cast %18 : vector<1x384xi1> to vector<1x384xi1>
    %1035 = vector.broadcast %1034 : vector<1x384xi1> to vector<8x384xi1>
    %1036 = arith.select %1035, %1032, %1033 : vector<8x384xi1>, vector<8x384xf32>
    %cst_272 = arith.constant dense<0.000000e+00> : vector<8x384xf32>
    %1037 = tpu.matmul %1031, %570, %cst_272 {dimension_numbers = #tpu.dot_dimension_numbers<[1], [0], [0], [1], [0, 0, 1, 1], [], []>} : vector<8x64xf32>, vector<64x384xf32>, vector<8x384xf32> -> vector<8x384xf32>
    %1038 = arith.addf %1036, %1037 : vector<8x384xf32>
    %1039 = vector.extract_strided_slice %1038 {offsets = [0, 0], sizes = [8, 64], strides = [1, 1]} : vector<8x384xf32> to vector<8x64xf32>
    %1040 = arith.negf %1039 : vector<8x64xf32>
    %1041 = math.exp %1040 : vector<8x64xf32>
    %cst_273 = arith.constant 1.000000e+00 : f32
    %1042 = vector.broadcast %cst_273 : f32 to vector<8x64xf32>
    %1043 = arith.addf %1042, %1041 : vector<8x64xf32>
    %1044 = arith.divf %1042, %1043 : vector<8x64xf32>
    %1045 = vector.extract_strided_slice %1038 {offsets = [0, 128], sizes = [8, 64], strides = [1, 1]} : vector<8x384xf32> to vector<8x64xf32>
    %1046 = arith.negf %1045 : vector<8x64xf32>
    %1047 = math.exp %1046 : vector<8x64xf32>
    %cst_274 = arith.constant 1.000000e+00 : f32
    %1048 = vector.broadcast %cst_274 : f32 to vector<8x64xf32>
    %1049 = arith.addf %1048, %1047 : vector<8x64xf32>
    %1050 = arith.divf %1048, %1049 : vector<8x64xf32>
    %1051 = vector.extract_strided_slice %1036 {offsets = [0, 256], sizes = [8, 64], strides = [1, 1]} : vector<8x384xf32> to vector<8x64xf32>
    %1052 = vector.extract_strided_slice %1037 {offsets = [0, 256], sizes = [8, 64], strides = [1, 1]} : vector<8x384xf32> to vector<8x64xf32>
    %1053 = arith.addf %1052, %576 : vector<8x64xf32>
    %1054 = arith.mulf %1044, %1053 : vector<8x64xf32>
    %1055 = arith.addf %1051, %1054 : vector<8x64xf32>
    %1056 = math.tanh %1055 : vector<8x64xf32>
    %cst_275 = arith.constant 1.000000e+00 : f32
    %1057 = vector.broadcast %cst_275 : f32 to vector<8x64xf32>
    %1058 = arith.subf %1057, %1050 : vector<8x64xf32>
    %1059 = arith.mulf %1058, %1056 : vector<8x64xf32>
    %1060 = arith.mulf %1050, %1031 : vector<8x64xf32>
    %1061 = arith.addf %1059, %1060 : vector<8x64xf32>
    %1062 = vector.shape_cast %21 : vector<1x64xi1> to vector<1x64xi1>
    %1063 = vector.broadcast %1062 : vector<1x64xi1> to vector<8x64xi1>
    %1064 = arith.select %1063, %611, %1061 : vector<8x64xi1>, vector<8x64xf32>
    %1065 = vector.shape_cast %21 : vector<1x64xi1> to vector<1x64xi1>
    %1066 = vector.broadcast %1065 : vector<1x64xi1> to vector<8x64xi1>
    %1067 = arith.select %1066, %641, %1031 : vector<8x64xi1>, vector<8x64xf32>
    %1068 = vector.shape_cast %21 : vector<1x64xi1> to vector<1x64xi1>
    %1069 = vector.broadcast %1068 : vector<1x64xi1> to vector<8x64xi1>
    %1070 = arith.select %1069, %671, %1001 : vector<8x64xi1>, vector<8x64xf32>
    %1071 = vector.shape_cast %21 : vector<1x64xi1> to vector<1x64xi1>
    %1072 = vector.broadcast %1071 : vector<1x64xi1> to vector<8x64xi1>
    %1073 = arith.select %1072, %701, %971 : vector<8x64xi1>, vector<8x64xf32>
    %1074 = vector.shape_cast %21 : vector<1x64xi1> to vector<1x64xi1>
    %1075 = vector.broadcast %1074 : vector<1x64xi1> to vector<8x64xi1>
    %1076 = arith.select %1075, %731, %941 : vector<8x64xi1>, vector<8x64xf32>
    %1077 = vector.shape_cast %21 : vector<1x64xi1> to vector<1x64xi1>
    %1078 = vector.broadcast %1077 : vector<1x64xi1> to vector<8x64xi1>
    %1079 = arith.select %1078, %761, %911 : vector<8x64xi1>, vector<8x64xf32>
    %1080 = vector.shape_cast %21 : vector<1x64xi1> to vector<1x64xi1>
    %1081 = vector.broadcast %1080 : vector<1x64xi1> to vector<8x64xi1>
    %1082 = arith.select %1081, %791, %881 : vector<8x64xi1>, vector<8x64xf32>
    %1083 = vector.shape_cast %21 : vector<1x64xi1> to vector<1x64xi1>
    %1084 = vector.broadcast %1083 : vector<1x64xi1> to vector<8x64xi1>
    %1085 = arith.select %1084, %821, %851 : vector<8x64xi1>, vector<8x64xf32>
    %1086 = vector.shape_cast %21 : vector<1x64xi1> to vector<1x64xi1>
    %1087 = vector.broadcast %1086 : vector<1x64xi1> to vector<8x64xi1>
    %1088 = arith.select %1087, %851, %821 : vector<8x64xi1>, vector<8x64xf32>
    %1089 = vector.shape_cast %21 : vector<1x64xi1> to vector<1x64xi1>
    %1090 = vector.broadcast %1089 : vector<1x64xi1> to vector<8x64xi1>
    %1091 = arith.select %1090, %881, %791 : vector<8x64xi1>, vector<8x64xf32>
    %1092 = vector.shape_cast %21 : vector<1x64xi1> to vector<1x64xi1>
    %1093 = vector.broadcast %1092 : vector<1x64xi1> to vector<8x64xi1>
    %1094 = arith.select %1093, %911, %761 : vector<8x64xi1>, vector<8x64xf32>
    %1095 = vector.shape_cast %21 : vector<1x64xi1> to vector<1x64xi1>
    %1096 = vector.broadcast %1095 : vector<1x64xi1> to vector<8x64xi1>
    %1097 = arith.select %1096, %941, %731 : vector<8x64xi1>, vector<8x64xf32>
    %1098 = vector.shape_cast %21 : vector<1x64xi1> to vector<1x64xi1>
    %1099 = vector.broadcast %1098 : vector<1x64xi1> to vector<8x64xi1>
    %1100 = arith.select %1099, %971, %701 : vector<8x64xi1>, vector<8x64xf32>
    %1101 = vector.shape_cast %21 : vector<1x64xi1> to vector<1x64xi1>
    %1102 = vector.broadcast %1101 : vector<1x64xi1> to vector<8x64xi1>
    %1103 = arith.select %1102, %1001, %671 : vector<8x64xi1>, vector<8x64xf32>
    %1104 = vector.shape_cast %21 : vector<1x64xi1> to vector<1x64xi1>
    %1105 = vector.broadcast %1104 : vector<1x64xi1> to vector<8x64xi1>
    %1106 = arith.select %1105, %1031, %641 : vector<8x64xi1>, vector<8x64xf32>
    %1107 = vector.shape_cast %21 : vector<1x64xi1> to vector<1x64xi1>
    %1108 = vector.broadcast %1107 : vector<1x64xi1> to vector<8x64xi1>
    %1109 = arith.select %1108, %1061, %611 : vector<8x64xi1>, vector<8x64xf32>
    %1110 = tpu.concatenate %1064, %1067, %1070, %1073, %1076, %1079, %1082, %1085, %1088, %1091, %1094, %1097, %1100, %1103, %1106, %1109 in 0 : vector<8x64xf32>, vector<8x64xf32>, vector<8x64xf32>, vector<8x64xf32>, vector<8x64xf32>, vector<8x64xf32>, vector<8x64xf32>, vector<8x64xf32>, vector<8x64xf32>, vector<8x64xf32>, vector<8x64xf32>, vector<8x64xf32>, vector<8x64xf32>, vector<8x64xf32>, vector<8x64xf32>, vector<8x64xf32> -> vector<128x64xf32>
    %c0_276 = arith.constant 0 : index
    %c0_277 = arith.constant 0 : index
    %1111 = vector.load %arg6[%c0_276, %c0_277] : memref<128x64xf32, #tpu.memory_space<vmem>>, vector<128x64xf32>
    tpu.vector_store %arg6[%c0_276, %c0_277], %1110 {strides = array<i32>} : memref<128x64xf32, #tpu.memory_space<vmem>>, vector<128x64xf32>,
    return
  }
  func.func @transform_0(%arg0: i32) -> (i32, i32) {
    %c0_i32 = arith.constant 0 : i32
    %c0_i32_0 = arith.constant 0 : i32
    %c0_i32_1 = arith.constant 0 : i32
    return %c0_i32, %c0_i32_0 : i32, i32
  }
  func.func @transform_1(%arg0: i32) -> (i32, i32, i32) {
    %c0_i32 = arith.constant 0 : i32
    %c0_i32_0 = arith.constant 0 : i32
    %c0_i32_1 = arith.constant 0 : i32
    %c0_i32_2 = arith.constant 0 : i32
    return %c0_i32, %c0_i32_0, %c0_i32_1 : i32, i32, i32
  }
  func.func @transform_2(%arg0: i32) -> (i32, i32, i32) {
    %c0_i32 = arith.constant 0 : i32
    %c0_i32_0 = arith.constant 0 : i32
    %c0_i32_1 = arith.constant 0 : i32
    %c0_i32_2 = arith.constant 0 : i32
    return %c0_i32, %c0_i32_0, %c0_i32_1 : i32, i32, i32
  }
  func.func @transform_3(%arg0: i32) -> (i32, i32, i32) {
    %c0_i32 = arith.constant 0 : i32
    %c0_i32_0 = arith.constant 0 : i32
    %c0_i32_1 = arith.constant 0 : i32
    %c0_i32_2 = arith.constant 0 : i32
    return %c0_i32, %c0_i32_0, %c0_i32_1 : i32, i32, i32
  }
  func.func @transform_4(%arg0: i32) -> (i32, i32, i32) {
    %c0_i32 = arith.constant 0 : i32
    %c0_i32_0 = arith.constant 0 : i32
    %c0_i32_1 = arith.constant 0 : i32
    %c0_i32_2 = arith.constant 0 : i32
    return %c0_i32, %c0_i32_0, %c0_i32_1 : i32, i32, i32
  }
  func.func @transform_5(%arg0: i32) -> (i32, i32) {
    %c0_i32 = arith.constant 0 : i32
    %c0_i32_0 = arith.constant 0 : i32
    %c0_i32_1 = arith.constant 0 : i32
    return %c0_i32, %c0_i32_0 : i32, i32
  }
}

</mosaic_0001>

<bundles_post_ra>
// kernel: tpu_custom_call.1
= control target key start
LH: loop header
LB: loop body
LE: loop exit
PB: predicated region body
PF: predicated region fallthrough
CT: control target
= control target key end

     0   :  { %10 = vsyncpa [#allocation4], 0  ;;  %s11482_s0 = inlined_call_operand.vmem [shape: f32[128,64], index: 0, kind: input, shape index: {}]   ;;  %s11483_s1 = inlined_call_operand.hbm [shape: f32[2,64,384], index: 1, kind: input, shape index: {}]   ;;  %s11484_s2 = inlined_call_operand.hbm [shape: f32[2,64,384], index: 2, kind: input, shape index: {}]   ;;  %s11485_s3 = inlined_call_operand.vmem [shape: f32[2,1,384], index: 3, kind: input, shape index: {}]   ;;  %s11486_s4 = inlined_call_operand.vmem [shape: f32[2,1,64], index: 4, kind: input, shape index: {}]   ;;  %s11487_s5 = inlined_call_operand.vmem [shape: f32[128,64], index: 5, kind: output, shape index: {}]  }
   0x1   :  { %11 = vsyncpa [#allocation6], 0  ;;  %s9177_s18 = smov [#allocation3]   ;;  %s9129_s22 = scalar_lea.hbm %s11483_s1, 6144 }
   0x2   :  { %s19_s19 = sshll.u32 %s9177_s18, 4  ;;  %p9130_p0 = scmp.ne.s32.totalorder %s11483_s1, %s9129_s22  ;;  %s20_s19 = int_to_ptr.vmem [resolvable:$true] %s19_s19 }
   0x3   :  { %p9133_p1 = scmp.lt.u32.totalorder %s9129_s22, %s11483_s1 }
   0x5   :  { %p9135_p2 = pnand %p9133_p1, %p9130_p0 }
   0x7   :  { %9138 = shalt.err (!%p9135_p2)
}
   0x8   :  { %s9139_s27 = scalar_lea.vmem %s20_s19, 6144  ;;  %p9144_p4 = scmp.lt.s32.totalorder %s20_s19, %s20_s19 }
   0x9   :  { %p9140_p3 = scmp.ne.s32.totalorder %s20_s19, %s9139_s27  ;;  %p9145_p5 = scmp.lt.s32.totalorder %s9139_s27, %s9139_s27 }
   0xb   :  { %p9146_p6 = por %p9145_p5, %p9144_p4 }
   0xd   :  { %p9147_p7 = pnand %p9146_p6, %p9140_p3 }
   0xf   :  { %9150 = shalt.err (!%p9147_p7)
}
  0x10   :  { %s9178_s28 = smov 384   ;;  %s9179_s29 = smov 24  }
  0x11   :  { %25 = dma.hbm_to_vmem [thread:$0]  %s11483_s1, 6144, %s20_s19, [#allocation4], %s9178_s28, %s9178_s28, %s9179_s29  }
  0x12   :  { %s9180_s7 = smov [#allocation5]   ;;  %s9151_s11 = scalar_lea.hbm %s11484_s2, 6144 }
  0x13   :  { %s31_s8 = sshll.u32 %s9180_s7, 4  ;;  %p9152_p8 = scmp.ne.s32.totalorder %s11484_s2, %s9151_s11  ;;  %s32_s8 = int_to_ptr.vmem [resolvable:$true] %s31_s8 }
  0x14   :  { %p9155_p9 = scmp.lt.u32.totalorder %s9151_s11, %s11484_s2 }
  0x16   :  { %p9157_p10 = pnand %p9155_p9, %p9152_p8 }
  0x18   :  { %9160 = shalt.err (!%p9157_p10)
}
  0x19   :  { %s9161_s16 = scalar_lea.vmem %s32_s8, 6144  ;;  %p9166_p12 = scmp.lt.s32.totalorder %s32_s8, %s32_s8 }
  0x1a   :  { %p9162_p11 = scmp.ne.s32.totalorder %s32_s8, %s9161_s16  ;;  %p9167_p13 = scmp.lt.s32.totalorder %s9161_s16, %s9161_s16 }
  0x1c   :  { %p9168_p0 = por %p9167_p13, %p9166_p12 }
  0x1e   :  { %p9169_p1 = pnand %p9168_p0, %p9162_p11 }
  0x20   :  { %9172 = shalt.err (!%p9169_p1)
}
  0x21   :  { %37 = dma.hbm_to_vmem [thread:$0]  %s11484_s2, 6144, %s32_s8, [#allocation6], %s9178_s28, %s9178_s28, %s9179_s29  }
  0x22   :  { %9173 = dma.done.wait [#allocation4], 6144  }
  0x23   :  { %9174 = vsyncadd [#allocation4], 4294961152 }
  0x24   :  { %9175 = dma.done.wait [#allocation6], 6144  }
  0x25   :  { %9176 = vsyncadd [#allocation6], 4294961152  ;;  %v11491_v0 = vmov 0.0   ;;  %v93_v1 = vld [vmem:[#allocation3 + $0x8] sm:$0xff]  ;;  %v96_v2 = vld [vmem:[#allocation3 + $0x20] sm:$0xff]  ;;  %vm180_vm0 = vcmask 523264  }
  0x26   :  { %293 = vmatprep.mubr.f32.mxu0 %v11491_v0  ;;  %v92_v3 = vld [vmem:[#allocation3] sm:$0xff]  ;;  %v7840_v4 = vpack.c.bf16 %v96_v2, %v93_v1  ;;  %v95_v5 = vld [vmem:[#allocation3 + $0x18] sm:$0xff]  ;;  %v94_v6 = vld [vmem:[#allocation3 + $0x10] sm:$0xff]  ;;  %vm9183_vm1 = vmmov 0  }
  0x27   :  { %v97_v7 = vld [vmem:[#allocation3 + $0x28] sm:$0xff]  ;;  %v7842_v8 = vpack.c.bf16 %v95_v5, %v92_v3  ;;  %v99_v10 = vld [vmem:[#allocation3 + $0x38] sm:$0xff]  ;;  %v102_v11 = vld [vmem:[#allocation3 + $0x50] sm:$0xff] }
  0x28   :  { %v7856_v9 = vpack.c.bf16 %v97_v7, %v94_v6  ;;  %v98_v12 = vld [vmem:[#allocation3 + $0x30] sm:$0xff]  ;;  %7841 = vmatprep.subr.bf16.mxu0 %v7840_v4  ;;  %v7844_v13 = vpack.c.bf16 %v102_v11, %v99_v10  ;;  %v101_v14 = vld [vmem:[#allocation3 + $0x48] sm:$0xff]  ;;  %v100_v15 = vld [vmem:[#allocation3 + $0x40] sm:$0xff] }
  0x29   :  { %v103_v16 = vld [vmem:[#allocation3 + $0x58] sm:$0xff]  ;;  %7843 = vmatpush1.bf16.msra.mxu0 %v7842_v8  ;;  %v7846_v17 = vpack.c.bf16 %v101_v14, %v98_v12  ;;  %v105_v19 = vld [vmem:[#allocation3 + $0x68] sm:$0xff]  ;;  %v108_v20 = vld [vmem:[#allocation3 + $0x80] sm:$0xff] }
  0x2a   :  { %7857 = vmatprep.subr.bf16.mxu1 %v7856_v9  ;;  %v7860_v18 = vpack.c.bf16 %v103_v16, %v100_v15  ;;  %v104_v21 = vld [vmem:[#allocation3 + $0x60] sm:$0xff]  ;;  %7845 = vmatprep.subr.bf16.mxu0 %v7844_v13  ;;  %v7848_v22 = vpack.c.bf16 %v108_v20, %v105_v19  ;;  %v107_v23 = vld [vmem:[#allocation3 + $0x78] sm:$0xff]  ;;  %v106_v24 = vld [vmem:[#allocation3 + $0x70] sm:$0xff] }
  0x2b   :  { %7859 = vmatpush3.bf16.msra.mxu1 %v7856_v9  ;;  %v109_v25 = vld [vmem:[#allocation3 + $0x88] sm:$0xff]  ;;  %v111_v27 = vld [vmem:[#allocation3 + $0x98] sm:$0xff]  ;;  %v114_v28 = vld [vmem:[#allocation3 + $0xb0] sm:$0xff]  ;;  %v7850_v31 = vpack.c.bf16 %v107_v23, %v104_v21  ;;  %v11493_v9 = vmov 0.0|0.0  }
  0x2c   :  { %7861 = vmatprep.subr.bf16.mxu1 %v7860_v18  ;;  %v7864_v26 = vpack.c.bf16 %v109_v25, %v106_v24  ;;  %v112_v29 = vld [vmem:[#allocation3 + $0xa0] sm:$0xff]  ;;  %v115_v30 = vld [vmem:[#allocation3 + $0xb8] sm:$0xff]  ;;  %v7852_v33 = vpack.c.bf16 %v114_v28, %v111_v27  ;;  %v110_v34 = vld [vmem:[#allocation3 + $0x90] sm:$0xff]  ;;  %v48_v27 = vlaneseq }
  0x2d   :  { %7847 = vmatpush1.bf16.msra.mxu0 %v7846_v17  ;;  %v148_v32 = vld [vmem:[%s11482_s0] sm:$0xff]  ;;  %v113_v35 = vld [vmem:[#allocation3 + $0xa8] sm:$0xff]  ;;  %v7868_v36 = vpack.c.bf16 %v115_v30, %v112_v29  ;;  %v119_v42 = vld [vmem:[#allocation5 + $0x18] sm:$0xff] }
  0x2e   :  { %7849 = vmatprep.subr.bf16.mxu0 %v7848_v22  ;;  %7168 = vmatprep.mubr.msk.f32.mxu1 %vm180_vm0, %v148_v32  ;;  %v7854_v37 = vpack.c.bf16 %v113_v35, %v110_v34  ;;  %v117_v38 = vld [vmem:[#allocation5 + $0x8] sm:$0xff]  ;;  %v120_v39 = vld [vmem:[#allocation5 + $0x20] sm:$0xff]  ;;  %v123_v43 = vld [vmem:[#allocation5 + $0x38] sm:$0xff]  ;;  %v9400_v28 = vshrl.u32 %v48_v27, 7 }
  0x2f   :  { %7863 = vmatpush3.bf16.msra.mxu1 %v7860_v18  ;;  %v9243_v40 = vpack.c.bf16 %v120_v39, %v117_v38  ;;  %v116_v41 = vld [vmem:[#allocation5] sm:$0xff]  ;;  %v126_v44 = vld [vmem:[#allocation5 + $0x50] sm:$0xff]  ;;  %v149_v45 = vld [vmem:[%s11482_s0 + $0x8] sm:$0xff] }
  0x30   :  { %7865 = vmatprep.subr.bf16.mxu1 %v7864_v26  ;;  %v9248_v46 = vpack.c.bf16 %v119_v42, %v116_v41  ;;  %v150_v47 = vld [vmem:[%s11482_s0 + $0x10] sm:$0xff]  ;;  %v9255_v48 = vpack.c.bf16 %v126_v44, %v123_v43  ;;  %v125_v50 = vld [vmem:[#allocation5 + $0x48] sm:$0xff]  ;;  %v132_v52 = vld [vmem:[#allocation5 + $0x80] sm:$0xff]  ;;  %11542 = vst [vmem:[#allocation9_spill] sm:$0xff] %v9400_v28  ;;  %v11490_v29 = vsub.s32 2, %v9400_v28  ;;  %v11488_v34 = vsub.s32 1, %v9400_v28 }
  0x31   :  { %7851 = vmatpush1.bf16.msra.mxu0 %v7850_v31  ;;  %v122_v49 = vld [vmem:[#allocation5 + $0x30] sm:$0xff]  ;;  %v129_v51 = vld [vmem:[#allocation5 + $0x68] sm:$0xff]  ;;  %v151_v53 = vld [vmem:[%s11482_s0 + $0x18] sm:$0xff] }
  0x32   :  { %7853 = vmatprep.subr.bf16.mxu0 %v7852_v33  ;;  %v9265_v54 = vpack.c.bf16 %v125_v50, %v122_v49  ;;  %v152_v55 = vld [vmem:[%s11482_s0 + $0x20] sm:$0xff]  ;;  %v9271_v56 = vpack.c.bf16 %v132_v52, %v129_v51  ;;  %v131_v58 = vld [vmem:[#allocation5 + $0x78] sm:$0xff]  ;;  %v138_v60 = vld [vmem:[#allocation5 + $0xb0] sm:$0xff]  ;;  %v9438_v51 = vand.u32 127, %v48_v27 }
  0x33   :  { %7867 = vmatpush3.bf16.msra.mxu1 %v7864_v26  ;;  %v128_v57 = vld [vmem:[#allocation5 + $0x60] sm:$0xff]  ;;  %v135_v59 = vld [vmem:[#allocation5 + $0x98] sm:$0xff]  ;;  %v153_v61 = vld [vmem:[%s11482_s0 + $0x28] sm:$0xff] }
  0x34   :  { %7869 = vmatprep.subr.bf16.mxu1 %v7868_v36  ;;  %v9283_v62 = vpack.c.bf16 %v131_v58, %v128_v57  ;;  %v154_v63 = vld [vmem:[%s11482_s0 + $0x30] sm:$0xff]  ;;  %v9289_v1 = vpack.c.bf16 %v138_v60, %v135_v59  ;;  %v137_v3 = vld [vmem:[#allocation5 + $0xa8] sm:$0xff]  ;;  %v155_v4 = vld [vmem:[%s11482_s0 + $0x38] sm:$0xff]  ;;  %11543 = vst [vmem:[#allocation10_spill] sm:$0xff] %v9438_v51  ;;  %vm88_vm3 = vcmp.lt.s32.totalorder %v9438_v51, 32 }
  0x35   :  { %7855 = vmatpush1.bf16.msra.mxu0 %v7854_v37  ;;  %v134_v2 = vld [vmem:[#allocation5 + $0x90] sm:$0xff]  ;;  %v156_v6 = vld [vmem:[%s11482_s0 + $0x40] sm:$0xff]  ;;  %v157_v7 = vld [vmem:[%s11482_s0 + $0x48] sm:$0xff] }
  0x36   :  { %7901 = vmatprep.subr.bf16.mxu0 %v9243_v40  ;;  %v9301_v5 = vpack.c.bf16 %v137_v3, %v134_v2  ;;  %v158_v8 = vld [vmem:[%s11482_s0 + $0x50] sm:$0xff]  ;;  %v159_v10 = vld [vmem:[%s11482_s0 + $0x58] sm:$0xff]  ;;  %v160_v11 = vld [vmem:[%s11482_s0 + $0x60] sm:$0xff] }
  0x37   :  { %7871 = vmatpush3.bf16.msra.mxu1 %v7868_v36  ;;  %v161_v12 = vld [vmem:[%s11482_s0 + $0x68] sm:$0xff]  ;;  %v162_v13 = vld [vmem:[%s11482_s0 + $0x70] sm:$0xff]  ;;  %v163_v14 = vld [vmem:[%s11482_s0 + $0x78] sm:$0xff] }
  0x38   :  { %7873 = vmatprep.subr.bf16.mxu1 %v9243_v40  ;;  %6625 = vmatmul.mubr.msk.f32.vlgmr.msra.gmra.mrb[0].mxu0 %vm180_vm0, %v148_v32  ;;  %v118_v15 = vld [vmem:[#allocation5 + $0x10] sm:$0xff]  ;;  %v121_v16 = vld [vmem:[#allocation5 + $0x28] sm:$0xff]  ;;  %v124_v18 = vld [vmem:[#allocation5 + $0x40] sm:$0xff]  ;;  %v11489_v32 = vsub.s32 0, %v9400_v28 }
  0x39   :  { %299 = vmatprep.mubr.f32.mxu0 %v11491_v0  ;;  %7903 = vmatpush1.bf16.msra.mxu0 %v9248_v46  ;;  %v9354_v17 = vpack.c.bf16 %v121_v16, %v118_v15  ;;  %v127_v19 = vld [vmem:[#allocation5 + $0x58] sm:$0xff]  ;;  %v130_v21 = vld [vmem:[#allocation5 + $0x70] sm:$0xff]  ;;  %v133_v22 = vld [vmem:[#allocation5 + $0x88] sm:$0xff] }
  0x3a   :  { %7169 = vmatmul.mubr.msk.f32.vlgmr.msra.gmra.mrb[0].mxu1 %vm180_vm0, %v149_v45  ;;  %7905 = vmatprep.subr.bf16.mxu0 %v9255_v48  ;;  %v9360_v20 = vpack.c.bf16 %v127_v19, %v124_v18  ;;  %v9368_v23 = vpack.c.bf16 %v133_v22, %v130_v21  ;;  %v136_v24 = vld [vmem:[#allocation5 + $0xa0] sm:$0xff]  ;;  %v139_v25 = vld [vmem:[#allocation5 + $0xb8] sm:$0xff] }
  0x3b   :  { %7171 = vmatprep.mubr.msk.f32.mxu1 %vm180_vm0, %v150_v47  ;;  %7875 = vmatpush1.bf16.msra.mxu1 %v9248_v46  ;;  %v9374_v26 = vpack.c.bf16 %v139_v25, %v136_v24  ;;  %v140_v30 = vld [vmem:[%s11485_s3] sm:$0x7] }
  0x3c   :  { %7877 = vmatprep.subr.bf16.mxu1 %v9255_v48  ;;  %6626 = vmatmul.mubr.msk.f32.gmra.mrb[2].mxu0 %vm180_vm0, %v149_v45  ;;  %v9408_v31 = vrot.slane %v140_v30, %v11490_v29  ;;  %v9423_v39 = vrot.slane %v140_v30, %v11489_v32  ;;  %v9427_v41 = vrot.slane %v140_v30, %v11488_v34 }
  0x3d   :  { %305 = vmatprep.mubr.f32.mxu0 %v11491_v0  ;;  %7907 = vmatpush1.bf16.msra.mxu0 %v9265_v54 }
  0x3e   :  { %7172 = vmatmul.mubr.msk.f32.gmra.mrb[2].mxu1 %vm180_vm0, %v151_v53  ;;  %7909 = vmatprep.subr.bf16.mxu0 %v9271_v56 }
  0x3f   :  { %7174 = vmatprep.mubr.msk.f32.mxu1 %vm180_vm0, %v152_v55  ;;  %7879 = vmatpush1.bf16.msra.mxu1 %v9265_v54 }
  0x40   :  { %7881 = vmatprep.subr.bf16.mxu1 %v9271_v56  ;;  %6627 = vmatmul.mubr.msk.f32.gmra.mrb[4].mxu0 %vm180_vm0, %v150_v47 }
  0x41   :  { %311 = vmatprep.mubr.f32.mxu0 %v11491_v0  ;;  %7911 = vmatpush1.bf16.msra.mxu0 %v9283_v62 }
  0x42   :  { %7175 = vmatmul.mubr.msk.f32.gmra.mrb[4].mxu1 %vm180_vm0, %v153_v61  ;;  %7913 = vmatprep.subr.bf16.mxu0 %v9289_v1 }
  0x43   :  { %7177 = vmatprep.mubr.msk.f32.mxu1 %vm180_vm0, %v154_v63  ;;  %7883 = vmatpush1.bf16.msra.mxu1 %v9283_v62 }
  0x44   :  { %7885 = vmatprep.subr.bf16.mxu1 %v9289_v1  ;;  %6628 = vmatmul.mubr.msk.f32.gmra.mrb[6].mxu0 %vm180_vm0, %v151_v53 }
  0x45   :  { %317 = vmatprep.mubr.f32.mxu0 %v11491_v0  ;;  %7915 = vmatpush1.bf16.msra.mxu0 %v9301_v5 }
  0x46   :  { %7178 = vmatmul.mubr.msk.f32.gmra.mrb[6].mxu1 %vm180_vm0, %v155_v4  ;;  %7929 = vmatprep.subr.bf16.mxu0 %v9243_v40 }
  0x47   :  { %7180 = vmatprep.mubr.msk.f32.mxu1 %vm180_vm0, %v156_v6  ;;  %7887 = vmatpush1.bf16.msra.mxu1 %v9301_v5 }
  0x48   :  { %7888 = vmatprep.subr.bf16.mxu1 %v11493_v9  ;;  %6629 = vmatmul.mubr.msk.f32.gmra.mrb[8].mxu0 %vm180_vm0, %v152_v55 }
  0x49   :  { %323 = vmatprep.mubr.f32.mxu0 %v11491_v0 }
  0x4a   :  { %7181 = vmatmul.mubr.msk.f32.gmra.mrb[8].mxu1 %vm180_vm0, %v157_v7 }
  0x4b   :  { %7183 = vmatprep.mubr.msk.f32.mxu1 %vm180_vm0, %v158_v8 }
  0x4c   :  { %6630 = vmatmul.mubr.msk.f32.gmra.mrb[10].mxu0 %vm180_vm0, %v153_v61 }
  0x4d   :  { %329 = vmatprep.mubr.f32.mxu0 %v11491_v0 }
  0x4e   :  { %7184 = vmatmul.mubr.msk.f32.gmra.mrb[10].mxu1 %vm180_vm0, %v159_v10 }
  0x4f   :  { %7186 = vmatprep.mubr.msk.f32.mxu1 %vm180_vm0, %v160_v11 }
  0x50   :  { %6631 = vmatmul.mubr.msk.f32.gmra.mrb[12].mxu0 %vm180_vm0, %v154_v63  ;;  %v51_v63 = vadd.s32 256, %v9438_v51 }
  0x51   :  { %335 = vmatprep.mubr.f32.mxu0 %v11491_v0 }
  0x52   :  { %7187 = vmatmul.mubr.msk.f32.gmra.mrb[12].mxu1 %vm180_vm0, %v161_v12 }
  0x53   :  { %7189 = vmatprep.mubr.msk.f32.mxu1 %vm180_vm0, %v162_v13 }
  0x54   :  { %6632 = vmatmul.mubr.msk.f32.gmra.mrb[14].mxu0 %vm180_vm0, %v155_v4 }
  0x55   :  { %341 = vmatprep.mubr.f32.mxu0 %v11491_v0 }
  0x56   :  { %7190 = vmatmul.mubr.msk.f32.gmra.mrb[14].mxu1 %vm180_vm0, %v163_v14 }
  0x57   :  { %665 = vmatprep.mubr.f32.mxu1 %v11491_v0 }
  0x58   :  { %6633 = vmatmul.mubr.msk.f32.gmra.mrb[16].mxu0 %vm180_vm0, %v156_v6 }
  0x59   :  { %347 = vmatprep.mubr.f32.mxu0 %v11491_v0 }
  0x5a   :  { %666 = vmatmul.mubr.f32.vlgmr.msra.gmra.mrb[16].mxu1 %v11491_v0 }
  0x5b   :  { %7890 = vmatpush3.bf16.msra.mxu1 %v9354_v17  ;;  %7208 = vmatprep.mubr.msk.f32.mxu1 %vm9183_vm1, %v11491_v0 }
  0x5c   :  { %7891 = vmatprep.subr.bf16.mxu1 %v11493_v9  ;;  %6634 = vmatmul.mubr.msk.f32.gmra.mrb[18].mxu0 %vm180_vm0, %v157_v7 }
  0x5d   :  { %353 = vmatprep.mubr.f32.mxu0 %v11491_v0 }
  0x5f   :  { %7893 = vmatpush3.bf16.msra.mxu1 %v9360_v20 }
  0x60   :  { %7894 = vmatprep.subr.bf16.mxu1 %v11493_v9  ;;  %6635 = vmatmul.mubr.msk.f32.gmra.mrb[20].mxu0 %vm180_vm0, %v158_v8 }
  0x61   :  { %359 = vmatprep.mubr.f32.mxu0 %v11491_v0 }
  0x63   :  { %7896 = vmatpush3.bf16.msra.mxu1 %v9368_v23 }
  0x64   :  { %7897 = vmatprep.subr.bf16.mxu1 %v11493_v9  ;;  %6636 = vmatmul.mubr.msk.f32.gmra.mrb[22].mxu0 %vm180_vm0, %v159_v10 }
  0x65   :  { %365 = vmatprep.mubr.f32.mxu0 %v11491_v0 }
  0x67   :  { %7899 = vmatpush3.bf16.msra.mxu1 %v9374_v26 }
  0x68   :  { %7916 = vmatprep.subr.bf16.mxu1 %v11493_v9  ;;  %6637 = vmatmul.mubr.msk.f32.gmra.mrb[24].mxu0 %vm180_vm0, %v160_v11 }
  0x69   :  { %371 = vmatprep.mubr.f32.mxu0 %v11491_v0 }
  0x6a   :  { %7209 = vmatmul.mubr.f32.vlgmr.msra.gmra.mrb[18].mxu1 %v11491_v0 }
  0x6b   :  { %7918 = vmatpush3.bf16.msra.mxu1 %v9354_v17  ;;  %7227 = vmatprep.mubr.msk.f32.mxu1 %vm9183_vm1, %v11491_v0 }
  0x6c   :  { %7919 = vmatprep.subr.bf16.mxu1 %v11493_v9  ;;  %6638 = vmatmul.mubr.msk.f32.gmra.mrb[26].mxu0 %vm180_vm0, %v161_v12  ;;  %v70_v12 = vand.u32 127, %v51_v63 }
  0x6d   :  { %377 = vmatprep.mubr.f32.mxu0 %v11491_v0 }
  0x6e   :  { %vm9477_vm2 = vcmp.lt.s32.totalorder %v70_v12, 32 }
  0x6f   :  { %7921 = vmatpush3.bf16.msra.mxu1 %v9360_v20 }
  0x70   :  { %7922 = vmatprep.subr.bf16.mxu1 %v11493_v9  ;;  %6639 = vmatmul.mubr.msk.f32.gmra.mrb[28].mxu0 %vm180_vm0, %v162_v13 }
  0x71   :  { %383 = vmatprep.mubr.f32.mxu0 %v11491_v0 }
  0x73   :  { %7924 = vmatpush3.bf16.msra.mxu1 %v9368_v23 }
  0x74   :  { %7925 = vmatprep.subr.bf16.mxu1 %v11493_v9  ;;  %6640 = vmatmul.mubr.msk.f32.gmra.mrb[30].mxu0 %vm180_vm0, %v163_v14 }
  0x75   :  { %840 = vmatprep.mubr.f32.mxu0 %v11491_v0 }
  0x77   :  { %7927 = vmatpush3.bf16.msra.mxu1 %v9374_v26 }
  0x78   :  { %7944 = vmatprep.subr.bf16.mxu1 %v11493_v9 }
 0x10b   :  { %v9411_v33 = vpop.f32.mrb[0].mxu0 }
 0x10c   :  { %v9414_v35 = vpop.f32.mrb[1].mxu0 }
 0x10d   :  { %v7170_v36 = vpop.f32.mrb[0].mxu1 }
 0x10e   :  { %v9417_v37 = vadd.f32 %v7170_v36, %v9408_v31  ;;  %v9419_v38 = vpop.f32.mrb[1].mxu1 }
 0x10f   :  { %v301_v42 = vpop.f32.mrb[2].mxu0 }
 0x110   :  { %v9430_v43 = vadd.f32 %v301_v42, %v9423_v39  ;;  %v303_v44 = vpop.f32.mrb[3].mxu0 }
 0x111   :  { %v7173_v45 = vpop.f32.mrb[2].mxu1  ;;  %v9433_v47 = vadd.f32 %v303_v44, %v9427_v41 }
 0x112   :  { %v9436_v49 = vadd.f32 %v7173_v45, %v9408_v31  ;;  %v466_v50 = vpop.f32.mrb[3].mxu1 }
 0x113   :  { %v9441_v52 = vadd.f32 %v466_v50, %v9408_v31  ;;  %v307_v53 = vpop.f32.mrb[4].mxu0 }
 0x114   :  { %v9444_v55 = vadd.f32 %v307_v53, %v9423_v39  ;;  %v309_v57 = vpop.f32.mrb[5].mxu0 }
 0x115   :  { %v7176_v58 = vpop.f32.mrb[4].mxu1  ;;  %v9447_v59 = vadd.f32 %v309_v57, %v9427_v41 }
 0x116   :  { %v9450_v60 = vadd.f32 %v7176_v58, %v9408_v31  ;;  %v476_v61 = vpop.f32.mrb[5].mxu1 }
 0x117   :  { %v9454_v2 = vadd.f32 %v476_v61, %v9408_v31  ;;  %v313_v3 = vpop.f32.mrb[6].mxu0 }
 0x118   :  { %v9457_v4 = vadd.f32 %v313_v3, %v9423_v39  ;;  %v315_v6 = vpop.f32.mrb[7].mxu0 }
 0x119   :  { %v7179_v7 = vpop.f32.mrb[6].mxu1  ;;  %v9460_v8 = vadd.f32 %v315_v6, %v9427_v41 }
 0x11a   :  { %v9463_v10 = vadd.f32 %v7179_v7, %v9408_v31  ;;  %v486_v11 = vpop.f32.mrb[7].mxu1 }
 0x11b   :  { %v9466_v13 = vadd.f32 %v486_v11, %v9408_v31  ;;  %v319_v14 = vpop.f32.mrb[8].mxu0  ;;  %v50_v11 = vadd.s32 128, %v9438_v51 }
 0x11c   :  { %11544 = vst [vmem:[#allocation11_spill] sm:$0xff] %v9463_v10  ;;  %v9469_v15 = vadd.f32 %v319_v14, %v9423_v39  ;;  %v321_v16 = vpop.f32.mrb[9].mxu0 }
 0x11d   :  { %v7182_v18 = vpop.f32.mrb[8].mxu1  ;;  %v9472_v19 = vadd.f32 %v321_v16, %v9427_v41 }
 0x11e   :  { %v9475_v21 = vadd.f32 %v7182_v18, %v9408_v31  ;;  %v496_v22 = vpop.f32.mrb[9].mxu1 }
 0x11f   :  { %v9482_v25 = vadd.f32 %v496_v22, %v9408_v31  ;;  %v325_v27 = vpop.f32.mrb[10].mxu0 }
 0x120   :  { %v9493_v42 = vadd.f32 %v325_v27, %v9423_v39  ;;  %v327_v44 = vpop.f32.mrb[11].mxu0 }
 0x121   :  { %11547 = vst [vmem:[#allocation12_spill] sm:$0xff] %v9482_v25  ;;  %v7185_v53 = vpop.f32.mrb[10].mxu1  ;;  %v9504_v57 = vadd.f32 %v327_v44, %v9427_v41 }
 0x122   :  { %v9507_v58 = vadd.f32 %v7185_v53, %v9408_v31  ;;  %v506_v61 = vpop.f32.mrb[11].mxu1 }
 0x123   :  { %v9510_v63 = vadd.f32 %v506_v61, %v9408_v31  ;;  %v331_v3 = vpop.f32.mrb[12].mxu0 }
 0x124   :  { %v332_v12 = vadd.f32 %v331_v3, %v9423_v39  ;;  %v333_v14 = vpop.f32.mrb[13].mxu0  ;;  %v9541_v3 = vadd.f32 %v9419_v38, %v9408_v31 }
 0x125   :  { %v7188_v22 = vpop.f32.mrb[12].mxu1  ;;  %v9531_v27 = vadd.f32 %v333_v14, %v9427_v41 }
 0x126   :  { %v9534_v44 = vadd.f32 %v7188_v22, %v9408_v31  ;;  %v516_v53 = vpop.f32.mrb[13].mxu1  ;;  %11548 = vst [vmem:[#allocation13_spill] sm:$0xff] %v9541_v3  ;;  %v63_v22 = vand.u32 127, %v50_v11 }
 0x127   :  { %v9537_v61 = vadd.f32 %v516_v53, %v9408_v31  ;;  %v337_v34 = vpop.f32.mrb[14].mxu0 }
 0x128   :  { %v338_v29 = vadd.f32 %v337_v34, %v9423_v39  ;;  %v339_v53 = vpop.f32.mrb[15].mxu0  ;;  %vm9578_vm4 = vcmp.lt.s32.totalorder %v63_v22, 32 }
 0x129   :  { %v7191_v18 = vpop.f32.mrb[14].mxu1  ;;  %v9561_v36 = vadd.f32 %v339_v53, %v9427_v41 }
 0x12a   :  { %v9564_v14 = vadd.f32 %v7191_v18, %v9408_v31  ;;  %v526_v11 = vpop.f32.mrb[15].mxu1 }
 0x12b   :  { %11549 = vst [vmem:[#allocation14_spill] sm:$0xff] %v9561_v36  ;;  %v9567_v34 = vadd.f32 %v526_v11, %v9408_v31  ;;  %v343_v7 = vpop.f32.mrb[16].mxu0 }
 0x12c   :  { %11550 = vst [vmem:[#allocation15_spill] sm:$0xff] %v9564_v14  ;;  %v344_v45 = vadd.f32 %v343_v7, %v9423_v39  ;;  %v345_v30 = vpop.f32.mrb[17].mxu0 }
 0x12d   :  { %v9591_v16 = vpop.f32.mrb[16].mxu1  ;;  %v9594_v22 = vadd.f32 %v345_v30, %v9427_v41 }
 0x12e   :  { %v9596_v53 = vpop.f32.mrb[17].mxu1  ;;  %v9600_v6 = vsel %vm88_vm3, %v338_v29, %v344_v45  ;;  %v9604_v38 = vsel %vm88_vm3, %v344_v45, %v338_v29 }
 0x12f   :  { %11553 = vst [vmem:[#allocation16_spill] sm:$0xff] %v9594_v22  ;;  %11554 = vst [vmem:[#allocation17_spill] sm:$0xff] %v9600_v6  ;;  %v349_v32 = vpop.f32.mrb[18].mxu0 }
 0x130   :  { %11555 = vst [vmem:[#allocation18_spill] sm:$0xff] %v9604_v38  ;;  %v350_v11 = vadd.f32 %v349_v32, %v9423_v39  ;;  %v351_v31 = vpop.f32.mrb[19].mxu0 }
 0x131   :  { %v9616_v0 = vadd.f32 %v351_v31, %v9427_v41 }
 0x132   :  { %v9620_v29 = vsel %vm88_vm3, %v332_v12, %v350_v11  ;;  %v9624_v45 = vsel %vm88_vm3, %v350_v11, %v332_v12 }
 0x133   :  { %11556 = vst [vmem:[#allocation19_spill] sm:$0xff] %v9624_v45  ;;  %v355_v7 = vpop.f32.mrb[20].mxu0 }
 0x134   :  { %v356_v31 = vadd.f32 %v355_v7, %v9423_v39  ;;  %v357_v9 = vpop.f32.mrb[21].mxu0 }
 0x135   :  { %v9636_v50 = vadd.f32 %v357_v9, %v9427_v41 }
 0x136   :  { %v9641_v12 = vsel %vm88_vm3, %v9493_v42, %v356_v31  ;;  %v9646_v11 = vsel %vm88_vm3, %v356_v31, %v9493_v42 }
 0x137   :  { %11557 = vst [vmem:[#allocation20_spill] sm:$0xff] %v9646_v11  ;;  %v361_v30 = vpop.f32.mrb[22].mxu0 }
 0x138   :  { %v362_v32 = vadd.f32 %v361_v30, %v9423_v39  ;;  %v363_v28 = vpop.f32.mrb[23].mxu0 }
 0x139   :  { %v9658_v45 = vadd.f32 %v363_v28, %v9427_v41 }
 0x13a   :  { %v9663_v42 = vsel %vm88_vm3, %v9469_v15, %v362_v32  ;;  %v9668_v31 = vsel %vm88_vm3, %v362_v32, %v9469_v15 }
 0x13b   :  { %11558 = vst [vmem:[#allocation21_spill] sm:$0xff] %v9668_v31  ;;  %v367_v7 = vpop.f32.mrb[24].mxu0 }
 0x13c   :  { %v368_v9 = vadd.f32 %v367_v7, %v9423_v39  ;;  %v369_v11 = vpop.f32.mrb[25].mxu0 }
 0x13d   :  { %v738_v38 = vpop.f32.mrb[18].mxu1  ;;  %v9680_v25 = vadd.f32 %v369_v11, %v9427_v41 }
 0x13e   :  { %v7210_v15 = vpop.f32.mrb[19].mxu1  ;;  %v9685_v32 = vsel %vm88_vm3, %v9457_v4, %v368_v9  ;;  %v9690_v30 = vsel %vm88_vm3, %v368_v9, %v9457_v4 }
 0x13f   :  { %11559 = vst [vmem:[#allocation22_spill] sm:$0xff] %v9690_v30  ;;  %v373_v31 = vpop.f32.mrb[26].mxu0 }
 0x140   :  { %v374_v15 = vadd.f32 %v373_v31, %v9423_v39  ;;  %v375_v28 = vpop.f32.mrb[27].mxu0 }
 0x141   :  { %v9702_v10 = vadd.f32 %v375_v28, %v9427_v41 }
 0x142   :  { %v9707_v4 = vsel %vm88_vm3, %v9444_v55, %v374_v15  ;;  %v9712_v9 = vsel %vm88_vm3, %v374_v15, %v9444_v55 }
 0x143   :  { %11560 = vst [vmem:[#allocation23_spill] sm:$0xff] %v9712_v9  ;;  %v379_v7 = vpop.f32.mrb[28].mxu0 }
 0x144   :  { %v380_v11 = vadd.f32 %v379_v7, %v9423_v39  ;;  %v381_v30 = vpop.f32.mrb[29].mxu0  ;;  %v296_v7 = vadd.f32 %v9411_v33, %v9423_v39 }
 0x145   :  { %v9724_v22 = vadd.f32 %v381_v30, %v9427_v41 }
 0x146   :  { %v770_v55 = vsel %vm88_vm3, %v9430_v43, %v380_v11  ;;  %v9732_v15 = vsel %vm88_vm3, %v380_v11, %v9430_v43  ;;  %v9747_v43 = vadd.f32 %v9414_v35, %v9427_v41 }
 0x147   :  { %11561 = vst [vmem:[#allocation24_spill] sm:$0xff] %v9732_v15  ;;  %v385_v31 = vpop.f32.mrb[30].mxu0  ;;  %v771_v28 = vsel %vm9578_vm4, %v9433_v47, %v9724_v22 }
 0x148   :  { %v386_v9 = vadd.f32 %v385_v31, %v9423_v39  ;;  %v387_v36 = vpop.f32.mrb[31].mxu0  ;;  %11562 = vst [vmem:[#allocation25_spill] sm:$0xff] %v9747_v43 }
 0x149   :  { %v9750_v11 = vadd.f32 %v387_v36, %v9427_v41 }
 0x14a   :  { %v595_v15 = vsel %vm88_vm3, %v296_v7, %v386_v9  ;;  %v9756_v6 = vsel %vm88_vm3, %v386_v9, %v296_v7 }
 0x14b   :  { %11563 = vst [vmem:[#allocation26_spill] sm:$0xff] %v9750_v11  ;;  %11564 = vst [vmem:[#allocation27_spill] sm:$0xff] %v9756_v6  ;;  %v742_v30 = vadd.f32 %v9591_v16, %v595_v15  ;;  %v596_v33 = vsel %vm9578_vm4, %v9747_v43, %v9750_v11  ;;  %v9771_v15 = vld [vmem:[%s11486_s4] ss:$0 sm:$0xff] }
 0x14c   :  { %v743_v39 = vadd.f32 %v9596_v53, %v596_v33  ;;  %v756_v51 = vadd.f32 %v9771_v15, %v738_v38  ;;  %v11565_v53 = vsel %vm9477_vm2, %v9541_v3, %v9564_v14 }
 0x14d   :  { %v6657_v41 = vmul.f32 -1.442695, %v742_v30 }
 0x14e   :  { %v6658_v36 = vmul.f32 -1.442695, %v743_v39 }
 0x14f   :  { %8807 = vpow2.f32 %v6657_v41 }
 0x150   :  { %8809 = vpow2.f32 %v6658_v36 }
 0x159   :  { %v8808_v9 = vpop.eup %8807 }
 0x15a   :  { %v747_v31 = vadd.f32 1.0, %v8808_v9  ;;  %v8810_v16 = vpop.eup %8809 }
 0x15b   :  { %v753_v7 = vadd.f32 1.0, %v8810_v16 }
 0x15c   :  { %8811 = vrcp.f32 %v747_v31 }
 0x15d   :  { %8813 = vrcp.f32 %v753_v7 }
 0x166   :  { %v8812_v6 = vpop.eup %8811 }
 0x167   :  { %v757_v35 = vmul.f32 %v8812_v6, %v756_v51  ;;  %v8814_v33 = vpop.eup %8813  ;;  %v11566_v51 = vmov 0.0|0.0   ;;  %v11567_v6 = vmov 0.0  }
 0x168   :  { %v760_v39 = vsub.f32 1.0, %v8814_v33  ;;  %v762_v36 = vmul.f32 0.0, %v8814_v33 }
 0x169   :  { %v758_v30 = vadd.f32 %v757_v35, %v11565_v53 }
 0x16b   :  { %8815 = vtanh.f32 %v758_v30 }
 0x175   :  { %v8816_v41 = vpop.eup %8815 }
 0x176   :  { %v761_v9 = vmul.f32 %v8816_v41, %v760_v39 }
 0x178   :  { %v9779_v31 = vadd.f32 %v762_v36, %v761_v9 }
 0x17a   :  { %6659 = vmatmul.mubr.msk.f32.vlgmr.msra.gmra.mrb[32].mxu0 %vm180_vm0, %v9779_v31  ;;  %7228 = vmatmul.mubr.msk.f32.vlgmr.msra.gmra.mrb[20].mxu1 %vm180_vm0, %v9779_v31 }
 0x17b   :  { %7931 = vmatpush1.bf16.msra.mxu0 %v9248_v46  ;;  %7946 = vmatpush3.bf16.msra.mxu1 %v9354_v17 }
 0x17c   :  { %7933 = vmatprep.subr.bf16.mxu0 %v9255_v48  ;;  %7947 = vmatprep.subr.bf16.mxu1 %v11566_v51 }
 0x17d   :  { %1015 = vmatprep.mubr.f32.mxu0 %v11567_v6  ;;  %7246 = vmatprep.mubr.msk.f32.mxu1 %vm9183_vm1, %v11567_v6 }
 0x17f   :  { %7935 = vmatpush1.bf16.msra.mxu0 %v9265_v54  ;;  %7949 = vmatpush3.bf16.msra.mxu1 %v9360_v20 }
 0x180   :  { %7937 = vmatprep.subr.bf16.mxu0 %v9271_v56  ;;  %7950 = vmatprep.subr.bf16.mxu1 %v11566_v51 }
 0x183   :  { %7939 = vmatpush1.bf16.msra.mxu0 %v9283_v62  ;;  %7952 = vmatpush3.bf16.msra.mxu1 %v9368_v23 }
 0x184   :  { %7941 = vmatprep.subr.bf16.mxu0 %v9289_v1  ;;  %7953 = vmatprep.subr.bf16.mxu1 %v11566_v51 }
 0x187   :  { %7943 = vmatpush1.bf16.msra.mxu0 %v9301_v5  ;;  %7955 = vmatpush3.bf16.msra.mxu1 %v9374_v26 }
 0x188   :  { %7957 = vmatprep.subr.bf16.mxu0 %v9243_v40  ;;  %7972 = vmatprep.subr.bf16.mxu1 %v11566_v51 }
 0x24d   :  { %v842_v38 = vpop.f32.mrb[32].mxu0  ;;  %v913_v35 = vpop.f32.mrb[20].mxu1 }
 0x24e   :  { %v917_v16 = vadd.f32 %v842_v38, %v770_v55  ;;  %v844_v7 = vpop.f32.mrb[33].mxu0  ;;  %v7229_v53 = vpop.f32.mrb[21].mxu1  ;;  %v931_v14 = vadd.f32 %v9771_v15, %v913_v35  ;;  %v11568_v55 = vsel %vm9477_vm2, %v9417_v37, %v9567_v34 }
 0x24f   :  { %v918_v30 = vadd.f32 %v844_v7, %v771_v28 }
 0x250   :  { %v6661_v33 = vmul.f32 -1.442695, %v917_v16 }
 0x251   :  { %v6662_v39 = vmul.f32 -1.442695, %v918_v30 }
 0x252   :  { %8817 = vpow2.f32 %v6661_v33 }
 0x253   :  { %8819 = vpow2.f32 %v6662_v39  ;;  %v11569_v39 = vsel %vm9578_vm4, %v9447_v59, %v9702_v10 }
 0x25c   :  { %v8818_v41 = vpop.eup %8817 }
 0x25d   :  { %v922_v36 = vadd.f32 1.0, %v8818_v41  ;;  %v8820_v9 = vpop.eup %8819 }
 0x25e   :  { %v928_v3 = vadd.f32 1.0, %v8820_v9 }
 0x25f   :  { %8821 = vrcp.f32 %v922_v36 }
 0x260   :  { %8823 = vrcp.f32 %v928_v3 }
 0x269   :  { %v8822_v43 = vpop.eup %8821 }
 0x26a   :  { %v932_v11 = vmul.f32 %v8822_v43, %v931_v14  ;;  %v8824_v38 = vpop.eup %8823 }
 0x26b   :  { %v935_v16 = vsub.f32 1.0, %v8824_v38  ;;  %v937_v30 = vmul.f32 %v8824_v38, %v9779_v31 }
 0x26c   :  { %v933_v28 = vadd.f32 %v932_v11, %v11568_v55 }
 0x26e   :  { %8825 = vtanh.f32 %v933_v28 }
 0x278   :  { %v8826_v7 = vpop.eup %8825 }
 0x279   :  { %v936_v53 = vmul.f32 %v8826_v7, %v935_v16 }
 0x27b   :  { %v9811_v33 = vadd.f32 %v937_v30, %v936_v53  ;;  %v11570_v30 = vsel %vm9477_vm2, %v9441_v52, %v9534_v44 }
 0x27d   :  { %6663 = vmatmul.mubr.msk.f32.vlgmr.msra.gmra.mrb[34].mxu0 %vm180_vm0, %v9811_v33  ;;  %7247 = vmatmul.mubr.msk.f32.vlgmr.msra.gmra.mrb[22].mxu1 %vm180_vm0, %v9811_v33 }
 0x27e   :  { %7959 = vmatpush1.bf16.msra.mxu0 %v9248_v46  ;;  %7974 = vmatpush3.bf16.msra.mxu1 %v9354_v17 }
 0x27f   :  { %7961 = vmatprep.subr.bf16.mxu0 %v9255_v48  ;;  %7975 = vmatprep.subr.bf16.mxu1 %v11566_v51 }
 0x280   :  { %1190 = vmatprep.mubr.f32.mxu0 %v11567_v6  ;;  %7265 = vmatprep.mubr.msk.f32.mxu1 %vm9183_vm1, %v11567_v6 }
 0x282   :  { %7963 = vmatpush1.bf16.msra.mxu0 %v9265_v54  ;;  %7977 = vmatpush3.bf16.msra.mxu1 %v9360_v20 }
 0x283   :  { %7965 = vmatprep.subr.bf16.mxu0 %v9271_v56  ;;  %7978 = vmatprep.subr.bf16.mxu1 %v11566_v51 }
 0x286   :  { %7967 = vmatpush1.bf16.msra.mxu0 %v9283_v62  ;;  %7980 = vmatpush3.bf16.msra.mxu1 %v9368_v23 }
 0x287   :  { %7969 = vmatprep.subr.bf16.mxu0 %v9289_v1  ;;  %7981 = vmatprep.subr.bf16.mxu1 %v11566_v51 }
 0x28a   :  { %7971 = vmatpush1.bf16.msra.mxu0 %v9301_v5  ;;  %7983 = vmatpush3.bf16.msra.mxu1 %v9374_v26 }
 0x28b   :  { %7985 = vmatprep.subr.bf16.mxu0 %v9243_v40  ;;  %8000 = vmatprep.subr.bf16.mxu1 %v11566_v51 }
 0x350   :  { %v1017_v3 = vpop.f32.mrb[34].mxu0  ;;  %v1088_v14 = vpop.f32.mrb[22].mxu1 }
 0x351   :  { %v1092_v43 = vadd.f32 %v1017_v3, %v9707_v4  ;;  %v1019_v11 = vpop.f32.mrb[35].mxu0  ;;  %v7248_v35 = vpop.f32.mrb[23].mxu1  ;;  %v1106_v7 = vadd.f32 %v9771_v15, %v1088_v14 }
 0x352   :  { %v1093_v41 = vadd.f32 %v1019_v11, %v11569_v39 }
 0x353   :  { %v6665_v36 = vmul.f32 -1.442695, %v1092_v43 }
 0x354   :  { %v6666_v9 = vmul.f32 -1.442695, %v1093_v41 }
 0x355   :  { %8827 = vpow2.f32 %v6665_v36 }
 0x356   :  { %8829 = vpow2.f32 %v6666_v9 }
 0x35f   :  { %v8828_v55 = vpop.eup %8827 }
 0x360   :  { %v1097_v28 = vadd.f32 1.0, %v8828_v55  ;;  %v8830_v38 = vpop.eup %8829 }
 0x361   :  { %v1103_v16 = vadd.f32 1.0, %v8830_v38 }
 0x362   :  { %8831 = vrcp.f32 %v1097_v28 }
 0x363   :  { %8833 = vrcp.f32 %v1103_v16  ;;  %v11571_v16 = vsel %vm9578_vm4, %v9460_v8, %v9680_v25 }
 0x36c   :  { %v8832_v4 = vpop.eup %8831 }
 0x36d   :  { %v1107_v53 = vmul.f32 %v8832_v4, %v1106_v7  ;;  %v8834_v43 = vpop.eup %8833 }
 0x36e   :  { %v1110_v11 = vsub.f32 1.0, %v8834_v43  ;;  %v1112_v41 = vmul.f32 %v8834_v43, %v9811_v33 }
 0x36f   :  { %v1108_v3 = vadd.f32 %v1107_v53, %v11570_v30 }
 0x371   :  { %8835 = vtanh.f32 %v1108_v3 }
 0x37b   :  { %v8836_v35 = vpop.eup %8835 }
 0x37c   :  { %v1111_v39 = vmul.f32 %v8836_v35, %v1110_v11 }
 0x37e   :  { %v9849_v36 = vadd.f32 %v1112_v41, %v1111_v39  ;;  %v11572_v41 = vsel %vm9477_vm2, %v9436_v49, %v9537_v61 }
 0x380   :  { %6667 = vmatmul.mubr.msk.f32.vlgmr.msra.gmra.mrb[36].mxu0 %vm180_vm0, %v9849_v36  ;;  %7266 = vmatmul.mubr.msk.f32.vlgmr.msra.gmra.mrb[24].mxu1 %vm180_vm0, %v9849_v36 }
 0x381   :  { %7987 = vmatpush1.bf16.msra.mxu0 %v9248_v46  ;;  %8002 = vmatpush3.bf16.msra.mxu1 %v9354_v17 }
 0x382   :  { %7989 = vmatprep.subr.bf16.mxu0 %v9255_v48  ;;  %8003 = vmatprep.subr.bf16.mxu1 %v11566_v51 }
 0x383   :  { %1365 = vmatprep.mubr.f32.mxu0 %v11567_v6  ;;  %7284 = vmatprep.mubr.msk.f32.mxu1 %vm9183_vm1, %v11567_v6 }
 0x385   :  { %7991 = vmatpush1.bf16.msra.mxu0 %v9265_v54  ;;  %8005 = vmatpush3.bf16.msra.mxu1 %v9360_v20 }
 0x386   :  { %7993 = vmatprep.subr.bf16.mxu0 %v9271_v56  ;;  %8006 = vmatprep.subr.bf16.mxu1 %v11566_v51 }
 0x389   :  { %7995 = vmatpush1.bf16.msra.mxu0 %v9283_v62  ;;  %8008 = vmatpush3.bf16.msra.mxu1 %v9368_v23 }
 0x38a   :  { %7997 = vmatprep.subr.bf16.mxu0 %v9289_v1  ;;  %8009 = vmatprep.subr.bf16.mxu1 %v11566_v51 }
 0x38d   :  { %7999 = vmatpush1.bf16.msra.mxu0 %v9301_v5  ;;  %8011 = vmatpush3.bf16.msra.mxu1 %v9374_v26 }
 0x38e   :  { %8013 = vmatprep.subr.bf16.mxu0 %v9243_v40  ;;  %8028 = vmatprep.subr.bf16.mxu1 %v11566_v51 }
 0x453   :  { %v1192_v14 = vpop.f32.mrb[36].mxu0  ;;  %v1263_v9 = vpop.f32.mrb[24].mxu1 }
 0x454   :  { %v1267_v55 = vadd.f32 %v1192_v14, %v9685_v32  ;;  %v1194_v28 = vpop.f32.mrb[37].mxu0  ;;  %v7267_v38 = vpop.f32.mrb[25].mxu1  ;;  %v1281_v35 = vadd.f32 %v9771_v15, %v1263_v9 }
 0x455   :  { %v1268_v7 = vadd.f32 %v1194_v28, %v11571_v16 }
 0x456   :  { %v6669_v4 = vmul.f32 -1.442695, %v1267_v55 }
 0x457   :  { %v6670_v53 = vmul.f32 -1.442695, %v1268_v7 }
 0x458   :  { %8837 = vpow2.f32 %v6669_v4 }
 0x459   :  { %8839 = vpow2.f32 %v6670_v53 }
 0x462   :  { %v8838_v30 = vpop.eup %8837 }
 0x463   :  { %v1272_v3 = vadd.f32 1.0, %v8838_v30  ;;  %v8840_v43 = vpop.eup %8839 }
 0x464   :  { %v1278_v11 = vadd.f32 1.0, %v8840_v43 }
 0x465   :  { %8841 = vrcp.f32 %v1272_v3 }
 0x466   :  { %8843 = vrcp.f32 %v1278_v11  ;;  %v11574_v11 = vsel %vm9578_vm4, %v9472_v19, %v9658_v45 }
 0x46f   :  { %v8842_v32 = vpop.eup %8841 }
 0x470   :  { %v1282_v39 = vmul.f32 %v8842_v32, %v1281_v35  ;;  %v8844_v55 = vpop.eup %8843 }
 0x471   :  { %v1285_v28 = vsub.f32 1.0, %v8844_v55  ;;  %v1287_v7 = vmul.f32 %v8844_v55, %v9849_v36 }
 0x472   :  { %v1283_v14 = vadd.f32 %v1282_v39, %v11572_v41 }
 0x474   :  { %8845 = vtanh.f32 %v1283_v14 }
 0x47e   :  { %v8846_v38 = vpop.eup %8845 }
 0x47f   :  { %v1286_v16 = vmul.f32 %v8846_v38, %v1285_v28 }
 0x481   :  { %v9887_v4 = vadd.f32 %v1287_v7, %v1286_v16  ;;  %v11575_v7 = vsel %vm9477_vm2, %v9454_v2, %v9507_v58 }
 0x483   :  { %11573 = vst [vmem:[#allocation28_spill] sm:$0xff] %v9887_v4  ;;  %6671 = vmatmul.mubr.msk.f32.vlgmr.msra.gmra.mrb[38].mxu0 %vm180_vm0, %v9887_v4  ;;  %7285 = vmatmul.mubr.msk.f32.vlgmr.msra.gmra.mrb[26].mxu1 %vm180_vm0, %v9887_v4 }
 0x484   :  { %8015 = vmatpush1.bf16.msra.mxu0 %v9248_v46  ;;  %8030 = vmatpush3.bf16.msra.mxu1 %v9354_v17 }
 0x485   :  { %8017 = vmatprep.subr.bf16.mxu0 %v9255_v48  ;;  %8031 = vmatprep.subr.bf16.mxu1 %v11566_v51 }
 0x486   :  { %1540 = vmatprep.mubr.f32.mxu0 %v11567_v6  ;;  %7303 = vmatprep.mubr.msk.f32.mxu1 %vm9183_vm1, %v11567_v6 }
 0x488   :  { %8019 = vmatpush1.bf16.msra.mxu0 %v9265_v54  ;;  %8033 = vmatpush3.bf16.msra.mxu1 %v9360_v20 }
 0x489   :  { %8021 = vmatprep.subr.bf16.mxu0 %v9271_v56  ;;  %8034 = vmatprep.subr.bf16.mxu1 %v11566_v51 }
 0x48c   :  { %8023 = vmatpush1.bf16.msra.mxu0 %v9283_v62  ;;  %8036 = vmatpush3.bf16.msra.mxu1 %v9368_v23 }
 0x48d   :  { %8025 = vmatprep.subr.bf16.mxu0 %v9289_v1  ;;  %8037 = vmatprep.subr.bf16.mxu1 %v11566_v51 }
 0x490   :  { %8027 = vmatpush1.bf16.msra.mxu0 %v9301_v5  ;;  %8039 = vmatpush3.bf16.msra.mxu1 %v9374_v26 }
 0x491   :  { %8041 = vmatprep.subr.bf16.mxu0 %v9243_v40  ;;  %8056 = vmatprep.subr.bf16.mxu1 %v11566_v51 }
 0x556   :  { %v1367_v9 = vpop.f32.mrb[38].mxu0  ;;  %v1438_v53 = vpop.f32.mrb[26].mxu1 }
 0x557   :  { %v1442_v30 = vadd.f32 %v1367_v9, %v9663_v42  ;;  %v1369_v3 = vpop.f32.mrb[39].mxu0  ;;  %v7286_v43 = vpop.f32.mrb[27].mxu1  ;;  %v1456_v38 = vadd.f32 %v9771_v15, %v1438_v53 }
 0x558   :  { %v1443_v35 = vadd.f32 %v1369_v3, %v11574_v11 }
 0x559   :  { %v6673_v32 = vmul.f32 -1.442695, %v1442_v30 }
 0x55a   :  { %v6674_v39 = vmul.f32 -1.442695, %v1443_v35 }
 0x55b   :  { %8847 = vpow2.f32 %v6673_v32 }
 0x55c   :  { %8849 = vpow2.f32 %v6674_v39 }
 0x565   :  { %v8848_v41 = vpop.eup %8847 }
 0x566   :  { %v1447_v14 = vadd.f32 1.0, %v8848_v41  ;;  %v8850_v55 = vpop.eup %8849 }
 0x567   :  { %v1453_v28 = vadd.f32 1.0, %v8850_v55 }
 0x568   :  { %8851 = vrcp.f32 %v1447_v14 }
 0x569   :  { %8853 = vrcp.f32 %v1453_v28  ;;  %v11577_v28 = vsel %vm9578_vm4, %v9504_v57, %v9636_v50 }
 0x572   :  { %v8852_v42 = vpop.eup %8851 }
 0x573   :  { %v1457_v16 = vmul.f32 %v8852_v42, %v1456_v38  ;;  %v8854_v30 = vpop.eup %8853 }
 0x574   :  { %v1460_v3 = vsub.f32 1.0, %v8854_v30  ;;  %v1462_v35 = vmul.f32 %v8854_v30, %v9887_v4 }
 0x575   :  { %v1458_v9 = vadd.f32 %v1457_v16, %v11575_v7 }
 0x577   :  { %8855 = vtanh.f32 %v1458_v9 }
 0x581   :  { %v8856_v43 = vpop.eup %8855 }
 0x582   :  { %v1461_v11 = vmul.f32 %v8856_v43, %v1460_v3 }
 0x584   :  { %v9925_v32 = vadd.f32 %v1462_v35, %v1461_v11  ;;  %v11578_v35 = vsel %vm9477_vm2, %v9450_v60, %v9510_v63 }
 0x586   :  { %11576 = vst [vmem:[#allocation29_spill] sm:$0xff] %v9925_v32  ;;  %6675 = vmatmul.mubr.msk.f32.vlgmr.msra.gmra.mrb[40].mxu0 %vm180_vm0, %v9925_v32  ;;  %7304 = vmatmul.mubr.msk.f32.vlgmr.msra.gmra.mrb[28].mxu1 %vm180_vm0, %v9925_v32 }
 0x587   :  { %8043 = vmatpush1.bf16.msra.mxu0 %v9248_v46  ;;  %8058 = vmatpush3.bf16.msra.mxu1 %v9354_v17 }
 0x588   :  { %8045 = vmatprep.subr.bf16.mxu0 %v9255_v48  ;;  %8059 = vmatprep.subr.bf16.mxu1 %v11566_v51 }
 0x589   :  { %1715 = vmatprep.mubr.f32.mxu0 %v11567_v6  ;;  %7322 = vmatprep.mubr.msk.f32.mxu1 %vm9183_vm1, %v11567_v6 }
 0x58b   :  { %8047 = vmatpush1.bf16.msra.mxu0 %v9265_v54  ;;  %8061 = vmatpush3.bf16.msra.mxu1 %v9360_v20 }
 0x58c   :  { %8049 = vmatprep.subr.bf16.mxu0 %v9271_v56  ;;  %8062 = vmatprep.subr.bf16.mxu1 %v11566_v51 }
 0x58f   :  { %8051 = vmatpush1.bf16.msra.mxu0 %v9283_v62  ;;  %8064 = vmatpush3.bf16.msra.mxu1 %v9368_v23 }
 0x590   :  { %8053 = vmatprep.subr.bf16.mxu0 %v9289_v1  ;;  %8065 = vmatprep.subr.bf16.mxu1 %v11566_v51 }
 0x593   :  { %8055 = vmatpush1.bf16.msra.mxu0 %v9301_v5  ;;  %8067 = vmatpush3.bf16.msra.mxu1 %v9374_v26 }
 0x594   :  { %8069 = vmatprep.subr.bf16.mxu0 %v9243_v40  ;;  %8084 = vmatprep.subr.bf16.mxu1 %v11566_v51 }
 0x659   :  { %v1542_v53 = vpop.f32.mrb[40].mxu0  ;;  %v1613_v39 = vpop.f32.mrb[28].mxu1 }
 0x65a   :  { %v1617_v41 = vadd.f32 %v1542_v53, %v9641_v12  ;;  %v1544_v14 = vpop.f32.mrb[41].mxu0  ;;  %v7305_v55 = vpop.f32.mrb[29].mxu1  ;;  %v1631_v43 = vadd.f32 %v9771_v15, %v1613_v39 }
 0x65b   :  { %v1618_v38 = vadd.f32 %v1544_v14, %v11577_v28 }
 0x65c   :  { %v6677_v42 = vmul.f32 -1.442695, %v1617_v41 }
 0x65d   :  { %v6678_v16 = vmul.f32 -1.442695, %v1618_v38 }
 0x65e   :  { %8857 = vpow2.f32 %v6677_v42 }
 0x65f   :  { %8859 = vpow2.f32 %v6678_v16 }
 0x668   :  { %v8858_v7 = vpop.eup %8857 }
 0x669   :  { %v1622_v9 = vadd.f32 1.0, %v8858_v7  ;;  %v8860_v30 = vpop.eup %8859 }
 0x66a   :  { %v1628_v3 = vadd.f32 1.0, %v8860_v30 }
 0x66b   :  { %8861 = vrcp.f32 %v1622_v9 }
 0x66c   :  { %8863 = vrcp.f32 %v1628_v3  ;;  %v11580_v3 = vsel %vm9578_vm4, %v9531_v27, %v9616_v0 }
 0x675   :  { %v8862_v12 = vpop.eup %8861 }
 0x676   :  { %v1632_v11 = vmul.f32 %v8862_v12, %v1631_v43  ;;  %v8864_v41 = vpop.eup %8863 }
 0x677   :  { %v1635_v14 = vsub.f32 1.0, %v8864_v41  ;;  %v1637_v38 = vmul.f32 %v8864_v41, %v9925_v32  ;;  %v11588_v32 = vld [vmem:[#allocation12_spill] sm:$0xff] }
 0x678   :  { %v1633_v53 = vadd.f32 %v1632_v11, %v11578_v35 }
 0x67a   :  { %8865 = vtanh.f32 %v1633_v53 }
 0x684   :  { %v8866_v55 = vpop.eup %8865 }
 0x685   :  { %v1636_v28 = vmul.f32 %v8866_v55, %v1635_v14 }
 0x687   :  { %v9963_v42 = vadd.f32 %v1637_v38, %v1636_v28  ;;  %v11581_v38 = vsel %vm9477_vm2, %v9466_v13, %v9475_v21 }
 0x689   :  { %11579 = vst [vmem:[#allocation30_spill] sm:$0xff] %v9963_v42  ;;  %6679 = vmatmul.mubr.msk.f32.vlgmr.msra.gmra.mrb[42].mxu0 %vm180_vm0, %v9963_v42  ;;  %7323 = vmatmul.mubr.msk.f32.vlgmr.msra.gmra.mrb[30].mxu1 %vm180_vm0, %v9963_v42 }
 0x68a   :  { %8071 = vmatpush1.bf16.msra.mxu0 %v9248_v46  ;;  %8086 = vmatpush3.bf16.msra.mxu1 %v9354_v17 }
 0x68b   :  { %8073 = vmatprep.subr.bf16.mxu0 %v9255_v48  ;;  %8087 = vmatprep.subr.bf16.mxu1 %v11566_v51 }
 0x68c   :  { %1890 = vmatprep.mubr.f32.mxu0 %v11567_v6  ;;  %7341 = vmatprep.mubr.msk.f32.mxu1 %vm9183_vm1, %v11567_v6 }
 0x68e   :  { %8075 = vmatpush1.bf16.msra.mxu0 %v9265_v54  ;;  %8089 = vmatpush3.bf16.msra.mxu1 %v9360_v20 }
 0x68f   :  { %8077 = vmatprep.subr.bf16.mxu0 %v9271_v56  ;;  %8090 = vmatprep.subr.bf16.mxu1 %v11566_v51 }
 0x692   :  { %8079 = vmatpush1.bf16.msra.mxu0 %v9283_v62  ;;  %8092 = vmatpush3.bf16.msra.mxu1 %v9368_v23 }
 0x693   :  { %8081 = vmatprep.subr.bf16.mxu0 %v9289_v1  ;;  %8093 = vmatprep.subr.bf16.mxu1 %v11566_v51 }
 0x696   :  { %8083 = vmatpush1.bf16.msra.mxu0 %v9301_v5  ;;  %8095 = vmatpush3.bf16.msra.mxu1 %v9374_v26 }
 0x697   :  { %8097 = vmatprep.subr.bf16.mxu0 %v9243_v40  ;;  %8112 = vmatprep.subr.bf16.mxu1 %v11566_v51 }
 0x75c   :  { %v1717_v39 = vpop.f32.mrb[42].mxu0  ;;  %v1788_v16 = vpop.f32.mrb[30].mxu1 }
 0x75d   :  { %v1792_v7 = vadd.f32 %v1717_v39, %v9620_v29  ;;  %v1719_v9 = vpop.f32.mrb[43].mxu0  ;;  %v7324_v30 = vpop.f32.mrb[31].mxu1  ;;  %v1806_v55 = vadd.f32 %v9771_v15, %v1788_v16 }
 0x75e   :  { %v1793_v43 = vadd.f32 %v1719_v9, %v11580_v3 }
 0x75f   :  { %v6681_v12 = vmul.f32 -1.442695, %v1792_v7 }
 0x760   :  { %v6682_v11 = vmul.f32 -1.442695, %v1793_v43 }
 0x761   :  { %8867 = vpow2.f32 %v6681_v12 }
 0x762   :  { %8869 = vpow2.f32 %v6682_v11 }
 0x76b   :  { %v8868_v35 = vpop.eup %8867 }
 0x76c   :  { %v1797_v53 = vadd.f32 1.0, %v8868_v35  ;;  %v8870_v41 = vpop.eup %8869  ;;  %v11583_v35 = vld [vmem:[#allocation17_spill] sm:$0xff] }
 0x76d   :  { %v1803_v14 = vadd.f32 1.0, %v8870_v41 }
 0x76e   :  { %8871 = vrcp.f32 %v1797_v53 }
 0x76f   :  { %8873 = vrcp.f32 %v1803_v14 }
 0x778   :  { %v8872_v29 = vpop.eup %8871 }
 0x779   :  { %v1807_v28 = vmul.f32 %v8872_v29, %v1806_v55  ;;  %v8874_v7 = vpop.eup %8873  ;;  %v11584_v55 = vld [vmem:[#allocation14_spill] sm:$0xff]  ;;  %v11585_v29 = vld [vmem:[#allocation16_spill] sm:$0xff] }
 0x77a   :  { %v1810_v9 = vsub.f32 1.0, %v8874_v7  ;;  %v1812_v43 = vmul.f32 %v8874_v7, %v9963_v42 }
 0x77b   :  { %v1808_v39 = vadd.f32 %v1807_v28, %v11581_v38  ;;  %v11586_v28 = vsel %vm9578_vm4, %v11584_v55, %v11585_v29 }
 0x77d   :  { %8875 = vtanh.f32 %v1808_v39 }
 0x787   :  { %v8876_v30 = vpop.eup %8875 }
 0x788   :  { %v1811_v3 = vmul.f32 %v8876_v30, %v1810_v9 }
 0x78a   :  { %v10001_v12 = vadd.f32 %v1812_v43, %v1811_v3 }
 0x78c   :  { %11582 = vst [vmem:[#allocation31_spill] sm:$0xff] %v10001_v12  ;;  %6683 = vmatmul.mubr.msk.f32.vlgmr.msra.gmra.mrb[44].mxu0 %vm180_vm0, %v10001_v12  ;;  %7342 = vmatmul.mubr.msk.f32.vlgmr.msra.gmra.mrb[32].mxu1 %vm180_vm0, %v10001_v12 }
 0x78d   :  { %8099 = vmatpush1.bf16.msra.mxu0 %v9248_v46  ;;  %8114 = vmatpush3.bf16.msra.mxu1 %v9354_v17 }
 0x78e   :  { %8101 = vmatprep.subr.bf16.mxu0 %v9255_v48  ;;  %8115 = vmatprep.subr.bf16.mxu1 %v11566_v51 }
 0x78f   :  { %2059 = vmatprep.mubr.f32.mxu0 %v11567_v6  ;;  %7360 = vmatprep.mubr.msk.f32.mxu1 %vm9183_vm1, %v11567_v6 }
 0x791   :  { %8103 = vmatpush1.bf16.msra.mxu0 %v9265_v54  ;;  %8117 = vmatpush3.bf16.msra.mxu1 %v9360_v20 }
 0x792   :  { %8105 = vmatprep.subr.bf16.mxu0 %v9271_v56  ;;  %8118 = vmatprep.subr.bf16.mxu1 %v11566_v51 }
 0x795   :  { %8107 = vmatpush1.bf16.msra.mxu0 %v9283_v62  ;;  %8120 = vmatpush3.bf16.msra.mxu1 %v9368_v23 }
 0x796   :  { %8109 = vmatprep.subr.bf16.mxu0 %v9289_v1  ;;  %8121 = vmatprep.subr.bf16.mxu1 %v11566_v51 }
 0x799   :  { %8111 = vmatpush1.bf16.msra.mxu0 %v9301_v5  ;;  %8123 = vmatpush3.bf16.msra.mxu1 %v9374_v26 }
 0x79a   :  { %8125 = vmatprep.subr.bf16.mxu0 %v9243_v40  ;;  %8140 = vmatprep.subr.bf16.mxu1 %v11566_v51 }
 0x85f   :  { %v1892_v16 = vpop.f32.mrb[44].mxu0  ;;  %v1963_v11 = vpop.f32.mrb[32].mxu1 }
 0x860   :  { %v1967_v53 = vadd.f32 %v1892_v16, %v11583_v35  ;;  %v1894_v41 = vpop.f32.mrb[45].mxu0  ;;  %v7343_v14 = vpop.f32.mrb[33].mxu1  ;;  %v1981_v42 = vadd.f32 %v9771_v15, %v1963_v11  ;;  %v11590_v11 = vld [vmem:[#allocation18_spill] sm:$0xff] }
 0x861   :  { %v1968_v38 = vadd.f32 %v1894_v41, %v11586_v28  ;;  %v11587_v14 = vld [vmem:[#allocation11_spill] sm:$0xff] }
 0x862   :  { %v6685_v39 = vmul.f32 -1.442695, %v1967_v53  ;;  %v11589_v4 = vsel %vm9477_vm2, %v11587_v14, %v11588_v32 }
 0x863   :  { %v6686_v7 = vmul.f32 -1.442695, %v1968_v38 }
 0x864   :  { %8877 = vpow2.f32 %v6685_v39 }
 0x865   :  { %8879 = vpow2.f32 %v6686_v7 }
 0x86e   :  { %v8878_v9 = vpop.eup %8877 }
 0x86f   :  { %v1972_v30 = vadd.f32 1.0, %v8878_v9  ;;  %v8880_v3 = vpop.eup %8879 }
 0x870   :  { %v1978_v43 = vadd.f32 1.0, %v8880_v3 }
 0x871   :  { %8881 = vrcp.f32 %v1972_v30 }
 0x872   :  { %8883 = vrcp.f32 %v1978_v43 }
 0x87b   :  { %v8882_v16 = vpop.eup %8881 }
 0x87c   :  { %v1982_v35 = vmul.f32 %v8882_v16, %v1981_v42  ;;  %v8884_v53 = vpop.eup %8883  ;;  %v11591_v16 = vsel %vm9578_vm4, %v11585_v29, %v11584_v55  ;;  %v11592_v55 = vsel %vm9477_vm2, %v11588_v32, %v11587_v14  ;;  %v11593_v14 = vld [vmem:[#allocation19_spill] sm:$0xff] }
 0x87d   :  { %v1985_v28 = vsub.f32 1.0, %v8884_v53  ;;  %v1987_v7 = vmul.f32 %v8884_v53, %v10001_v12 }
 0x87e   :  { %v1983_v41 = vadd.f32 %v1982_v35, %v11589_v4 }
 0x880   :  { %8885 = vtanh.f32 %v1983_v41 }
 0x88a   :  { %v8886_v38 = vpop.eup %8885 }
 0x88b   :  { %v1986_v39 = vmul.f32 %v8886_v38, %v1985_v28 }
 0x88d   :  { %v10039_v9 = vadd.f32 %v1987_v7, %v1986_v39 }
 0x88f   :  { %6687 = vmatmul.mubr.msk.f32.vlgmr.msra.gmra.mrb[46].mxu0 %vm180_vm0, %v10039_v9  ;;  %7361 = vmatmul.mubr.msk.f32.vlgmr.msra.gmra.mrb[34].mxu1 %vm180_vm0, %v10039_v9 }
 0x890   :  { %8127 = vmatpush1.bf16.msra.mxu0 %v9248_v46  ;;  %8142 = vmatpush3.bf16.msra.mxu1 %v9354_v17 }
 0x891   :  { %8129 = vmatprep.subr.bf16.mxu0 %v9255_v48  ;;  %8143 = vmatprep.subr.bf16.mxu1 %v11566_v51 }
 0x892   :  { %2228 = vmatprep.mubr.f32.mxu0 %v11567_v6  ;;  %7379 = vmatprep.mubr.msk.f32.mxu1 %vm9183_vm1, %v11567_v6 }
 0x894   :  { %8131 = vmatpush1.bf16.msra.mxu0 %v9265_v54  ;;  %8145 = vmatpush3.bf16.msra.mxu1 %v9360_v20 }
 0x895   :  { %8133 = vmatprep.subr.bf16.mxu0 %v9271_v56  ;;  %8146 = vmatprep.subr.bf16.mxu1 %v11566_v51 }
 0x898   :  { %8135 = vmatpush1.bf16.msra.mxu0 %v9283_v62  ;;  %8148 = vmatpush3.bf16.msra.mxu1 %v9368_v23 }
 0x899   :  { %8137 = vmatprep.subr.bf16.mxu0 %v9289_v1  ;;  %8149 = vmatprep.subr.bf16.mxu1 %v11566_v51 }
 0x89c   :  { %8139 = vmatpush1.bf16.msra.mxu0 %v9301_v5  ;;  %8151 = vmatpush3.bf16.msra.mxu1 %v9374_v26 }
 0x89d   :  { %8153 = vmatprep.subr.bf16.mxu0 %v9243_v40  ;;  %8168 = vmatprep.subr.bf16.mxu1 %v11566_v51 }
 0x962   :  { %v2061_v4 = vpop.f32.mrb[46].mxu0  ;;  %v2132_v42 = vpop.f32.mrb[34].mxu1 }
 0x963   :  { %v2136_v30 = vadd.f32 %v2061_v4, %v11590_v11  ;;  %v2063_v3 = vpop.f32.mrb[47].mxu0  ;;  %v7362_v43 = vpop.f32.mrb[35].mxu1  ;;  %v2150_v12 = vadd.f32 %v9771_v15, %v2132_v42 }
 0x964   :  { %v2137_v35 = vadd.f32 %v2063_v3, %v11591_v16 }
 0x965   :  { %v6689_v41 = vmul.f32 -1.442695, %v2136_v30 }
 0x966   :  { %v6690_v53 = vmul.f32 -1.442695, %v2137_v35 }
 0x967   :  { %8887 = vpow2.f32 %v6689_v41 }
 0x968   :  { %8889 = vpow2.f32 %v6690_v53 }
 0x971   :  { %v8888_v28 = vpop.eup %8887 }
 0x972   :  { %v2141_v38 = vadd.f32 1.0, %v8888_v28  ;;  %v8890_v39 = vpop.eup %8889 }
 0x973   :  { %v2147_v7 = vadd.f32 1.0, %v8890_v39 }
 0x974   :  { %8891 = vrcp.f32 %v2141_v38  ;;  %v11594_v38 = vsel %vm9578_vm4, %v9616_v0, %v9531_v27  ;;  %v11595_v0 = vsel %vm9477_vm2, %v9475_v21, %v9466_v13 }
 0x975   :  { %8893 = vrcp.f32 %v2147_v7 }
 0x97e   :  { %v8892_v4 = vpop.eup %8891 }
 0x97f   :  { %v2151_v11 = vmul.f32 %v8892_v4, %v2150_v12  ;;  %v8894_v30 = vpop.eup %8893 }
 0x980   :  { %v2154_v3 = vsub.f32 1.0, %v8894_v30  ;;  %v2156_v35 = vmul.f32 %v8894_v30, %v10039_v9 }
 0x981   :  { %v2152_v29 = vadd.f32 %v2151_v11, %v11592_v55 }
 0x983   :  { %8895 = vtanh.f32 %v2152_v29 }
 0x98d   :  { %v8896_v43 = vpop.eup %8895 }
 0x98e   :  { %v2155_v16 = vmul.f32 %v8896_v43, %v2154_v3 }
 0x990   :  { %v10077_v41 = vadd.f32 %v2156_v35, %v2155_v16 }
 0x992   :  { %6691 = vmatmul.mubr.msk.f32.vlgmr.msra.gmra.mrb[48].mxu0 %vm180_vm0, %v10077_v41  ;;  %7380 = vmatmul.mubr.msk.f32.vlgmr.msra.gmra.mrb[36].mxu1 %vm180_vm0, %v10077_v41 }
 0x993   :  { %8155 = vmatpush1.bf16.msra.mxu0 %v9248_v46  ;;  %8170 = vmatpush3.bf16.msra.mxu1 %v9354_v17 }
 0x994   :  { %8157 = vmatprep.subr.bf16.mxu0 %v9255_v48  ;;  %8171 = vmatprep.subr.bf16.mxu1 %v11566_v51 }
 0x995   :  { %2397 = vmatprep.mubr.f32.mxu0 %v11567_v6  ;;  %7398 = vmatprep.mubr.msk.f32.mxu1 %vm9183_vm1, %v11567_v6 }
 0x997   :  { %8159 = vmatpush1.bf16.msra.mxu0 %v9265_v54  ;;  %8173 = vmatpush3.bf16.msra.mxu1 %v9360_v20 }
 0x998   :  { %8161 = vmatprep.subr.bf16.mxu0 %v9271_v56  ;;  %8174 = vmatprep.subr.bf16.mxu1 %v11566_v51 }
 0x99b   :  { %8163 = vmatpush1.bf16.msra.mxu0 %v9283_v62  ;;  %8176 = vmatpush3.bf16.msra.mxu1 %v9368_v23 }
 0x99c   :  { %8165 = vmatprep.subr.bf16.mxu0 %v9289_v1  ;;  %8177 = vmatprep.subr.bf16.mxu1 %v11566_v51 }
 0x99f   :  { %8167 = vmatpush1.bf16.msra.mxu0 %v9301_v5  ;;  %8179 = vmatpush3.bf16.msra.mxu1 %v9374_v26 }
 0x9a0   :  { %8181 = vmatprep.subr.bf16.mxu0 %v9243_v40  ;;  %8196 = vmatprep.subr.bf16.mxu1 %v11566_v51 }
 0xa65   :  { %v2230_v32 = vpop.f32.mrb[48].mxu0  ;;  %v2301_v12 = vpop.f32.mrb[36].mxu1 }
 0xa66   :  { %v2305_v42 = vadd.f32 %v2230_v32, %v11593_v14  ;;  %v2232_v53 = vpop.f32.mrb[49].mxu0  ;;  %v7381_v28 = vpop.f32.mrb[37].mxu1  ;;  %v2319_v3 = vadd.f32 %v9771_v15, %v2301_v12  ;;  %v11596_v12 = vld [vmem:[#allocation20_spill] sm:$0xff] }
 0xa67   :  { %v2306_v39 = vadd.f32 %v2232_v53, %v11594_v38 }
 0xa68   :  { %v6693_v7 = vmul.f32 -1.442695, %v2305_v42 }
 0xa69   :  { %v6694_v4 = vmul.f32 -1.442695, %v2306_v39 }
 0xa6a   :  { %8897 = vpow2.f32 %v6693_v7 }
 0xa6b   :  { %8899 = vpow2.f32 %v6694_v4  ;;  %v11597_v4 = vsel %vm9578_vm4, %v9636_v50, %v9504_v57  ;;  %v11598_v50 = vsel %vm9477_vm2, %v9510_v63, %v9450_v60 }
 0xa74   :  { %v8898_v11 = vpop.eup %8897 }
 0xa75   :  { %v2310_v55 = vadd.f32 1.0, %v8898_v11  ;;  %v8900_v29 = vpop.eup %8899 }
 0xa76   :  { %v2316_v30 = vadd.f32 1.0, %v8900_v29 }
 0xa77   :  { %8901 = vrcp.f32 %v2310_v55 }
 0xa78   :  { %8903 = vrcp.f32 %v2316_v30 }
 0xa81   :  { %v8902_v43 = vpop.eup %8901 }
 0xa82   :  { %v2320_v16 = vmul.f32 %v8902_v43, %v2319_v3  ;;  %v8904_v35 = vpop.eup %8903 }
 0xa83   :  { %v2323_v32 = vsub.f32 1.0, %v8904_v35  ;;  %v2325_v53 = vmul.f32 %v8904_v35, %v10077_v41 }
 0xa84   :  { %v2321_v27 = vadd.f32 %v2320_v16, %v11595_v0 }
 0xa86   :  { %8905 = vtanh.f32 %v2321_v27 }
 0xa90   :  { %v8906_v14 = vpop.eup %8905 }
 0xa91   :  { %v2324_v42 = vmul.f32 %v8906_v14, %v2323_v32 }
 0xa93   :  { %v10115_v28 = vadd.f32 %v2325_v53, %v2324_v42 }
 0xa95   :  { %6695 = vmatmul.mubr.msk.f32.vlgmr.msra.gmra.mrb[50].mxu0 %vm180_vm0, %v10115_v28  ;;  %7399 = vmatmul.mubr.msk.f32.vlgmr.msra.gmra.mrb[38].mxu1 %vm180_vm0, %v10115_v28 }
 0xa96   :  { %8183 = vmatpush1.bf16.msra.mxu0 %v9248_v46  ;;  %8198 = vmatpush3.bf16.msra.mxu1 %v9354_v17 }
 0xa97   :  { %8185 = vmatprep.subr.bf16.mxu0 %v9255_v48  ;;  %8199 = vmatprep.subr.bf16.mxu1 %v11566_v51 }
 0xa98   :  { %2566 = vmatprep.mubr.f32.mxu0 %v11567_v6  ;;  %7417 = vmatprep.mubr.msk.f32.mxu1 %vm9183_vm1, %v11567_v6 }
 0xa9a   :  { %8187 = vmatpush1.bf16.msra.mxu0 %v9265_v54  ;;  %8201 = vmatpush3.bf16.msra.mxu1 %v9360_v20 }
 0xa9b   :  { %8189 = vmatprep.subr.bf16.mxu0 %v9271_v56  ;;  %8202 = vmatprep.subr.bf16.mxu1 %v11566_v51 }
 0xa9e   :  { %8191 = vmatpush1.bf16.msra.mxu0 %v9283_v62  ;;  %8204 = vmatpush3.bf16.msra.mxu1 %v9368_v23 }
 0xa9f   :  { %8193 = vmatprep.subr.bf16.mxu0 %v9289_v1  ;;  %8205 = vmatprep.subr.bf16.mxu1 %v11566_v51 }
 0xaa2   :  { %8195 = vmatpush1.bf16.msra.mxu0 %v9301_v5  ;;  %8207 = vmatpush3.bf16.msra.mxu1 %v9374_v26 }
 0xaa3   :  { %8209 = vmatprep.subr.bf16.mxu0 %v9243_v40  ;;  %8224 = vmatprep.subr.bf16.mxu1 %v11566_v51 }
 0xb68   :  { %v2399_v13 = vpop.f32.mrb[50].mxu0  ;;  %v2470_v21 = vpop.f32.mrb[38].mxu1 }
 0xb69   :  { %v2474_v38 = vadd.f32 %v2399_v13, %v11596_v12  ;;  %v2401_v39 = vpop.f32.mrb[51].mxu0  ;;  %v7400_v7 = vpop.f32.mrb[39].mxu1  ;;  %v2488_v0 = vadd.f32 %v9771_v15, %v2470_v21  ;;  %v11599_v15 = vld [vmem:[#allocation21_spill] sm:$0xff] }
 0xb6a   :  { %v2475_v11 = vadd.f32 %v2401_v39, %v11597_v4  ;;  %v11600_v7 = vsel %vm9578_vm4, %v9658_v45, %v9472_v19  ;;  %v11601_v19 = vsel %vm9477_vm2, %v9507_v58, %v9454_v2 }
 0xb6b   :  { %v6697_v55 = vmul.f32 -1.442695, %v2474_v38 }
 0xb6c   :  { %v6698_v29 = vmul.f32 -1.442695, %v2475_v11 }
 0xb6d   :  { %8907 = vpow2.f32 %v6697_v55 }
 0xb6e   :  { %8909 = vpow2.f32 %v6698_v29 }
 0xb77   :  { %v8908_v30 = vpop.eup %8907 }
 0xb78   :  { %v2479_v3 = vadd.f32 1.0, %v8908_v30  ;;  %v8910_v43 = vpop.eup %8909 }
 0xb79   :  { %v2485_v16 = vadd.f32 1.0, %v8910_v43 }
 0xb7a   :  { %8911 = vrcp.f32 %v2479_v3 }
 0xb7b   :  { %8913 = vrcp.f32 %v2485_v16  ;;  %v10187_v16 = vld [vmem:[%s11486_s4] ss:$0 sm:$0xff] }
 0xb84   :  { %v8912_v27 = vpop.eup %8911 }
 0xb85   :  { %v2489_v35 = vmul.f32 %v8912_v27, %v2488_v0  ;;  %v8914_v32 = vpop.eup %8913 }
 0xb86   :  { %v2492_v14 = vsub.f32 1.0, %v8914_v32  ;;  %v2494_v13 = vmul.f32 %v8914_v32, %v10115_v28 }
 0xb87   :  { %v2490_v57 = vadd.f32 %v2489_v35, %v11598_v50 }
 0xb89   :  { %8915 = vtanh.f32 %v2490_v57 }
 0xb93   :  { %v8916_v42 = vpop.eup %8915 }
 0xb94   :  { %v2493_v53 = vmul.f32 %v8916_v42, %v2492_v14 }
 0xb96   :  { %v10153_v12 = vadd.f32 %v2494_v13, %v2493_v53  ;;  %v11602_v13 = vld [vmem:[#allocation22_spill] sm:$0xff] }
 0xb98   :  { %6699 = vmatmul.mubr.msk.f32.vlgmr.msra.gmra.mrb[52].mxu0 %vm180_vm0, %v10153_v12  ;;  %7418 = vmatmul.mubr.msk.f32.vlgmr.msra.gmra.mrb[40].mxu1 %vm180_vm0, %v10153_v12 }
 0xb99   :  { %8211 = vmatpush1.bf16.msra.mxu0 %v9248_v46  ;;  %8226 = vmatpush3.bf16.msra.mxu1 %v9354_v17 }
 0xb9a   :  { %8213 = vmatprep.subr.bf16.mxu0 %v9255_v48  ;;  %8227 = vmatprep.subr.bf16.mxu1 %v11566_v51 }
 0xb9b   :  { %2735 = vmatprep.mubr.f32.mxu0 %v11567_v6  ;;  %7436 = vmatprep.mubr.msk.f32.mxu1 %vm9183_vm1, %v11567_v6 }
 0xb9d   :  { %8215 = vmatpush1.bf16.msra.mxu0 %v9265_v54  ;;  %8229 = vmatpush3.bf16.msra.mxu1 %v9360_v20 }
 0xb9e   :  { %8217 = vmatprep.subr.bf16.mxu0 %v9271_v56  ;;  %8230 = vmatprep.subr.bf16.mxu1 %v11566_v51 }
 0xba1   :  { %8219 = vmatpush1.bf16.msra.mxu0 %v9283_v62  ;;  %8232 = vmatpush3.bf16.msra.mxu1 %v9368_v23 }
 0xba2   :  { %8221 = vmatprep.subr.bf16.mxu0 %v9289_v1  ;;  %8233 = vmatprep.subr.bf16.mxu1 %v11566_v51 }
 0xba5   :  { %8223 = vmatpush1.bf16.msra.mxu0 %v9301_v5  ;;  %8235 = vmatpush3.bf16.msra.mxu1 %v9374_v26 }
 0xba6   :  { %8237 = vmatprep.subr.bf16.mxu0 %v9243_v40  ;;  %8252 = vmatprep.subr.bf16.mxu1 %v11566_v51 }
 0xc6b   :  { %v2568_v60 = vpop.f32.mrb[52].mxu0  ;;  %v2639_v63 = vpop.f32.mrb[40].mxu1 }
 0xc6c   :  { %v2643_v21 = vadd.f32 %v2568_v60, %v11599_v15  ;;  %v2570_v38 = vpop.f32.mrb[53].mxu0  ;;  %v7419_v39 = vpop.f32.mrb[41].mxu1  ;;  %v2657_v0 = vadd.f32 %v10187_v16, %v2639_v63 }
 0xc6d   :  { %v2644_v4 = vadd.f32 %v2570_v38, %v11600_v7 }
 0xc6e   :  { %v6701_v11 = vmul.f32 -1.442695, %v2643_v21  ;;  %v11603_v21 = vsel %vm9578_vm4, %v9680_v25, %v9460_v8  ;;  %v11604_v8 = vsel %vm9477_vm2, %v9537_v61, %v9436_v49 }
 0xc6f   :  { %v6702_v55 = vmul.f32 -1.442695, %v2644_v4 }
 0xc70   :  { %8917 = vpow2.f32 %v6701_v11 }
 0xc71   :  { %8919 = vpow2.f32 %v6702_v55 }
 0xc7a   :  { %v8918_v29 = vpop.eup %8917 }
 0xc7b   :  { %v2648_v30 = vadd.f32 1.0, %v8918_v29  ;;  %v8920_v3 = vpop.eup %8919 }
 0xc7c   :  { %v2654_v43 = vadd.f32 1.0, %v8920_v3 }
 0xc7d   :  { %8921 = vrcp.f32 %v2648_v30 }
 0xc7e   :  { %8923 = vrcp.f32 %v2654_v43 }
 0xc87   :  { %v8922_v27 = vpop.eup %8921 }
 0xc88   :  { %v2658_v35 = vmul.f32 %v8922_v27, %v2657_v0  ;;  %v8924_v50 = vpop.eup %8923 }
 0xc89   :  { %v2661_v57 = vsub.f32 1.0, %v8924_v50  ;;  %v2663_v42 = vmul.f32 %v8924_v50, %v10153_v12 }
 0xc8a   :  { %v2659_v45 = vadd.f32 %v2658_v35, %v11601_v19 }
 0xc8c   :  { %8925 = vtanh.f32 %v2659_v45 }
 0xc96   :  { %v8926_v32 = vpop.eup %8925 }
 0xc97   :  { %v2662_v14 = vmul.f32 %v8926_v32, %v2661_v57  ;;  %v11605_v57 = vld [vmem:[#allocation23_spill] sm:$0xff] }
 0xc99   :  { %v10196_v53 = vadd.f32 %v2663_v42, %v2662_v14 }
 0xc9b   :  { %6703 = vmatmul.mubr.msk.f32.vlgmr.msra.gmra.mrb[54].mxu0 %vm180_vm0, %v10196_v53  ;;  %7437 = vmatmul.mubr.msk.f32.vlgmr.msra.gmra.mrb[42].mxu1 %vm180_vm0, %v10196_v53 }
 0xc9c   :  { %8239 = vmatpush1.bf16.msra.mxu0 %v9248_v46  ;;  %8254 = vmatpush3.bf16.msra.mxu1 %v9354_v17 }
 0xc9d   :  { %8241 = vmatprep.subr.bf16.mxu0 %v9255_v48  ;;  %8255 = vmatprep.subr.bf16.mxu1 %v11566_v51 }
 0xc9e   :  { %2904 = vmatprep.mubr.f32.mxu0 %v11567_v6  ;;  %7455 = vmatprep.mubr.msk.f32.mxu1 %vm9183_vm1, %v11567_v6 }
 0xca0   :  { %8243 = vmatpush1.bf16.msra.mxu0 %v9265_v54  ;;  %8257 = vmatpush3.bf16.msra.mxu1 %v9360_v20 }
 0xca1   :  { %8245 = vmatprep.subr.bf16.mxu0 %v9271_v56  ;;  %8258 = vmatprep.subr.bf16.mxu1 %v11566_v51 }
 0xca4   :  { %8247 = vmatpush1.bf16.msra.mxu0 %v9283_v62  ;;  %8260 = vmatpush3.bf16.msra.mxu1 %v9368_v23 }
 0xca5   :  { %8249 = vmatprep.subr.bf16.mxu0 %v9289_v1  ;;  %8261 = vmatprep.subr.bf16.mxu1 %v11566_v51 }
 0xca8   :  { %8251 = vmatpush1.bf16.msra.mxu0 %v9301_v5  ;;  %8263 = vmatpush3.bf16.msra.mxu1 %v9374_v26 }
 0xca9   :  { %8265 = vmatprep.subr.bf16.mxu0 %v9243_v40  ;;  %8280 = vmatprep.subr.bf16.mxu1 %v11566_v51 }
 0xd6e   :  { %v2737_v2 = vpop.f32.mrb[54].mxu0  ;;  %v2808_v58 = vpop.f32.mrb[42].mxu1 }
 0xd6f   :  { %v2812_v60 = vadd.f32 %v2737_v2, %v11602_v13  ;;  %v2739_v63 = vpop.f32.mrb[55].mxu0  ;;  %v7438_v15 = vpop.f32.mrb[43].mxu1  ;;  %v2826_v30 = vadd.f32 %v10187_v16, %v2808_v58  ;;  %v11606_v2 = vsel %vm9578_vm4, %v9702_v10, %v9447_v59  ;;  %v11607_v59 = vsel %vm9477_vm2, %v9534_v44, %v9441_v52 }
 0xd70   :  { %v2813_v38 = vadd.f32 %v2739_v63, %v11603_v21 }
 0xd71   :  { %v6705_v39 = vmul.f32 -1.442695, %v2812_v60 }
 0xd72   :  { %v6706_v7 = vmul.f32 -1.442695, %v2813_v38 }
 0xd73   :  { %8927 = vpow2.f32 %v6705_v39 }
 0xd74   :  { %8929 = vpow2.f32 %v6706_v7 }
 0xd7d   :  { %v8928_v4 = vpop.eup %8927 }
 0xd7e   :  { %v2817_v11 = vadd.f32 1.0, %v8928_v4  ;;  %v8930_v55 = vpop.eup %8929 }
 0xd7f   :  { %v2823_v29 = vadd.f32 1.0, %v8930_v55 }
 0xd80   :  { %8931 = vrcp.f32 %v2817_v11 }
 0xd81   :  { %8933 = vrcp.f32 %v2823_v29 }
 0xd8a   :  { %v8932_v3 = vpop.eup %8931 }
 0xd8b   :  { %v2827_v43 = vmul.f32 %v8932_v3, %v2826_v30  ;;  %v8934_v0 = vpop.eup %8933 }
 0xd8c   :  { %v2830_v27 = vsub.f32 1.0, %v8934_v0  ;;  %v2832_v45 = vmul.f32 %v8934_v0, %v10196_v53 }
 0xd8d   :  { %v2828_v25 = vadd.f32 %v2827_v43, %v11604_v8 }
 0xd8f   :  { %8935 = vtanh.f32 %v2828_v25 }
 0xd99   :  { %v8936_v35 = vpop.eup %8935 }
 0xd9a   :  { %v2831_v19 = vmul.f32 %v8936_v35, %v2830_v27 }
 0xd9c   :  { %v10234_v50 = vadd.f32 %v2832_v45, %v2831_v19 }
 0xd9e   :  { %6707 = vmatmul.mubr.msk.f32.vlgmr.msra.gmra.mrb[56].mxu0 %vm180_vm0, %v10234_v50  ;;  %7456 = vmatmul.mubr.msk.f32.vlgmr.msra.gmra.mrb[44].mxu1 %vm180_vm0, %v10234_v50 }
 0xd9f   :  { %8267 = vmatpush1.bf16.msra.mxu0 %v9248_v46  ;;  %8282 = vmatpush3.bf16.msra.mxu1 %v9354_v17 }
 0xda0   :  { %8269 = vmatprep.subr.bf16.mxu0 %v9255_v48  ;;  %8283 = vmatprep.subr.bf16.mxu1 %v11566_v51 }
 0xda1   :  { %3073 = vmatprep.mubr.f32.mxu0 %v11567_v6  ;;  %7474 = vmatprep.mubr.msk.f32.mxu1 %vm9183_vm1, %v11567_v6 }
 0xda3   :  { %8271 = vmatpush1.bf16.msra.mxu0 %v9265_v54  ;;  %8285 = vmatpush3.bf16.msra.mxu1 %v9360_v20 }
 0xda4   :  { %8273 = vmatprep.subr.bf16.mxu0 %v9271_v56  ;;  %8286 = vmatprep.subr.bf16.mxu1 %v11566_v51 }
 0xda7   :  { %8275 = vmatpush1.bf16.msra.mxu0 %v9283_v62  ;;  %8288 = vmatpush3.bf16.msra.mxu1 %v9368_v23 }
 0xda8   :  { %8277 = vmatprep.subr.bf16.mxu0 %v9289_v1  ;;  %8289 = vmatprep.subr.bf16.mxu1 %v11566_v51 }
 0xdab   :  { %8279 = vmatpush1.bf16.msra.mxu0 %v9301_v5  ;;  %8291 = vmatpush3.bf16.msra.mxu1 %v9374_v26 }
 0xdac   :  { %8293 = vmatprep.subr.bf16.mxu0 %v9243_v40  ;;  %8308 = vmatprep.subr.bf16.mxu1 %v11566_v51 }
 0xe71   :  { %v2906_v49 = vpop.f32.mrb[56].mxu0  ;;  %v2977_v61 = vpop.f32.mrb[44].mxu1 }
 0xe72   :  { %v2981_v32 = vadd.f32 %v2906_v49, %v11605_v57  ;;  %v2908_v14 = vpop.f32.mrb[57].mxu0  ;;  %v7457_v42 = vpop.f32.mrb[45].mxu1  ;;  %v2995_v38 = vadd.f32 %v10187_v16, %v2977_v61  ;;  %v3361_v57 = vld [vmem:[#allocation3 + $0xc8] sm:$0xff] }
 0xe73   :  { %v2982_v58 = vadd.f32 %v2908_v14, %v11606_v2  ;;  %v3363_v14 = vld [vmem:[#allocation3 + $0xd8] sm:$0xff]  ;;  %v3362_v42 = vld [vmem:[#allocation3 + $0xd0] sm:$0xff] }
 0xe74   :  { %v6709_v13 = vmul.f32 -1.442695, %v2981_v32  ;;  %v3360_v32 = vld [vmem:[#allocation3 + $0xc0] sm:$0xff] }
 0xe75   :  { %v6710_v60 = vmul.f32 -1.442695, %v2982_v58  ;;  %v8322_v2 = vpack.c.bf16 %v3363_v14, %v3360_v32  ;;  %v3365_v58 = vld [vmem:[#allocation3 + $0xe8] sm:$0xff] }
 0xe76   :  { %8937 = vpow2.f32 %v6709_v13  ;;  %v8336_v13 = vpack.c.bf16 %v3365_v58, %v3362_v42 }
 0xe77   :  { %8939 = vpow2.f32 %v6710_v60  ;;  %v3367_v60 = vld [vmem:[#allocation3 + $0xf8] sm:$0xff] }
 0xe80   :  { %v8938_v63 = vpop.eup %8937 }
 0xe81   :  { %v2986_v40 = vadd.f32 1.0, %v8938_v63  ;;  %v8940_v15 = vpop.eup %8939  ;;  %v3370_v63 = vld [vmem:[#allocation3 + $0x110] sm:$0xff] }
 0xe82   :  { %v2992_v21 = vadd.f32 1.0, %v8940_v15  ;;  %v8324_v15 = vpack.c.bf16 %v3370_v63, %v3367_v60  ;;  %v11615_v63 = vld [vmem:[#allocation15_spill] sm:$0xff] }
 0xe83   :  { %8941 = vrcp.f32 %v2986_v40  ;;  %v3366_v40 = vld [vmem:[#allocation3 + $0xf0] sm:$0xff] }
 0xe84   :  { %8943 = vrcp.f32 %v2992_v21  ;;  %v3369_v21 = vld [vmem:[#allocation3 + $0x108] sm:$0xff] }
 0xe8d   :  { %v8942_v39 = vpop.eup %8941 }
 0xe8e   :  { %v2996_v7 = vmul.f32 %v8942_v39, %v2995_v38  ;;  %v8944_v4 = vpop.eup %8943  ;;  %v3368_v38 = vld [vmem:[#allocation3 + $0x100] sm:$0xff]  ;;  %v3371_v39 = vld [vmem:[#allocation3 + $0x118] sm:$0xff] }
 0xe8f   :  { %v2999_v11 = vsub.f32 1.0, %v8944_v4  ;;  %v3001_v30 = vmul.f32 %v8944_v4, %v10234_v50  ;;  %v3376_v4 = vld [vmem:[#allocation3 + $0x140] sm:$0xff] }
 0xe90   :  { %v2997_v10 = vadd.f32 %v2996_v7, %v11607_v59  ;;  %v8326_v7 = vpack.c.bf16 %v3369_v21, %v3366_v40  ;;  %v8340_v59 = vpack.c.bf16 %v3371_v39, %v3368_v38  ;;  %v11616_v40 = vld [vmem:[#allocation13_spill] sm:$0xff] }
 0xe92   :  { %8945 = vtanh.f32 %v2997_v10  ;;  %v3373_v10 = vld [vmem:[#allocation3 + $0x128] sm:$0xff] }
 0xe9c   :  { %v8946_v55 = vpop.eup %8945 }
 0xe9d   :  { %v3000_v29 = vmul.f32 %v8946_v55, %v2999_v11  ;;  %v3372_v11 = vld [vmem:[#allocation3 + $0x120] sm:$0xff]  ;;  %v8328_v55 = vpack.c.bf16 %v3376_v4, %v3373_v10 }
 0xe9e   :  { %v3385_v4 = vld [vmem:[#allocation5 + $0xc0] sm:$0xff] }
 0xe9f   :  { %v10272_v3 = vadd.f32 %v3001_v30, %v3000_v29  ;;  %v3375_v29 = vld [vmem:[#allocation3 + $0x138] sm:$0xff]  ;;  %v3374_v30 = vld [vmem:[#allocation3 + $0x130] sm:$0xff] }
 0xea1   :  { %6711 = vmatmul.mubr.msk.f32.vlgmr.msra.gmra.mrb[58].mxu0 %vm180_vm0, %v10272_v3  ;;  %7475 = vmatmul.mubr.msk.f32.vlgmr.msra.gmra.mrb[46].mxu1 %vm180_vm0, %v10272_v3 }
 0xea2   :  { %8295 = vmatpush1.bf16.msra.mxu0 %v9248_v46  ;;  %8310 = vmatpush3.bf16.msra.mxu1 %v9354_v17 }
 0xea3   :  { %8297 = vmatprep.subr.bf16.mxu0 %v9255_v48  ;;  %8311 = vmatprep.subr.bf16.mxu1 %v11566_v51 }
 0xea4   :  { %3242 = vmatprep.mubr.f32.mxu0 %v11567_v6  ;;  %7493 = vmatprep.mubr.msk.f32.mxu1 %vm9183_vm1, %v11567_v6 }
 0xea6   :  { %8299 = vmatpush1.bf16.msra.mxu0 %v9265_v54  ;;  %8313 = vmatpush3.bf16.msra.mxu1 %v9360_v20  ;;  %v11608_v54 = vld [vmem:[#allocation24_spill] sm:$0xff] }
 0xea7   :  { %8301 = vmatprep.subr.bf16.mxu0 %v9271_v56  ;;  %8314 = vmatprep.subr.bf16.mxu1 %v11566_v51 }
 0xeaa   :  { %8303 = vmatpush1.bf16.msra.mxu0 %v9283_v62  ;;  %8316 = vmatpush3.bf16.msra.mxu1 %v9368_v23  ;;  %v11609_v62 = vsel %vm9578_vm4, %v9724_v22, %v9433_v47  ;;  %v11610_v47 = vsel %vm9477_vm2, %v9567_v34, %v9417_v37  ;;  %v3364_v37 = vld [vmem:[#allocation3 + $0xe0] sm:$0xff] }
 0xeab   :  { %8305 = vmatprep.subr.bf16.mxu0 %v9289_v1  ;;  %8317 = vmatprep.subr.bf16.mxu1 %v11566_v51  ;;  %v8320_v34 = vpack.c.bf16 %v3364_v37, %v3361_v57 }
 0xeae   :  { %8307 = vmatpush1.bf16.msra.mxu0 %v9301_v5  ;;  %8319 = vmatpush3.bf16.msra.mxu1 %v9374_v26 }
 0xeaf   :  { %8321 = vmatprep.subr.bf16.mxu0 %v8320_v34  ;;  %8337 = vmatprep.subr.bf16.mxu1 %v8336_v13 }
 0xf74   :  { %v3075_v46 = vpop.f32.mrb[58].mxu0  ;;  %v3146_v48 = vpop.f32.mrb[46].mxu1 }
 0xf75   :  { %v3150_v17 = vadd.f32 %v3075_v46, %v11608_v54  ;;  %v3077_v20 = vpop.f32.mrb[59].mxu0  ;;  %v7476_v56 = vpop.f32.mrb[47].mxu1  ;;  %v3164_v8 = vadd.f32 %v10187_v16, %v3146_v48  ;;  %v3377_v46 = vld [vmem:[#allocation3 + $0x148] sm:$0xff]  ;;  %v3379_v54 = vld [vmem:[#allocation3 + $0x158] sm:$0xff] }
 0xf76   :  { %v3151_v23 = vadd.f32 %v3077_v20, %v11609_v62  ;;  %v8344_v48 = vpack.c.bf16 %v3377_v46, %v3374_v30  ;;  %v8330_v20 = vpack.c.bf16 %v3375_v29, %v3372_v11  ;;  %v3380_v56 = vld [vmem:[#allocation3 + $0x160] sm:$0xff]  ;;  %v3383_v62 = vld [vmem:[#allocation3 + $0x178] sm:$0xff] }
 0xf77   :  { %v6713_v52 = vmul.f32 -1.442695, %v3150_v17  ;;  %v3382_v17 = vld [vmem:[#allocation3 + $0x170] sm:$0xff]  ;;  %v3388_v11 = vld [vmem:[#allocation5 + $0xd8] sm:$0xff] }
 0xf78   :  { %v6714_v1 = vmul.f32 -1.442695, %v3151_v23  ;;  %v8332_v23 = vpack.c.bf16 %v3382_v17, %v3379_v54  ;;  %v10334_v30 = vpack.c.bf16 %v3388_v11, %v3385_v4  ;;  %v3391_v17 = vld [vmem:[#allocation5 + $0xf0] sm:$0xff] }
 0xf79   :  { %8947 = vpow2.f32 %v6713_v52  ;;  %v3378_v52 = vld [vmem:[#allocation3 + $0x150] sm:$0xff] }
 0xf7a   :  { %8949 = vpow2.f32 %v6714_v1  ;;  %v3381_v1 = vld [vmem:[#allocation3 + $0x168] sm:$0xff] }
 0xf83   :  { %v8948_v44 = vpop.eup %8947 }
 0xf84   :  { %v3155_v5 = vadd.f32 1.0, %v8948_v44  ;;  %v8950_v26 = vpop.eup %8949  ;;  %v8348_v44 = vpack.c.bf16 %v3383_v62, %v3380_v56  ;;  %v3398_v62 = vld [vmem:[#allocation5 + $0x128] sm:$0xff] }
 0xf85   :  { %v3161_v43 = vadd.f32 1.0, %v8950_v26  ;;  %v3386_v26 = vld [vmem:[#allocation5 + $0xc8] sm:$0xff] }
 0xf86   :  { %8951 = vrcp.f32 %v3155_v5  ;;  %v8334_v5 = vpack.c.bf16 %v3381_v1, %v3378_v52  ;;  %v3345_v52 = vsel %vm88_vm3, %v9849_v36, %v10272_v3 }
 0xf87   :  { %8953 = vrcp.f32 %v3161_v43  ;;  %v3389_v43 = vld [vmem:[#allocation5 + $0xe0] sm:$0xff] }
 0xf90   :  { %v8952_v25 = vpop.eup %8951 }
 0xf91   :  { %v3165_v0 = vmul.f32 %v8952_v25, %v3164_v8  ;;  %v8954_v27 = vpop.eup %8953  ;;  %v10315_v8 = vpack.c.bf16 %v3389_v43, %v3386_v26  ;;  %v3400_v26 = vld [vmem:[#allocation5 + $0x138] sm:$0xff] }
 0xf92   :  { %v3168_v35 = vsub.f32 1.0, %v8954_v27  ;;  %v3170_v49 = vmul.f32 %v8954_v27, %v10272_v3  ;;  %v11619_v43 = vld [vmem:[#allocation28_spill] sm:$0xff] }
 0xf93   :  { %v3166_v22 = vadd.f32 %v3165_v0, %v11610_v47  ;;  %v11611_v47 = vld [vmem:[#allocation27_spill] sm:$0xff] }
 0xf95   :  { %8955 = vtanh.f32 %v3166_v22 }
 0xf9f   :  { %v8956_v19 = vpop.eup %8955 }
 0xfa0   :  { %v3169_v45 = vmul.f32 %v8956_v19, %v3168_v35  ;;  %v11612_v19 = vld [vmem:[#allocation26_spill] sm:$0xff] }
 0xfa2   :  { %v10308_v61 = vadd.f32 %v3170_v49, %v3169_v45  ;;  %v11613_v45 = vld [vmem:[#allocation25_spill] sm:$0xff] }
 0xfa3   :  { %v11614_v49 = vsel %vm9578_vm4, %v11612_v19, %v11613_v45  ;;  %v3403_v45 = vld [vmem:[#allocation5 + $0x150] sm:$0xff] }
 0xfa4   :  { %6715 = vmatmul.mubr.msk.f32.vlgmr.msra.gmra.mrb[60].mxu0 %vm180_vm0, %v10308_v61  ;;  %7494 = vmatmul.mubr.msk.f32.vlgmr.msra.gmra.mrb[48].mxu1 %vm180_vm0, %v10308_v61  ;;  %v3344_v56 = vsel %vm88_vm3, %v9811_v33, %v10308_v61 }
 0xfa5   :  { %3547 = vmatprep.mubr.f32.mxu0 %v11567_v6  ;;  %8323 = vmatpush1.bf16.msra.mxu0 %v8322_v2 }
 0xfa6   :  { %8339 = vmatpush3.bf16.msra.mxu1 %v8336_v13  ;;  %8325 = vmatprep.subr.bf16.mxu0 %v8324_v15  ;;  %v11617_v15 = vsel %vm9477_vm2, %v11615_v63, %v11616_v40  ;;  %v3402_v63 = vld [vmem:[#allocation5 + $0x148] sm:$0xff] }
 0xfa7   :  { %8341 = vmatprep.subr.bf16.mxu1 %v8340_v59 }
 0xfa9   :  { %8327 = vmatpush1.bf16.msra.mxu0 %v8326_v7 }
 0xfaa   :  { %8329 = vmatprep.subr.bf16.mxu0 %v8328_v55  ;;  %8343 = vmatpush3.bf16.msra.mxu1 %v8340_v59  ;;  %v3392_v55 = vld [vmem:[#allocation5 + $0xf8] sm:$0xff] }
 0xfab   :  { %8345 = vmatprep.subr.bf16.mxu1 %v8344_v48 }
 0xfad   :  { %8331 = vmatpush1.bf16.msra.mxu0 %v8330_v20  ;;  %v3394_v20 = vld [vmem:[#allocation5 + $0x108] sm:$0xff] }
 0xfae   :  { %8333 = vmatprep.subr.bf16.mxu0 %v8332_v23  ;;  %8347 = vmatpush3.bf16.msra.mxu1 %v8344_v48  ;;  %v3401_v23 = vld [vmem:[#allocation5 + $0x140] sm:$0xff]  ;;  %v10356_v1 = vpack.c.bf16 %v3394_v20, %v3391_v17 }
 0xfaf   :  { %8349 = vmatprep.subr.bf16.mxu1 %v8348_v44 }
 0xfb1   :  { %8335 = vmatpush1.bf16.msra.mxu0 %v8334_v5  ;;  %v3397_v5 = vld [vmem:[#allocation5 + $0x120] sm:$0xff] }
 0xfb2   :  { %8351 = vmatpush3.bf16.msra.mxu1 %v8348_v44  ;;  %8381 = vmatprep.subr.bf16.mxu0 %v10315_v8  ;;  %v10359_v44 = vpack.c.bf16 %v3401_v23, %v3398_v62 }
 0xfb3   :  { %8353 = vmatprep.subr.bf16.mxu1 %v10315_v8 }
0x1077   :  { %v3244_v25 = vpop.f32.mrb[60].mxu0  ;;  %v3315_v0 = vpop.f32.mrb[48].mxu1 }
0x1078   :  { %v3319_v22 = vadd.f32 %v3244_v25, %v11611_v47  ;;  %v3246_v27 = vpop.f32.mrb[61].mxu0  ;;  %v7495_v35 = vpop.f32.mrb[49].mxu1  ;;  %v3333_v58 = vadd.f32 %v10187_v16, %v3315_v0  ;;  %v3395_v16 = vld [vmem:[#allocation5 + $0x110] sm:$0xff]  ;;  %v3346_v25 = vsel %vm88_vm3, %v11619_v43, %v10234_v50  ;;  %v3404_v0 = vld [vmem:[#allocation5 + $0x158] sm:$0xff] }
0x1079   :  { %v3320_v57 = vadd.f32 %v3246_v27, %v11614_v49  ;;  %v10340_v54 = vpack.c.bf16 %v3395_v16, %v3392_v55  ;;  %v3407_v47 = vld [vmem:[#allocation5 + $0x170] sm:$0xff]  ;;  %v10376_v35 = vpack.c.bf16 %v3400_v26, %v3397_v5  ;;  %v3406_v49 = vld [vmem:[#allocation5 + $0x168] sm:$0xff] }
0x107a   :  { %v6717_v37 = vmul.f32 -1.442695, %v3319_v22  ;;  %v11620_v22 = vld [vmem:[#allocation29_spill] sm:$0xff]  ;;  %v10379_v19 = vpack.c.bf16 %v3407_v47, %v3404_v0 }
0x107b   :  { %v6718_v34 = vmul.f32 -1.442695, %v3320_v57  ;;  %v3347_v27 = vsel %vm88_vm3, %v11620_v22, %v10196_v53  ;;  %v11621_v57 = vld [vmem:[#allocation30_spill] sm:$0xff] }
0x107c   :  { %8957 = vpow2.f32 %v6717_v37  ;;  %v3348_v37 = vsel %vm88_vm3, %v11621_v57, %v10153_v12 }
0x107d   :  { %8959 = vpow2.f32 %v6718_v34  ;;  %v11622_v34 = vld [vmem:[#allocation31_spill] sm:$0xff] }
0x1086   :  { %v8958_v32 = vpop.eup %8957 }
0x1087   :  { %v3324_v14 = vadd.f32 1.0, %v8958_v32  ;;  %v8960_v42 = vpop.eup %8959  ;;  %v3349_v32 = vsel %vm88_vm3, %v11622_v34, %v10115_v28 }
0x1088   :  { %v3330_v2 = vadd.f32 1.0, %v8960_v42  ;;  %v3350_v42 = vsel %vm88_vm3, %v10039_v9, %v10077_v41 }
0x1089   :  { %8961 = vrcp.f32 %v3324_v14  ;;  %v10396_v14 = vpack.c.bf16 %v3406_v49, %v3403_v45 }
0x108a   :  { %8963 = vrcp.f32 %v3330_v2  ;;  %v3351_v2 = vsel %vm88_vm3, %v10077_v41, %v10039_v9  ;;  %v3353_v9 = vsel %vm88_vm3, %v10153_v12, %v11621_v57  ;;  %v3354_v41 = vsel %vm88_vm3, %v10196_v53, %v11620_v22 }
0x108b   :  { %v3356_v12 = vsel %vm88_vm3, %v10272_v3, %v9849_v36  ;;  %v3357_v53 = vsel %vm88_vm3, %v10308_v61, %v9811_v33  ;;  %v3393_v3 = vld [vmem:[#allocation5 + $0x100] sm:$0xff] }
0x1093   :  { %v8962_v13 = vpop.eup %8961 }
0x1094   :  { %v3334_v60 = vmul.f32 %v8962_v13, %v3333_v58  ;;  %v8964_v38 = vpop.eup %8963  ;;  %v3352_v58 = vsel %vm88_vm3, %v10115_v28, %v11622_v34  ;;  %v3355_v28 = vsel %vm88_vm3, %v10234_v50, %v11619_v43  ;;  %v3387_v50 = vld [vmem:[#allocation5 + $0xd0] sm:$0xff]  ;;  %v3390_v13 = vld [vmem:[#allocation5 + $0xe8] sm:$0xff] }
0x1095   :  { %v3337_v39 = vsub.f32 1.0, %v8964_v38  ;;  %v3339_v10 = vmul.f32 %v8964_v38, %v10308_v61  ;;  %v10461_v33 = vpack.c.bf16 %v3390_v13, %v3387_v50  ;;  %v3396_v61 = vld [vmem:[#allocation5 + $0x118] sm:$0xff] }
0x1096   :  { %v3335_v21 = vadd.f32 %v3334_v60, %v11617_v15  ;;  %v10467_v60 = vpack.c.bf16 %v3396_v61, %v3393_v3  ;;  %v3405_v15 = vld [vmem:[#allocation5 + $0x160] sm:$0xff] }
0x1098   :  { %8965 = vtanh.f32 %v3335_v21  ;;  %v3408_v21 = vld [vmem:[#allocation5 + $0x178] sm:$0xff] }
0x1099   :  { %v10481_v38 = vpack.c.bf16 %v3408_v21, %v3405_v15 }
0x10a2   :  { %v8966_v7 = vpop.eup %8965 }
0x10a3   :  { %v3338_v59 = vmul.f32 %v8966_v7, %v3337_v39  ;;  %v6719_v39 = vld [vmem:[%s11485_s3 + $0x3] sm:$0x7] }
0x10a4   :  { %v11623_v7 = vld [vmem:[#allocation9_spill] sm:$0xff] }
0x10a5   :  { %v10332_v29 = vadd.f32 %v3339_v10, %v3338_v59  ;;  %v11624_v59 = vsub.s32 2, %v11623_v7  ;;  %v11627_v20 = vsub.s32 1, %v11623_v7 }
0x10a7   :  { %v3343_v48 = vsel %vm88_vm3, %v9779_v31, %v10332_v29  ;;  %v3358_v36 = vsel %vm88_vm3, %v10332_v29, %v9779_v31  ;;  %v3399_v31 = vld [vmem:[#allocation5 + $0x130] sm:$0xff]  ;;  %v10512_v10 = vrot.slane %v6719_v39, %v11624_v59 }
0x10a8   :  { %6722 = vmatmul.mubr.msk.f32.vlgmr.msra.gmra.mrb[62].mxu0 %vm180_vm0, %v3343_v48  ;;  %7512 = vmatprep.mubr.msk.f32.mxu1 %vm180_vm0, %v3343_v48  ;;  %v10475_v40 = vpack.c.bf16 %v3402_v63, %v3399_v31  ;;  %v11626_v48 = vsub.s32 0, %v11623_v7 }
0x10a9   :  { %7513 = vmatmul.mubr.msk.f32.vlgmr.msra.gmra.mrb[50].mxu1 %vm180_vm0, %v3344_v56  ;;  %3553 = vmatprep.mubr.f32.mxu0 %v11567_v6 }
0x10aa   :  { %7515 = vmatprep.mubr.msk.f32.mxu1 %vm180_vm0, %v3345_v52  ;;  %8355 = vmatpush1.bf16.msra.mxu1 %v10334_v30  ;;  %v10525_v17 = vrot.slane %v6719_v39, %v11626_v48 }
0x10ab   :  { %8357 = vmatprep.subr.bf16.mxu1 %v10340_v54  ;;  %8383 = vmatpush1.bf16.msra.mxu0 %v10334_v30 }
0x10ac   :  { %6723 = vmatmul.mubr.msk.f32.gmra.mrb[64].mxu0 %vm180_vm0, %v3344_v56  ;;  %8385 = vmatprep.subr.bf16.mxu0 %v10340_v54  ;;  %v10529_v56 = vrot.slane %v6719_v39, %v11627_v20 }
0x10ad   :  { %7516 = vmatmul.mubr.msk.f32.gmra.mrb[52].mxu1 %vm180_vm0, %v3346_v25  ;;  %3559 = vmatprep.mubr.f32.mxu0 %v11567_v6 }
0x10ae   :  { %7518 = vmatprep.mubr.msk.f32.mxu1 %vm180_vm0, %v3347_v27  ;;  %8359 = vmatpush1.bf16.msra.mxu1 %v10356_v1 }
0x10af   :  { %8361 = vmatprep.subr.bf16.mxu1 %v10359_v44  ;;  %8387 = vmatpush1.bf16.msra.mxu0 %v10356_v1 }
0x10b0   :  { %6724 = vmatmul.mubr.msk.f32.gmra.mrb[66].mxu0 %vm180_vm0, %v3345_v52  ;;  %8389 = vmatprep.subr.bf16.mxu0 %v10359_v44 }
0x10b1   :  { %7519 = vmatmul.mubr.msk.f32.gmra.mrb[54].mxu1 %vm180_vm0, %v3348_v37  ;;  %3565 = vmatprep.mubr.f32.mxu0 %v11567_v6 }
0x10b2   :  { %7521 = vmatprep.mubr.msk.f32.mxu1 %vm180_vm0, %v3349_v32  ;;  %8363 = vmatpush1.bf16.msra.mxu1 %v10376_v35 }
0x10b3   :  { %8365 = vmatprep.subr.bf16.mxu1 %v10379_v19  ;;  %8391 = vmatpush1.bf16.msra.mxu0 %v10376_v35 }
0x10b4   :  { %6725 = vmatmul.mubr.msk.f32.gmra.mrb[68].mxu0 %vm180_vm0, %v3346_v25  ;;  %8393 = vmatprep.subr.bf16.mxu0 %v10379_v19 }
0x10b5   :  { %7522 = vmatmul.mubr.msk.f32.gmra.mrb[56].mxu1 %vm180_vm0, %v3350_v42  ;;  %3571 = vmatprep.mubr.f32.mxu0 %v11567_v6 }
0x10b6   :  { %7524 = vmatprep.mubr.msk.f32.mxu1 %vm180_vm0, %v3351_v2  ;;  %8367 = vmatpush1.bf16.msra.mxu1 %v10396_v14 }
0x10b7   :  { %8368 = vmatprep.subr.bf16.mxu1 %v11566_v51  ;;  %8395 = vmatpush1.bf16.msra.mxu0 %v10396_v14 }
0x10b8   :  { %6726 = vmatmul.mubr.msk.f32.gmra.mrb[70].mxu0 %vm180_vm0, %v3347_v27  ;;  %8409 = vmatprep.subr.bf16.mxu0 %v10315_v8 }
0x10b9   :  { %7525 = vmatmul.mubr.msk.f32.gmra.mrb[58].mxu1 %vm180_vm0, %v3352_v58  ;;  %3577 = vmatprep.mubr.f32.mxu0 %v11567_v6 }
0x10ba   :  { %7527 = vmatprep.mubr.msk.f32.mxu1 %vm180_vm0, %v3353_v9 }
0x10bc   :  { %6727 = vmatmul.mubr.msk.f32.gmra.mrb[72].mxu0 %vm180_vm0, %v3348_v37 }
0x10bd   :  { %7528 = vmatmul.mubr.msk.f32.gmra.mrb[60].mxu1 %vm180_vm0, %v3354_v41  ;;  %3583 = vmatprep.mubr.f32.mxu0 %v11567_v6 }
0x10be   :  { %7530 = vmatprep.mubr.msk.f32.mxu1 %vm180_vm0, %v3355_v28 }
0x10c0   :  { %6728 = vmatmul.mubr.msk.f32.gmra.mrb[74].mxu0 %vm180_vm0, %v3349_v32 }
0x10c1   :  { %7531 = vmatmul.mubr.msk.f32.gmra.mrb[62].mxu1 %vm180_vm0, %v3356_v12  ;;  %3589 = vmatprep.mubr.f32.mxu0 %v11567_v6 }
0x10c2   :  { %7533 = vmatprep.mubr.msk.f32.mxu1 %vm180_vm0, %v3357_v53 }
0x10c4   :  { %6729 = vmatmul.mubr.msk.f32.gmra.mrb[76].mxu0 %vm180_vm0, %v3350_v42 }
0x10c5   :  { %7534 = vmatmul.mubr.msk.f32.gmra.mrb[64].mxu1 %vm180_vm0, %v3358_v36  ;;  %3595 = vmatprep.mubr.f32.mxu0 %v11567_v6 }
0x10c6   :  { %3910 = vmatprep.mubr.f32.mxu1 %v11567_v6 }
0x10c8   :  { %6730 = vmatmul.mubr.msk.f32.gmra.mrb[78].mxu0 %vm180_vm0, %v3351_v2 }
0x10c9   :  { %3601 = vmatprep.mubr.f32.mxu0 %v11567_v6  ;;  %3911 = vmatmul.mubr.f32.vlgmr.msra.gmra.mrb[66].mxu1 %v11567_v6 }
0x10ca   :  { %8370 = vmatpush3.bf16.msra.mxu1 %v10461_v33  ;;  %7552 = vmatprep.mubr.msk.f32.mxu1 %vm9183_vm1, %v11567_v6 }
0x10cb   :  { %8371 = vmatprep.subr.bf16.mxu1 %v11566_v51 }
0x10cc   :  { %6731 = vmatmul.mubr.msk.f32.gmra.mrb[80].mxu0 %vm180_vm0, %v3352_v58 }
0x10cd   :  { %3607 = vmatprep.mubr.f32.mxu0 %v11567_v6 }
0x10ce   :  { %8373 = vmatpush3.bf16.msra.mxu1 %v10467_v60 }
0x10cf   :  { %8374 = vmatprep.subr.bf16.mxu1 %v11566_v51 }
0x10d0   :  { %6732 = vmatmul.mubr.msk.f32.gmra.mrb[82].mxu0 %vm180_vm0, %v3353_v9 }
0x10d1   :  { %3613 = vmatprep.mubr.f32.mxu0 %v11567_v6 }
0x10d2   :  { %8376 = vmatpush3.bf16.msra.mxu1 %v10475_v40 }
0x10d3   :  { %8377 = vmatprep.subr.bf16.mxu1 %v11566_v51 }
0x10d4   :  { %6733 = vmatmul.mubr.msk.f32.gmra.mrb[84].mxu0 %vm180_vm0, %v3354_v41 }
0x10d5   :  { %3619 = vmatprep.mubr.f32.mxu0 %v11567_v6 }
0x10d6   :  { %8379 = vmatpush3.bf16.msra.mxu1 %v10481_v38 }
0x10d7   :  { %8396 = vmatprep.subr.bf16.mxu1 %v11566_v51 }
0x10d8   :  { %6734 = vmatmul.mubr.msk.f32.gmra.mrb[86].mxu0 %vm180_vm0, %v3355_v28 }
0x10d9   :  { %3625 = vmatprep.mubr.f32.mxu0 %v11567_v6  ;;  %7553 = vmatmul.mubr.f32.vlgmr.msra.gmra.mrb[68].mxu1 %v11567_v6 }
0x10da   :  { %8398 = vmatpush3.bf16.msra.mxu1 %v10461_v33  ;;  %7571 = vmatprep.mubr.msk.f32.mxu1 %vm9183_vm1, %v11567_v6 }
0x10db   :  { %8399 = vmatprep.subr.bf16.mxu1 %v11566_v51 }
0x10dc   :  { %6735 = vmatmul.mubr.msk.f32.gmra.mrb[88].mxu0 %vm180_vm0, %v3356_v12 }
0x10dd   :  { %3631 = vmatprep.mubr.f32.mxu0 %v11567_v6 }
0x10de   :  { %8401 = vmatpush3.bf16.msra.mxu1 %v10467_v60 }
0x10df   :  { %8402 = vmatprep.subr.bf16.mxu1 %v11566_v51 }
0x10e0   :  { %6736 = vmatmul.mubr.msk.f32.gmra.mrb[90].mxu0 %vm180_vm0, %v3357_v53 }
0x10e1   :  { %3637 = vmatprep.mubr.f32.mxu0 %v11567_v6 }
0x10e2   :  { %8404 = vmatpush3.bf16.msra.mxu1 %v10475_v40 }
0x10e3   :  { %8405 = vmatprep.subr.bf16.mxu1 %v11566_v51 }
0x10e4   :  { %6737 = vmatmul.mubr.msk.f32.gmra.mrb[92].mxu0 %vm180_vm0, %v3358_v36 }
0x10e5   :  { %4085 = vmatprep.mubr.f32.mxu0 %v11567_v6 }
0x10e6   :  { %8407 = vmatpush3.bf16.msra.mxu1 %v10481_v38 }
0x10e7   :  { %8424 = vmatprep.subr.bf16.mxu1 %v11566_v51 }
0x117b   :  { %v10514_v4 = vpop.f32.mrb[62].mxu0 }
0x117c   :  { %v10516_v11 = vpop.f32.mrb[63].mxu0  ;;  %v7514_v55 = vpop.f32.mrb[50].mxu1 }
0x117d   :  { %v10519_v16 = vadd.f32 %v7514_v55, %v10512_v10  ;;  %v10521_v29 = vpop.f32.mrb[51].mxu1 }
0x117f   :  { %11625 = vst [vmem:[#allocation17_spill] sm:$0xff] %v10519_v16  ;;  %v3555_v62 = vpop.f32.mrb[64].mxu0 }
0x1180   :  { %v10532_v23 = vadd.f32 %v3555_v62, %v10525_v17  ;;  %v3557_v52 = vpop.f32.mrb[65].mxu0  ;;  %v7517_v5 = vpop.f32.mrb[52].mxu1 }
0x1181   :  { %v10535_v26 = vadd.f32 %v3557_v52, %v10529_v56  ;;  %v10538_v43 = vadd.f32 %v7517_v5, %v10512_v10  ;;  %v3720_v25 = vpop.f32.mrb[53].mxu1 }
0x1182   :  { %v10541_v0 = vadd.f32 %v3720_v25, %v10512_v10 }
0x1183   :  { %11628 = vst [vmem:[#allocation14_spill] sm:$0xff] %v10535_v26  ;;  %v3561_v47 = vpop.f32.mrb[66].mxu0 }
0x1184   :  { %v10544_v22 = vadd.f32 %v3561_v47, %v10525_v17  ;;  %v3563_v27 = vpop.f32.mrb[67].mxu0  ;;  %v7520_v45 = vpop.f32.mrb[54].mxu1 }
0x1185   :  { %v10547_v49 = vadd.f32 %v3563_v27, %v10529_v56  ;;  %v10550_v57 = vadd.f32 %v7520_v45, %v10512_v10  ;;  %v3730_v37 = vpop.f32.mrb[55].mxu1  ;;  %v10650_v27 = vadd.f32 %v10521_v29, %v10512_v10 }
0x1186   :  { %v10553_v34 = vadd.f32 %v3730_v37, %v10512_v10 }
0x1187   :  { %v3567_v32 = vpop.f32.mrb[68].mxu0  ;;  %11633 = vst [vmem:[#allocation19_spill] sm:$0xff] %v10650_v27 }
0x1188   :  { %v10556_v42 = vadd.f32 %v3567_v32, %v10525_v17  ;;  %v3569_v2 = vpop.f32.mrb[69].mxu0  ;;  %v7523_v58 = vpop.f32.mrb[56].mxu1 }
0x1189   :  { %v10559_v9 = vadd.f32 %v3569_v2, %v10529_v56  ;;  %v10562_v41 = vadd.f32 %v7523_v58, %v10512_v10  ;;  %v3740_v28 = vpop.f32.mrb[57].mxu1 }
0x118a   :  { %v10565_v12 = vadd.f32 %v3740_v28, %v10512_v10 }
0x118b   :  { %11629 = vst [vmem:[#allocation16_spill] sm:$0xff] %v10562_v41  ;;  %v3573_v53 = vpop.f32.mrb[70].mxu0 }
0x118c   :  { %11630 = vst [vmem:[#allocation11_spill] sm:$0xff] %v10565_v12  ;;  %v10568_v50 = vadd.f32 %v3573_v53, %v10525_v17  ;;  %v3575_v13 = vpop.f32.mrb[71].mxu0  ;;  %v7526_v36 = vpop.f32.mrb[58].mxu1 }
0x118d   :  { %v10571_v3 = vadd.f32 %v3575_v13, %v10529_v56  ;;  %v10574_v61 = vadd.f32 %v7526_v36, %v10512_v10  ;;  %v3750_v31 = vpop.f32.mrb[59].mxu1 }
0x118e   :  { %v10577_v63 = vadd.f32 %v3750_v31, %v10512_v10 }
0x118f   :  { %11631 = vst [vmem:[#allocation12_spill] sm:$0xff] %v10574_v61  ;;  %v3579_v39 = vpop.f32.mrb[72].mxu0 }
0x1190   :  { %11632 = vst [vmem:[#allocation18_spill] sm:$0xff] %v10577_v63  ;;  %v3580_v55 = vadd.f32 %v3579_v39, %v10525_v17  ;;  %v3581_v48 = vpop.f32.mrb[73].mxu0  ;;  %v7529_v20 = vpop.f32.mrb[60].mxu1 }
0x1191   :  { %v10597_v62 = vadd.f32 %v3581_v48, %v10529_v56  ;;  %v10600_v52 = vadd.f32 %v7529_v20, %v10512_v10  ;;  %v3760_v5 = vpop.f32.mrb[61].mxu1 }
0x1192   :  { %v10603_v25 = vadd.f32 %v3760_v5, %v10512_v10 }
0x1193   :  { %v3585_v45 = vpop.f32.mrb[74].mxu0 }
0x1194   :  { %v3586_v2 = vadd.f32 %v3585_v45, %v10525_v17  ;;  %v3587_v58 = vpop.f32.mrb[75].mxu0  ;;  %v7532_v28 = vpop.f32.mrb[62].mxu1 }
0x1195   :  { %v10623_v53 = vadd.f32 %v3587_v58, %v10529_v56  ;;  %v10626_v13 = vadd.f32 %v7532_v28, %v10512_v10  ;;  %v3770_v36 = vpop.f32.mrb[63].mxu1 }
0x1196   :  { %v10629_v31 = vadd.f32 %v3770_v36, %v10512_v10 }
0x1197   :  { %v3591_v20 = vpop.f32.mrb[76].mxu0 }
0x1198   :  { %v3592_v58 = vadd.f32 %v3591_v20, %v10525_v17  ;;  %v3593_v28 = vpop.f32.mrb[77].mxu0  ;;  %v7535_v36 = vpop.f32.mrb[64].mxu1 }
0x1199   :  { %v10653_v48 = vadd.f32 %v3593_v28, %v10529_v56  ;;  %v10656_v32 = vadd.f32 %v7535_v36, %v10512_v10  ;;  %v3780_v21 = vpop.f32.mrb[65].mxu1 }
0x119a   :  { %v10659_v59 = vadd.f32 %v3780_v21, %v10512_v10 }
0x119b   :  { %11634 = vst [vmem:[#allocation20_spill] sm:$0xff] %v10653_v48  ;;  %11635 = vst [vmem:[#allocation21_spill] sm:$0xff] %v10656_v32  ;;  %v3597_v45 = vpop.f32.mrb[78].mxu0 }
0x119c   :  { %11636 = vst [vmem:[#allocation22_spill] sm:$0xff] %v10659_v59  ;;  %v3598_v21 = vadd.f32 %v3597_v45, %v10525_v17  ;;  %v3599_v36 = vpop.f32.mrb[79].mxu0  ;;  %v10678_v7 = vpop.f32.mrb[66].mxu1 }
0x119d   :  { %v10681_v15 = vadd.f32 %v3599_v36, %v10529_v56  ;;  %v10683_v29 = vpop.f32.mrb[67].mxu1 }
0x119e   :  { %v10687_v37 = vsel %vm88_vm3, %v3592_v58, %v3598_v21  ;;  %v10691_v47 = vsel %vm88_vm3, %v3598_v21, %v3592_v58 }
0x119f   :  { %11637 = vst [vmem:[#allocation23_spill] sm:$0xff] %v10681_v15  ;;  %11638 = vst [vmem:[#allocation24_spill] sm:$0xff] %v10687_v37  ;;  %v3603_v5 = vpop.f32.mrb[80].mxu0 }
0x11a0   :  { %11639 = vst [vmem:[#allocation27_spill] sm:$0xff] %v10691_v47  ;;  %v3604_v10 = vadd.f32 %v3603_v5, %v10525_v17  ;;  %v3605_v39 = vpop.f32.mrb[81].mxu0 }
0x11a1   :  { %v10703_v28 = vadd.f32 %v3605_v39, %v10529_v56 }
0x11a2   :  { %v10707_v58 = vsel %vm88_vm3, %v3586_v2, %v3604_v10  ;;  %v10711_v21 = vsel %vm88_vm3, %v3604_v10, %v3586_v2  ;;  %v11701_v18 = vld [vmem:[#allocation21_spill] sm:$0xff] }
0x11a3   :  { %11640 = vst [vmem:[#allocation26_spill] sm:$0xff] %v10711_v21  ;;  %v3609_v45 = vpop.f32.mrb[82].mxu0 }
0x11a4   :  { %v3610_v5 = vadd.f32 %v3609_v45, %v10525_v17  ;;  %v3611_v20 = vpop.f32.mrb[83].mxu0 }
0x11a5   :  { %v10723_v47 = vadd.f32 %v3611_v20, %v10529_v56 }
0x11a6   :  { %v10727_v2 = vsel %vm88_vm3, %v3580_v55, %v3610_v5  ;;  %v10731_v10 = vsel %vm88_vm3, %v3610_v5, %v3580_v55 }
0x11a7   :  { %11641 = vst [vmem:[#allocation25_spill] sm:$0xff] %v10731_v10  ;;  %v3615_v36 = vpop.f32.mrb[84].mxu0 }
0x11a8   :  { %v3616_v45 = vadd.f32 %v3615_v36, %v10525_v17  ;;  %v3617_v21 = vpop.f32.mrb[85].mxu0 }
0x11a9   :  { %v10743_v63 = vadd.f32 %v3617_v21, %v10529_v56 }
0x11aa   :  { %v10748_v55 = vsel %vm88_vm3, %v10568_v50, %v3616_v45  ;;  %v10753_v5 = vsel %vm88_vm3, %v3616_v45, %v10568_v50 }
0x11ab   :  { %11642 = vst [vmem:[#allocation15_spill] sm:$0xff] %v10753_v5  ;;  %v3621_v39 = vpop.f32.mrb[86].mxu0 }
0x11ac   :  { %v3622_v20 = vadd.f32 %v3621_v39, %v10525_v17  ;;  %v3623_v10 = vpop.f32.mrb[87].mxu0  ;;  %v3983_v41 = vpop.f32.mrb[68].mxu1 }
0x11ad   :  { %v10765_v15 = vadd.f32 %v3623_v10, %v10529_v56  ;;  %v7554_v50 = vpop.f32.mrb[69].mxu1 }
0x11ae   :  { %v10770_v45 = vsel %vm88_vm3, %v10556_v42, %v3622_v20  ;;  %v10775_v36 = vsel %vm88_vm3, %v3622_v20, %v10556_v42 }
0x11af   :  { %11643 = vst [vmem:[#allocation13_spill] sm:$0xff] %v10775_v36  ;;  %v3627_v5 = vpop.f32.mrb[88].mxu0 }
0x11b0   :  { %v3628_v50 = vadd.f32 %v3627_v5, %v10525_v17  ;;  %v3629_v21 = vpop.f32.mrb[89].mxu0 }
0x11b1   :  { %v10787_v48 = vadd.f32 %v3629_v21, %v10529_v56 }
0x11b2   :  { %v10792_v42 = vsel %vm88_vm3, %v10544_v22, %v3628_v50  ;;  %v10797_v20 = vsel %vm88_vm3, %v3628_v50, %v10544_v22 }
0x11b3   :  { %11644 = vst [vmem:[#allocation10_spill] sm:$0xff] %v10797_v20  ;;  %v3633_v39 = vpop.f32.mrb[90].mxu0 }
0x11b4   :  { %v3634_v10 = vadd.f32 %v3633_v39, %v10525_v17  ;;  %v3635_v36 = vpop.f32.mrb[91].mxu0  ;;  %v3550_v39 = vadd.f32 %v10514_v4, %v10525_v17 }
0x11b5   :  { %v10809_v37 = vadd.f32 %v3635_v36, %v10529_v56 }
0x11b6   :  { %v4015_v22 = vsel %vm88_vm3, %v10532_v23, %v3634_v10  ;;  %v10817_v50 = vsel %vm88_vm3, %v3634_v10, %v10532_v23  ;;  %v10832_v23 = vadd.f32 %v10516_v11, %v10529_v56 }
0x11b7   :  { %11645 = vst [vmem:[#allocation28_spill] sm:$0xff] %v10817_v50  ;;  %v3639_v5 = vpop.f32.mrb[92].mxu0  ;;  %v4016_v21 = vsel %vm9578_vm4, %v10535_v26, %v10809_v37 }
0x11b8   :  { %v3640_v20 = vadd.f32 %v3639_v5, %v10525_v17  ;;  %v3641_v61 = vpop.f32.mrb[93].mxu0  ;;  %11646 = vst [vmem:[#allocation29_spill] sm:$0xff] %v10832_v23 }
0x11b9   :  { %v10835_v10 = vadd.f32 %v3641_v61, %v10529_v56 }
0x11ba   :  { %v3843_v50 = vsel %vm88_vm3, %v3550_v39, %v3640_v20  ;;  %v10841_v12 = vsel %vm88_vm3, %v3640_v20, %v3550_v39 }
0x11bb   :  { %11647 = vst [vmem:[#allocation30_spill] sm:$0xff] %v10835_v10  ;;  %11648 = vst [vmem:[#allocation31_spill] sm:$0xff] %v10841_v12  ;;  %v3987_v36 = vadd.f32 %v10678_v7, %v3843_v50  ;;  %v3844_v4 = vsel %vm9578_vm4, %v10832_v23, %v10835_v10  ;;  %v10856_v50 = vld [vmem:[%s11486_s4 + $0x1] ss:$0 sm:$0xff] }
0x11bc   :  { %v3988_v17 = vadd.f32 %v10683_v29, %v3844_v4  ;;  %v4001_v12 = vadd.f32 %v10856_v50, %v3983_v41  ;;  %v11649_v29 = vsel %vm9477_vm2, %v10650_v27, %v10656_v32 }
0x11bd   :  { %v6754_v56 = vmul.f32 -1.442695, %v3987_v36 }
0x11be   :  { %v6755_v61 = vmul.f32 -1.442695, %v3988_v17 }
0x11bf   :  { %8967 = vpow2.f32 %v6754_v56 }
0x11c0   :  { %8969 = vpow2.f32 %v6755_v61 }
0x11c9   :  { %v8968_v20 = vpop.eup %8967 }
0x11ca   :  { %v3992_v5 = vadd.f32 1.0, %v8968_v20  ;;  %v8970_v7 = vpop.eup %8969 }
0x11cb   :  { %v3998_v39 = vadd.f32 1.0, %v8970_v7 }
0x11cc   :  { %8971 = vrcp.f32 %v3992_v5 }
0x11cd   :  { %8973 = vrcp.f32 %v3998_v39 }
0x11d6   :  { %v8972_v26 = vpop.eup %8971 }
0x11d7   :  { %v4002_v11 = vmul.f32 %v8972_v26, %v4001_v12  ;;  %v8974_v4 = vpop.eup %8973 }
0x11d8   :  { %v4005_v17 = vsub.f32 1.0, %v8974_v4  ;;  %v4007_v61 = vmul.f32 0.0, %v8974_v4 }
0x11d9   :  { %v4003_v36 = vadd.f32 %v4002_v11, %v11649_v29 }
0x11db   :  { %8975 = vtanh.f32 %v4003_v36 }
0x11e5   :  { %v8976_v56 = vpop.eup %8975 }
0x11e6   :  { %v4006_v20 = vmul.f32 %v8976_v56, %v4005_v17 }
0x11e8   :  { %v10864_v5 = vadd.f32 %v4007_v61, %v4006_v20 }
0x11ea   :  { %11650 = vst [vmem:[#allocation9_spill] sm:$0xff] %v10864_v5  ;;  %6756 = vmatmul.mubr.msk.f32.vlgmr.msra.gmra.mrb[94].mxu0 %vm180_vm0, %v10864_v5  ;;  %7572 = vmatmul.mubr.msk.f32.vlgmr.msra.gmra.mrb[70].mxu1 %vm180_vm0, %v10864_v5 }
0x11eb   :  { %8411 = vmatpush1.bf16.msra.mxu0 %v10334_v30  ;;  %8426 = vmatpush3.bf16.msra.mxu1 %v10461_v33 }
0x11ec   :  { %8413 = vmatprep.subr.bf16.mxu0 %v10340_v54  ;;  %8427 = vmatprep.subr.bf16.mxu1 %v11566_v51 }
0x11ed   :  { %4260 = vmatprep.mubr.f32.mxu0 %v11567_v6  ;;  %7590 = vmatprep.mubr.msk.f32.mxu1 %vm9183_vm1, %v11567_v6 }
0x11ef   :  { %8415 = vmatpush1.bf16.msra.mxu0 %v10356_v1  ;;  %8429 = vmatpush3.bf16.msra.mxu1 %v10467_v60 }
0x11f0   :  { %8417 = vmatprep.subr.bf16.mxu0 %v10359_v44  ;;  %8430 = vmatprep.subr.bf16.mxu1 %v11566_v51 }
0x11f3   :  { %8419 = vmatpush1.bf16.msra.mxu0 %v10376_v35  ;;  %8432 = vmatpush3.bf16.msra.mxu1 %v10475_v40 }
0x11f4   :  { %8421 = vmatprep.subr.bf16.mxu0 %v10379_v19  ;;  %8433 = vmatprep.subr.bf16.mxu1 %v11566_v51 }
0x11f7   :  { %8423 = vmatpush1.bf16.msra.mxu0 %v10396_v14  ;;  %8435 = vmatpush3.bf16.msra.mxu1 %v10481_v38 }
0x11f8   :  { %8437 = vmatprep.subr.bf16.mxu0 %v10315_v8  ;;  %8452 = vmatprep.subr.bf16.mxu1 %v11566_v51 }
0x12bd   :  { %v4087_v26 = vpop.f32.mrb[94].mxu0  ;;  %v4158_v41 = vpop.f32.mrb[70].mxu1 }
0x12be   :  { %v4162_v12 = vadd.f32 %v4087_v26, %v4015_v22  ;;  %v4089_v11 = vpop.f32.mrb[95].mxu0  ;;  %v7573_v7 = vpop.f32.mrb[71].mxu1  ;;  %v4176_v20 = vadd.f32 %v10856_v50, %v4158_v41  ;;  %v11651_v22 = vsel %vm9477_vm2, %v10519_v16, %v10659_v59 }
0x12bf   :  { %v4163_v39 = vadd.f32 %v4089_v11, %v4016_v21 }
0x12c0   :  { %v6758_v29 = vmul.f32 -1.442695, %v4162_v12 }
0x12c1   :  { %v6759_v36 = vmul.f32 -1.442695, %v4163_v39 }
0x12c2   :  { %8977 = vpow2.f32 %v6758_v29 }
0x12c3   :  { %8979 = vpow2.f32 %v6759_v36 }
0x12cc   :  { %v8978_v4 = vpop.eup %8977 }
0x12cd   :  { %v4167_v17 = vadd.f32 1.0, %v8978_v4  ;;  %v8980_v56 = vpop.eup %8979 }
0x12ce   :  { %v4173_v61 = vadd.f32 1.0, %v8980_v56 }
0x12cf   :  { %8981 = vrcp.f32 %v4167_v17  ;;  %v11653_v17 = vsel %vm9578_vm4, %v10547_v49, %v10787_v48 }
0x12d0   :  { %8983 = vrcp.f32 %v4173_v61 }
0x12d9   :  { %v8982_v27 = vpop.eup %8981 }
0x12da   :  { %v4177_v32 = vmul.f32 %v8982_v27, %v4176_v20  ;;  %v8984_v26 = vpop.eup %8983 }
0x12db   :  { %v4180_v12 = vsub.f32 1.0, %v8984_v26  ;;  %v4182_v39 = vmul.f32 %v8984_v26, %v10864_v5 }
0x12dc   :  { %v4178_v21 = vadd.f32 %v4177_v32, %v11651_v22 }
0x12de   :  { %8985 = vtanh.f32 %v4178_v21 }
0x12e8   :  { %v8986_v11 = vpop.eup %8985 }
0x12e9   :  { %v4181_v7 = vmul.f32 %v8986_v11, %v4180_v12 }
0x12eb   :  { %v10896_v29 = vadd.f32 %v4182_v39, %v4181_v7  ;;  %v11654_v39 = vsel %vm9477_vm2, %v10541_v0, %v10626_v13 }
0x12ed   :  { %11652 = vst [vmem:[#allocation32_spill] sm:$0xff] %v10896_v29  ;;  %6760 = vmatmul.mubr.msk.f32.vlgmr.msra.gmra.mrb[96].mxu0 %vm180_vm0, %v10896_v29  ;;  %7591 = vmatmul.mubr.msk.f32.vlgmr.msra.gmra.mrb[72].mxu1 %vm180_vm0, %v10896_v29 }
0x12ee   :  { %8439 = vmatpush1.bf16.msra.mxu0 %v10334_v30  ;;  %8454 = vmatpush3.bf16.msra.mxu1 %v10461_v33 }
0x12ef   :  { %8441 = vmatprep.subr.bf16.mxu0 %v10340_v54  ;;  %8455 = vmatprep.subr.bf16.mxu1 %v11566_v51 }
0x12f0   :  { %4435 = vmatprep.mubr.f32.mxu0 %v11567_v6  ;;  %7609 = vmatprep.mubr.msk.f32.mxu1 %vm9183_vm1, %v11567_v6 }
0x12f2   :  { %8443 = vmatpush1.bf16.msra.mxu0 %v10356_v1  ;;  %8457 = vmatpush3.bf16.msra.mxu1 %v10467_v60 }
0x12f3   :  { %8445 = vmatprep.subr.bf16.mxu0 %v10359_v44  ;;  %8458 = vmatprep.subr.bf16.mxu1 %v11566_v51 }
0x12f6   :  { %8447 = vmatpush1.bf16.msra.mxu0 %v10376_v35  ;;  %8460 = vmatpush3.bf16.msra.mxu1 %v10475_v40 }
0x12f7   :  { %8449 = vmatprep.subr.bf16.mxu0 %v10379_v19  ;;  %8461 = vmatprep.subr.bf16.mxu1 %v11566_v51 }
0x12fa   :  { %8451 = vmatpush1.bf16.msra.mxu0 %v10396_v14  ;;  %8463 = vmatpush3.bf16.msra.mxu1 %v10481_v38 }
0x12fb   :  { %8465 = vmatprep.subr.bf16.mxu0 %v10315_v8  ;;  %8480 = vmatprep.subr.bf16.mxu1 %v11566_v51 }
0x13c0   :  { %v4262_v27 = vpop.f32.mrb[96].mxu0  ;;  %v4333_v32 = vpop.f32.mrb[72].mxu1 }
0x13c1   :  { %v4337_v41 = vadd.f32 %v4262_v27, %v10792_v42  ;;  %v4264_v36 = vpop.f32.mrb[97].mxu0  ;;  %v7592_v4 = vpop.f32.mrb[73].mxu1  ;;  %v4351_v11 = vadd.f32 %v10856_v50, %v4333_v32 }
0x13c2   :  { %v4338_v56 = vadd.f32 %v4264_v36, %v11653_v17 }
0x13c3   :  { %v6762_v61 = vmul.f32 -1.442695, %v4337_v41 }
0x13c4   :  { %v6763_v20 = vmul.f32 -1.442695, %v4338_v56 }
0x13c5   :  { %8987 = vpow2.f32 %v6762_v61 }
0x13c6   :  { %8989 = vpow2.f32 %v6763_v20 }
0x13cf   :  { %v8988_v22 = vpop.eup %8987 }
0x13d0   :  { %v4342_v21 = vadd.f32 1.0, %v8988_v22  ;;  %v8990_v26 = vpop.eup %8989 }
0x13d1   :  { %v4348_v12 = vadd.f32 1.0, %v8990_v26 }
0x13d2   :  { %8991 = vrcp.f32 %v4342_v21 }
0x13d3   :  { %8993 = vrcp.f32 %v4348_v12  ;;  %v11655_v12 = vsel %vm9578_vm4, %v10559_v9, %v10765_v15 }
0x13dc   :  { %v8992_v42 = vpop.eup %8991 }
0x13dd   :  { %v4352_v7 = vmul.f32 %v8992_v42, %v4351_v11  ;;  %v8994_v41 = vpop.eup %8993 }
0x13de   :  { %v4355_v36 = vsub.f32 1.0, %v8994_v41  ;;  %v4357_v56 = vmul.f32 %v8994_v41, %v10896_v29  ;;  %v11670_v29 = vld [vmem:[#allocation18_spill] sm:$0xff] }
0x13df   :  { %v4353_v27 = vadd.f32 %v4352_v7, %v11654_v39 }
0x13e1   :  { %8995 = vtanh.f32 %v4353_v27 }
0x13eb   :  { %v8996_v4 = vpop.eup %8995 }
0x13ec   :  { %v4356_v17 = vmul.f32 %v8996_v4, %v4355_v36 }
0x13ee   :  { %v10934_v61 = vadd.f32 %v4357_v56, %v4356_v17  ;;  %v11656_v56 = vsel %vm9477_vm2, %v10538_v43, %v10629_v31 }
0x13f0   :  { %6764 = vmatmul.mubr.msk.f32.vlgmr.msra.gmra.mrb[98].mxu0 %vm180_vm0, %v10934_v61  ;;  %7610 = vmatmul.mubr.msk.f32.vlgmr.msra.gmra.mrb[74].mxu1 %vm180_vm0, %v10934_v61 }
0x13f1   :  { %8467 = vmatpush1.bf16.msra.mxu0 %v10334_v30  ;;  %8482 = vmatpush3.bf16.msra.mxu1 %v10461_v33 }
0x13f2   :  { %8469 = vmatprep.subr.bf16.mxu0 %v10340_v54  ;;  %8483 = vmatprep.subr.bf16.mxu1 %v11566_v51 }
0x13f3   :  { %4610 = vmatprep.mubr.f32.mxu0 %v11567_v6  ;;  %7628 = vmatprep.mubr.msk.f32.mxu1 %vm9183_vm1, %v11567_v6 }
0x13f5   :  { %8471 = vmatpush1.bf16.msra.mxu0 %v10356_v1  ;;  %8485 = vmatpush3.bf16.msra.mxu1 %v10467_v60 }
0x13f6   :  { %8473 = vmatprep.subr.bf16.mxu0 %v10359_v44  ;;  %8486 = vmatprep.subr.bf16.mxu1 %v11566_v51 }
0x13f9   :  { %8475 = vmatpush1.bf16.msra.mxu0 %v10376_v35  ;;  %8488 = vmatpush3.bf16.msra.mxu1 %v10475_v40 }
0x13fa   :  { %8477 = vmatprep.subr.bf16.mxu0 %v10379_v19  ;;  %8489 = vmatprep.subr.bf16.mxu1 %v11566_v51 }
0x13fd   :  { %8479 = vmatpush1.bf16.msra.mxu0 %v10396_v14  ;;  %8491 = vmatpush3.bf16.msra.mxu1 %v10481_v38 }
0x13fe   :  { %8493 = vmatprep.subr.bf16.mxu0 %v10315_v8  ;;  %8508 = vmatprep.subr.bf16.mxu1 %v11566_v51 }
0x14c3   :  { %v4437_v32 = vpop.f32.mrb[98].mxu0  ;;  %v4508_v20 = vpop.f32.mrb[74].mxu1 }
0x14c4   :  { %v4512_v22 = vadd.f32 %v4437_v32, %v10770_v45  ;;  %v4439_v21 = vpop.f32.mrb[99].mxu0  ;;  %v7611_v26 = vpop.f32.mrb[75].mxu1  ;;  %v4526_v4 = vadd.f32 %v10856_v50, %v4508_v20 }
0x14c5   :  { %v4513_v11 = vadd.f32 %v4439_v21, %v11655_v12 }
0x14c6   :  { %v6766_v42 = vmul.f32 -1.442695, %v4512_v22 }
0x14c7   :  { %v6767_v7 = vmul.f32 -1.442695, %v4513_v11 }
0x14c8   :  { %8997 = vpow2.f32 %v6766_v42 }
0x14c9   :  { %8999 = vpow2.f32 %v6767_v7 }
0x14d2   :  { %v8998_v39 = vpop.eup %8997 }
0x14d3   :  { %v4517_v27 = vadd.f32 1.0, %v8998_v39  ;;  %v9000_v41 = vpop.eup %8999 }
0x14d4   :  { %v4523_v36 = vadd.f32 1.0, %v9000_v41 }
0x14d5   :  { %9001 = vrcp.f32 %v4517_v27 }
0x14d6   :  { %9003 = vrcp.f32 %v4523_v36  ;;  %v11657_v36 = vsel %vm9578_vm4, %v10571_v3, %v10743_v63 }
0x14df   :  { %v9002_v45 = vpop.eup %9001 }
0x14e0   :  { %v4527_v17 = vmul.f32 %v9002_v45, %v4526_v4  ;;  %v9004_v22 = vpop.eup %9003 }
0x14e1   :  { %v4530_v21 = vsub.f32 1.0, %v9004_v22  ;;  %v4532_v11 = vmul.f32 %v9004_v22, %v10934_v61 }
0x14e2   :  { %v4528_v32 = vadd.f32 %v4527_v17, %v11656_v56 }
0x14e4   :  { %9005 = vtanh.f32 %v4528_v32 }
0x14ee   :  { %v9006_v26 = vpop.eup %9005 }
0x14ef   :  { %v4531_v12 = vmul.f32 %v9006_v26, %v4530_v21 }
0x14f1   :  { %v10972_v42 = vadd.f32 %v4532_v11, %v4531_v12  ;;  %v11658_v11 = vsel %vm9477_vm2, %v10553_v34, %v10600_v52 }
0x14f3   :  { %6768 = vmatmul.mubr.msk.f32.vlgmr.msra.gmra.mrb[100].mxu0 %vm180_vm0, %v10972_v42  ;;  %7629 = vmatmul.mubr.msk.f32.vlgmr.msra.gmra.mrb[76].mxu1 %vm180_vm0, %v10972_v42 }
0x14f4   :  { %8495 = vmatpush1.bf16.msra.mxu0 %v10334_v30  ;;  %8510 = vmatpush3.bf16.msra.mxu1 %v10461_v33 }
0x14f5   :  { %8497 = vmatprep.subr.bf16.mxu0 %v10340_v54  ;;  %8511 = vmatprep.subr.bf16.mxu1 %v11566_v51 }
0x14f6   :  { %4785 = vmatprep.mubr.f32.mxu0 %v11567_v6  ;;  %7647 = vmatprep.mubr.msk.f32.mxu1 %vm9183_vm1, %v11567_v6 }
0x14f8   :  { %8499 = vmatpush1.bf16.msra.mxu0 %v10356_v1  ;;  %8513 = vmatpush3.bf16.msra.mxu1 %v10467_v60 }
0x14f9   :  { %8501 = vmatprep.subr.bf16.mxu0 %v10359_v44  ;;  %8514 = vmatprep.subr.bf16.mxu1 %v11566_v51 }
0x14fc   :  { %8503 = vmatpush1.bf16.msra.mxu0 %v10376_v35  ;;  %8516 = vmatpush3.bf16.msra.mxu1 %v10475_v40 }
0x14fd   :  { %8505 = vmatprep.subr.bf16.mxu0 %v10379_v19  ;;  %8517 = vmatprep.subr.bf16.mxu1 %v11566_v51 }
0x1500   :  { %8507 = vmatpush1.bf16.msra.mxu0 %v10396_v14  ;;  %8519 = vmatpush3.bf16.msra.mxu1 %v10481_v38 }
0x1501   :  { %8521 = vmatprep.subr.bf16.mxu0 %v10315_v8  ;;  %8536 = vmatprep.subr.bf16.mxu1 %v11566_v51 }
0x15c6   :  { %v4612_v20 = vpop.f32.mrb[100].mxu0  ;;  %v4683_v7 = vpop.f32.mrb[76].mxu1 }
0x15c7   :  { %v4687_v39 = vadd.f32 %v4612_v20, %v10748_v55  ;;  %v4614_v27 = vpop.f32.mrb[101].mxu0  ;;  %v7630_v41 = vpop.f32.mrb[77].mxu1  ;;  %v4701_v26 = vadd.f32 %v10856_v50, %v4683_v7 }
0x15c8   :  { %v4688_v4 = vadd.f32 %v4614_v27, %v11657_v36 }
0x15c9   :  { %v6770_v45 = vmul.f32 -1.442695, %v4687_v39 }
0x15ca   :  { %v6771_v17 = vmul.f32 -1.442695, %v4688_v4 }
0x15cb   :  { %9007 = vpow2.f32 %v6770_v45 }
0x15cc   :  { %9009 = vpow2.f32 %v6771_v17 }
0x15d5   :  { %v9008_v56 = vpop.eup %9007 }
0x15d6   :  { %v4692_v32 = vadd.f32 1.0, %v9008_v56  ;;  %v9010_v22 = vpop.eup %9009 }
0x15d7   :  { %v4698_v21 = vadd.f32 1.0, %v9010_v22 }
0x15d8   :  { %9011 = vrcp.f32 %v4692_v32 }
0x15d9   :  { %9013 = vrcp.f32 %v4698_v21  ;;  %v11659_v21 = vsel %vm9578_vm4, %v10597_v62, %v10723_v47 }
0x15e2   :  { %v9012_v55 = vpop.eup %9011 }
0x15e3   :  { %v4702_v12 = vmul.f32 %v9012_v55, %v4701_v26  ;;  %v9014_v39 = vpop.eup %9013 }
0x15e4   :  { %v4705_v27 = vsub.f32 1.0, %v9014_v39  ;;  %v4707_v4 = vmul.f32 %v9014_v39, %v10972_v42 }
0x15e5   :  { %v4703_v20 = vadd.f32 %v4702_v12, %v11658_v11 }
0x15e7   :  { %9015 = vtanh.f32 %v4703_v20 }
0x15f1   :  { %v9016_v41 = vpop.eup %9015 }
0x15f2   :  { %v4706_v36 = vmul.f32 %v9016_v41, %v4705_v27 }
0x15f4   :  { %v11010_v45 = vadd.f32 %v4707_v4, %v4706_v36  ;;  %v11660_v4 = vsel %vm9477_vm2, %v10550_v57, %v10603_v25 }
0x15f6   :  { %6772 = vmatmul.mubr.msk.f32.vlgmr.msra.gmra.mrb[102].mxu0 %vm180_vm0, %v11010_v45  ;;  %7648 = vmatmul.mubr.msk.f32.vlgmr.msra.gmra.mrb[78].mxu1 %vm180_vm0, %v11010_v45 }
0x15f7   :  { %8523 = vmatpush1.bf16.msra.mxu0 %v10334_v30  ;;  %8538 = vmatpush3.bf16.msra.mxu1 %v10461_v33 }
0x15f8   :  { %8525 = vmatprep.subr.bf16.mxu0 %v10340_v54  ;;  %8539 = vmatprep.subr.bf16.mxu1 %v11566_v51 }
0x15f9   :  { %4960 = vmatprep.mubr.f32.mxu0 %v11567_v6  ;;  %7666 = vmatprep.mubr.msk.f32.mxu1 %vm9183_vm1, %v11567_v6 }
0x15fb   :  { %8527 = vmatpush1.bf16.msra.mxu0 %v10356_v1  ;;  %8541 = vmatpush3.bf16.msra.mxu1 %v10467_v60 }
0x15fc   :  { %8529 = vmatprep.subr.bf16.mxu0 %v10359_v44  ;;  %8542 = vmatprep.subr.bf16.mxu1 %v11566_v51 }
0x15ff   :  { %8531 = vmatpush1.bf16.msra.mxu0 %v10376_v35  ;;  %8544 = vmatpush3.bf16.msra.mxu1 %v10475_v40 }
0x1600   :  { %8533 = vmatprep.subr.bf16.mxu0 %v10379_v19  ;;  %8545 = vmatprep.subr.bf16.mxu1 %v11566_v51 }
0x1603   :  { %8535 = vmatpush1.bf16.msra.mxu0 %v10396_v14  ;;  %8547 = vmatpush3.bf16.msra.mxu1 %v10481_v38 }
0x1604   :  { %8549 = vmatprep.subr.bf16.mxu0 %v10315_v8  ;;  %8564 = vmatprep.subr.bf16.mxu1 %v11566_v51 }
0x16c9   :  { %v4787_v7 = vpop.f32.mrb[102].mxu0  ;;  %v4858_v17 = vpop.f32.mrb[78].mxu1 }
0x16ca   :  { %v4862_v56 = vadd.f32 %v4787_v7, %v10727_v2  ;;  %v4789_v32 = vpop.f32.mrb[103].mxu0  ;;  %v7649_v22 = vpop.f32.mrb[79].mxu1  ;;  %v4876_v41 = vadd.f32 %v10856_v50, %v4858_v17 }
0x16cb   :  { %v4863_v26 = vadd.f32 %v4789_v32, %v11659_v21 }
0x16cc   :  { %v6774_v55 = vmul.f32 -1.442695, %v4862_v56 }
0x16cd   :  { %v6775_v12 = vmul.f32 -1.442695, %v4863_v26 }
0x16ce   :  { %9017 = vpow2.f32 %v6774_v55 }
0x16cf   :  { %9019 = vpow2.f32 %v6775_v12 }
0x16d8   :  { %v9018_v11 = vpop.eup %9017 }
0x16d9   :  { %v4867_v20 = vadd.f32 1.0, %v9018_v11  ;;  %v9020_v39 = vpop.eup %9019 }
0x16da   :  { %v4873_v27 = vadd.f32 1.0, %v9020_v39 }
0x16db   :  { %9021 = vrcp.f32 %v4867_v20 }
0x16dc   :  { %9023 = vrcp.f32 %v4873_v27  ;;  %v11661_v27 = vsel %vm9578_vm4, %v10623_v53, %v10703_v28 }
0x16e5   :  { %v9022_v2 = vpop.eup %9021 }
0x16e6   :  { %v4877_v36 = vmul.f32 %v9022_v2, %v4876_v41  ;;  %v9024_v56 = vpop.eup %9023 }
0x16e7   :  { %v4880_v32 = vsub.f32 1.0, %v9024_v56  ;;  %v4882_v26 = vmul.f32 %v9024_v56, %v11010_v45 }
0x16e8   :  { %v4878_v7 = vadd.f32 %v4877_v36, %v11660_v4 }
0x16ea   :  { %9025 = vtanh.f32 %v4878_v7 }
0x16f4   :  { %v9026_v22 = vpop.eup %9025 }
0x16f5   :  { %v4881_v21 = vmul.f32 %v9026_v22, %v4880_v32 }
0x16f7   :  { %v11048_v55 = vadd.f32 %v4882_v26, %v4881_v21  ;;  %v11662_v26 = vld [vmem:[#allocation11_spill] sm:$0xff] }
0x16f9   :  { %6776 = vmatmul.mubr.msk.f32.vlgmr.msra.gmra.mrb[104].mxu0 %vm180_vm0, %v11048_v55  ;;  %7667 = vmatmul.mubr.msk.f32.vlgmr.msra.gmra.mrb[80].mxu1 %vm180_vm0, %v11048_v55 }
0x16fa   :  { %8551 = vmatpush1.bf16.msra.mxu0 %v10334_v30  ;;  %8566 = vmatpush3.bf16.msra.mxu1 %v10461_v33 }
0x16fb   :  { %8553 = vmatprep.subr.bf16.mxu0 %v10340_v54  ;;  %8567 = vmatprep.subr.bf16.mxu1 %v11566_v51 }
0x16fc   :  { %5135 = vmatprep.mubr.f32.mxu0 %v11567_v6  ;;  %7685 = vmatprep.mubr.msk.f32.mxu1 %vm9183_vm1, %v11567_v6 }
0x16fe   :  { %8555 = vmatpush1.bf16.msra.mxu0 %v10356_v1  ;;  %8569 = vmatpush3.bf16.msra.mxu1 %v10467_v60 }
0x16ff   :  { %8557 = vmatprep.subr.bf16.mxu0 %v10359_v44  ;;  %8570 = vmatprep.subr.bf16.mxu1 %v11566_v51 }
0x1702   :  { %8559 = vmatpush1.bf16.msra.mxu0 %v10376_v35  ;;  %8572 = vmatpush3.bf16.msra.mxu1 %v10475_v40 }
0x1703   :  { %8561 = vmatprep.subr.bf16.mxu0 %v10379_v19  ;;  %8573 = vmatprep.subr.bf16.mxu1 %v11566_v51 }
0x1706   :  { %8563 = vmatpush1.bf16.msra.mxu0 %v10396_v14  ;;  %8575 = vmatpush3.bf16.msra.mxu1 %v10481_v38 }
0x1707   :  { %8577 = vmatprep.subr.bf16.mxu0 %v10315_v8  ;;  %8592 = vmatprep.subr.bf16.mxu1 %v11566_v51 }
0x17cc   :  { %v4962_v17 = vpop.f32.mrb[104].mxu0  ;;  %v5033_v12 = vpop.f32.mrb[80].mxu1 }
0x17cd   :  { %v5037_v11 = vadd.f32 %v4962_v17, %v10707_v58  ;;  %v4964_v20 = vpop.f32.mrb[105].mxu0  ;;  %v7668_v39 = vpop.f32.mrb[81].mxu1  ;;  %v5051_v22 = vadd.f32 %v10856_v50, %v5033_v12  ;;  %v11663_v17 = vld [vmem:[#allocation12_spill] sm:$0xff] }
0x17ce   :  { %v5038_v41 = vadd.f32 %v4964_v20, %v11661_v27  ;;  %v11664_v39 = vsel %vm9477_vm2, %v11662_v26, %v11663_v17 }
0x17cf   :  { %v6778_v2 = vmul.f32 -1.442695, %v5037_v11 }
0x17d0   :  { %v6779_v36 = vmul.f32 -1.442695, %v5038_v41 }
0x17d1   :  { %9027 = vpow2.f32 %v6778_v2 }
0x17d2   :  { %9029 = vpow2.f32 %v6779_v36 }
0x17db   :  { %v9028_v4 = vpop.eup %9027 }
0x17dc   :  { %v5042_v7 = vadd.f32 1.0, %v9028_v4  ;;  %v9030_v56 = vpop.eup %9029 }
0x17dd   :  { %v5048_v32 = vadd.f32 1.0, %v9030_v56  ;;  %v11665_v56 = vld [vmem:[#allocation24_spill] sm:$0xff] }
0x17de   :  { %9031 = vrcp.f32 %v5042_v7 }
0x17df   :  { %9033 = vrcp.f32 %v5048_v32 }
0x17e8   :  { %v9032_v58 = vpop.eup %9031 }
0x17e9   :  { %v5052_v21 = vmul.f32 %v9032_v58, %v5051_v22  ;;  %v9034_v11 = vpop.eup %9033 }
0x17ea   :  { %v5055_v27 = vsub.f32 1.0, %v9034_v11  ;;  %v5057_v36 = vmul.f32 %v9034_v11, %v11048_v55 }
0x17eb   :  { %v5053_v20 = vadd.f32 %v5052_v21, %v11664_v39  ;;  %v11666_v21 = vld [vmem:[#allocation20_spill] sm:$0xff]  ;;  %v11667_v39 = vld [vmem:[#allocation23_spill] sm:$0xff] }
0x17ed   :  { %9035 = vtanh.f32 %v5053_v20  ;;  %v11668_v20 = vsel %vm9578_vm4, %v11666_v21, %v11667_v39 }
0x17f7   :  { %v9036_v41 = vpop.eup %9035 }
0x17f8   :  { %v5056_v2 = vmul.f32 %v9036_v41, %v5055_v27 }
0x17fa   :  { %v11086_v4 = vadd.f32 %v5057_v36, %v5056_v2 }
0x17fc   :  { %6780 = vmatmul.mubr.msk.f32.vlgmr.msra.gmra.mrb[106].mxu0 %vm180_vm0, %v11086_v4  ;;  %7686 = vmatmul.mubr.msk.f32.vlgmr.msra.gmra.mrb[82].mxu1 %vm180_vm0, %v11086_v4 }
0x17fd   :  { %8579 = vmatpush1.bf16.msra.mxu0 %v10334_v30  ;;  %8594 = vmatpush3.bf16.msra.mxu1 %v10461_v33 }
0x17fe   :  { %8581 = vmatprep.subr.bf16.mxu0 %v10340_v54  ;;  %8595 = vmatprep.subr.bf16.mxu1 %v11566_v51 }
0x17ff   :  { %5304 = vmatprep.mubr.f32.mxu0 %v11567_v6  ;;  %7704 = vmatprep.mubr.msk.f32.mxu1 %vm9183_vm1, %v11567_v6 }
0x1801   :  { %8583 = vmatpush1.bf16.msra.mxu0 %v10356_v1  ;;  %8597 = vmatpush3.bf16.msra.mxu1 %v10467_v60 }
0x1802   :  { %8585 = vmatprep.subr.bf16.mxu0 %v10359_v44  ;;  %8598 = vmatprep.subr.bf16.mxu1 %v11566_v51 }
0x1805   :  { %8587 = vmatpush1.bf16.msra.mxu0 %v10376_v35  ;;  %8600 = vmatpush3.bf16.msra.mxu1 %v10475_v40 }
0x1806   :  { %8589 = vmatprep.subr.bf16.mxu0 %v10379_v19  ;;  %8601 = vmatprep.subr.bf16.mxu1 %v11566_v51 }
0x1809   :  { %8591 = vmatpush1.bf16.msra.mxu0 %v10396_v14  ;;  %8603 = vmatpush3.bf16.msra.mxu1 %v10481_v38 }
0x180a   :  { %8605 = vmatprep.subr.bf16.mxu0 %v10315_v8  ;;  %8620 = vmatprep.subr.bf16.mxu1 %v11566_v51 }
0x18cf   :  { %v5137_v12 = vpop.f32.mrb[106].mxu0  ;;  %v5208_v7 = vpop.f32.mrb[82].mxu1 }
0x18d0   :  { %v5212_v32 = vadd.f32 %v5137_v12, %v11665_v56  ;;  %v5139_v22 = vpop.f32.mrb[107].mxu0  ;;  %v7687_v58 = vpop.f32.mrb[83].mxu1  ;;  %v5226_v10 = vadd.f32 %v10856_v50, %v5208_v7 }
0x18d1   :  { %v5213_v11 = vadd.f32 %v5139_v22, %v11668_v20  ;;  %v11669_v58 = vld [vmem:[#allocation16_spill] sm:$0xff] }
0x18d2   :  { %v6782_v27 = vmul.f32 -1.442695, %v5212_v32  ;;  %v11671_v16 = vsel %vm9477_vm2, %v11669_v58, %v11670_v29 }
0x18d3   :  { %v6783_v41 = vmul.f32 -1.442695, %v5213_v11 }
0x18d4   :  { %9037 = vpow2.f32 %v6782_v27 }
0x18d5   :  { %9039 = vpow2.f32 %v6783_v41 }
0x18de   :  { %v9038_v2 = vpop.eup %9037 }
0x18df   :  { %v5217_v36 = vadd.f32 1.0, %v9038_v2  ;;  %v9040_v5 = vpop.eup %9039 }
0x18e0   :  { %v5223_v23 = vadd.f32 1.0, %v9040_v5 }
0x18e1   :  { %9041 = vrcp.f32 %v5217_v36 }
0x18e2   :  { %9043 = vrcp.f32 %v5223_v23 }
0x18eb   :  { %v9042_v12 = vpop.eup %9041 }
0x18ec   :  { %v5227_v56 = vmul.f32 %v9042_v12, %v5226_v10  ;;  %v9044_v32 = vpop.eup %9043  ;;  %v11672_v10 = vld [vmem:[#allocation27_spill] sm:$0xff]  ;;  %v11673_v12 = vsel %vm9578_vm4, %v11667_v39, %v11666_v21  ;;  %v11674_v21 = vsel %vm9477_vm2, %v11670_v29, %v11669_v58 }
0x18ed   :  { %v5230_v20 = vsub.f32 1.0, %v9044_v32  ;;  %v5232_v41 = vmul.f32 %v9044_v32, %v11086_v4 }
0x18ee   :  { %v5228_v22 = vadd.f32 %v5227_v56, %v11671_v16 }
0x18f0   :  { %9045 = vtanh.f32 %v5228_v22 }
0x18fa   :  { %v9046_v11 = vpop.eup %9045 }
0x18fb   :  { %v5231_v27 = vmul.f32 %v9046_v11, %v5230_v20 }
0x18fd   :  { %v5233_v2 = vadd.f32 %v5232_v41, %v5231_v27 }
0x18ff   :  { %6784 = vmatmul.mubr.msk.f32.vlgmr.msra.gmra.mrb[108].mxu0 %vm180_vm0, %v5233_v2  ;;  %7705 = vmatmul.mubr.msk.f32.vlgmr.msra.gmra.mrb[84].mxu1 %vm180_vm0, %v5233_v2 }
0x1900   :  { %8607 = vmatpush1.bf16.msra.mxu0 %v10334_v30  ;;  %8622 = vmatpush3.bf16.msra.mxu1 %v10461_v33 }
0x1901   :  { %8609 = vmatprep.subr.bf16.mxu0 %v10340_v54  ;;  %8623 = vmatprep.subr.bf16.mxu1 %v11566_v51 }
0x1902   :  { %5473 = vmatprep.mubr.f32.mxu0 %v11567_v6  ;;  %7723 = vmatprep.mubr.msk.f32.mxu1 %vm9183_vm1, %v11567_v6 }
0x1904   :  { %8611 = vmatpush1.bf16.msra.mxu0 %v10356_v1  ;;  %8625 = vmatpush3.bf16.msra.mxu1 %v10467_v60 }
0x1905   :  { %8613 = vmatprep.subr.bf16.mxu0 %v10359_v44  ;;  %8626 = vmatprep.subr.bf16.mxu1 %v11566_v51 }
0x1908   :  { %8615 = vmatpush1.bf16.msra.mxu0 %v10376_v35  ;;  %8628 = vmatpush3.bf16.msra.mxu1 %v10475_v40 }
0x1909   :  { %8617 = vmatprep.subr.bf16.mxu0 %v10379_v19  ;;  %8629 = vmatprep.subr.bf16.mxu1 %v11566_v51 }
0x190c   :  { %8619 = vmatpush1.bf16.msra.mxu0 %v10396_v14  ;;  %8631 = vmatpush3.bf16.msra.mxu1 %v10481_v38 }
0x190d   :  { %8633 = vmatprep.subr.bf16.mxu0 %v10315_v8  ;;  %8648 = vmatprep.subr.bf16.mxu1 %v11566_v51 }
0x19d2   :  { %v5306_v16 = vpop.f32.mrb[108].mxu0  ;;  %v5377_v23 = vpop.f32.mrb[84].mxu1 }
0x19d3   :  { %v5381_v5 = vadd.f32 %v5306_v16, %v11672_v10  ;;  %v5308_v7 = vpop.f32.mrb[109].mxu0  ;;  %v7706_v36 = vpop.f32.mrb[85].mxu1  ;;  %v5395_v59 = vadd.f32 %v10856_v50, %v5377_v23 }
0x19d4   :  { %v5382_v56 = vadd.f32 %v5308_v7, %v11673_v12 }
0x19d5   :  { %v6786_v22 = vmul.f32 -1.442695, %v5381_v5 }
0x19d6   :  { %v6787_v32 = vmul.f32 -1.442695, %v5382_v56 }
0x19d7   :  { %9047 = vpow2.f32 %v6786_v22 }
0x19d8   :  { %9049 = vpow2.f32 %v6787_v32 }
0x19e1   :  { %v9048_v20 = vpop.eup %9047 }
0x19e2   :  { %v5386_v11 = vadd.f32 1.0, %v9048_v20  ;;  %v9050_v27 = vpop.eup %9049 }
0x19e3   :  { %v5392_v41 = vadd.f32 1.0, %v9050_v27  ;;  %v11676_v27 = vsel %vm9578_vm4, %v10703_v28, %v10623_v53  ;;  %v11677_v53 = vsel %vm9477_vm2, %v11663_v17, %v11662_v26 }
0x19e4   :  { %9051 = vrcp.f32 %v5386_v11 }
0x19e5   :  { %9053 = vrcp.f32 %v5392_v41 }
0x19ee   :  { %v9052_v16 = vpop.eup %9051 }
0x19ef   :  { %v5396_v10 = vmul.f32 %v9052_v16, %v5395_v59  ;;  %v9054_v5 = vpop.eup %9053 }
0x19f0   :  { %v5399_v7 = vsub.f32 1.0, %v9054_v5  ;;  %v5401_v56 = vmul.f32 %v9054_v5, %v5233_v2 }
0x19f1   :  { %v5397_v39 = vadd.f32 %v5396_v10, %v11674_v21 }
0x19f3   :  { %9055 = vtanh.f32 %v5397_v39 }
0x19fd   :  { %v9056_v36 = vpop.eup %9055 }
0x19fe   :  { %v5400_v12 = vmul.f32 %v9056_v36, %v5399_v7 }
0x1a00   :  { %v5402_v22 = vadd.f32 %v5401_v56, %v5400_v12 }
0x1a02   :  { %6788 = vmatmul.mubr.msk.f32.vlgmr.msra.gmra.mrb[110].mxu0 %vm180_vm0, %v5402_v22  ;;  %v6593_v23 = vsel %vm88_vm3, %v5233_v2, %v5402_v22  ;;  %v6594_v59 = vsel %vm88_vm3, %v5402_v22, %v5233_v2  ;;  %7724 = vmatmul.mubr.msk.f32.vlgmr.msra.gmra.mrb[86].mxu1 %vm180_vm0, %v5402_v22  ;;  %v11675_v2 = vld [vmem:[#allocation26_spill] sm:$0xff] }
0x1a03   :  { %6609 = vst.msk [vmem:[%s11487_s5 + $0x38] sm:$0xff] %vm180_vm0, %v6593_v23  ;;  %6610 = vst.msk [vmem:[%s11487_s5 + $0x40] sm:$0xff] %vm180_vm0, %v6594_v59  ;;  %8635 = vmatpush1.bf16.msra.mxu0 %v10334_v30  ;;  %8650 = vmatpush3.bf16.msra.mxu1 %v10461_v33 }
0x1a04   :  { %8637 = vmatprep.subr.bf16.mxu0 %v10340_v54  ;;  %8651 = vmatprep.subr.bf16.mxu1 %v11566_v51 }
0x1a05   :  { %5642 = vmatprep.mubr.f32.mxu0 %v11567_v6  ;;  %7742 = vmatprep.mubr.msk.f32.mxu1 %vm9183_vm1, %v11567_v6 }
0x1a07   :  { %8639 = vmatpush1.bf16.msra.mxu0 %v10356_v1  ;;  %8653 = vmatpush3.bf16.msra.mxu1 %v10467_v60 }
0x1a08   :  { %8641 = vmatprep.subr.bf16.mxu0 %v10359_v44  ;;  %8654 = vmatprep.subr.bf16.mxu1 %v11566_v51 }
0x1a0b   :  { %8643 = vmatpush1.bf16.msra.mxu0 %v10376_v35  ;;  %8656 = vmatpush3.bf16.msra.mxu1 %v10475_v40 }
0x1a0c   :  { %8645 = vmatprep.subr.bf16.mxu0 %v10379_v19  ;;  %8657 = vmatprep.subr.bf16.mxu1 %v11566_v51 }
0x1a0f   :  { %8647 = vmatpush1.bf16.msra.mxu0 %v10396_v14  ;;  %8659 = vmatpush3.bf16.msra.mxu1 %v10481_v38 }
0x1a10   :  { %8661 = vmatprep.subr.bf16.mxu0 %v10315_v8  ;;  %8676 = vmatprep.subr.bf16.mxu1 %v11566_v51 }
0x1ad5   :  { %v5475_v29 = vpop.f32.mrb[110].mxu0  ;;  %v5546_v58 = vpop.f32.mrb[86].mxu1 }
0x1ad6   :  { %v5550_v32 = vadd.f32 %v5475_v29, %v11675_v2  ;;  %v5477_v20 = vpop.f32.mrb[111].mxu0  ;;  %v7725_v11 = vpop.f32.mrb[87].mxu1  ;;  %v5564_v36 = vadd.f32 %v10856_v50, %v5546_v58 }
0x1ad7   :  { %v5551_v41 = vadd.f32 %v5477_v20, %v11676_v27 }
0x1ad8   :  { %v6790_v16 = vmul.f32 -1.442695, %v5550_v32 }
0x1ad9   :  { %v6791_v10 = vmul.f32 -1.442695, %v5551_v41 }
0x1ada   :  { %9057 = vpow2.f32 %v6790_v16  ;;  %v11679_v16 = vsel %vm9578_vm4, %v10723_v47, %v10597_v62  ;;  %v11680_v62 = vsel %vm9477_vm2, %v10603_v25, %v10550_v57 }
0x1adb   :  { %9059 = vpow2.f32 %v6791_v10 }
0x1ae4   :  { %v9058_v21 = vpop.eup %9057 }
0x1ae5   :  { %v5555_v39 = vadd.f32 1.0, %v9058_v21  ;;  %v9060_v5 = vpop.eup %9059 }
0x1ae6   :  { %v5561_v7 = vadd.f32 1.0, %v9060_v5 }
0x1ae7   :  { %9061 = vrcp.f32 %v5555_v39 }
0x1ae8   :  { %9063 = vrcp.f32 %v5561_v7 }
0x1af1   :  { %v9062_v12 = vpop.eup %9061 }
0x1af2   :  { %v5565_v56 = vmul.f32 %v9062_v12, %v5564_v36  ;;  %v9064_v23 = vpop.eup %9063 }
0x1af3   :  { %v5568_v59 = vsub.f32 1.0, %v9064_v23  ;;  %v5570_v32 = vmul.f32 %v9064_v23, %v5402_v22 }
0x1af4   :  { %v5566_v28 = vadd.f32 %v5565_v56, %v11677_v53 }
0x1af6   :  { %9065 = vtanh.f32 %v5566_v28 }
0x1b00   :  { %v9066_v29 = vpop.eup %9065 }
0x1b01   :  { %v5569_v2 = vmul.f32 %v9066_v29, %v5568_v59 }
0x1b03   :  { %v5571_v20 = vadd.f32 %v5570_v32, %v5569_v2 }
0x1b05   :  { %6792 = vmatmul.mubr.msk.f32.vlgmr.msra.gmra.mrb[112].mxu0 %vm180_vm0, %v5571_v20  ;;  %v6592_v58 = vsel %vm88_vm3, %v11086_v4, %v5571_v20  ;;  %v6595_v11 = vsel %vm88_vm3, %v5571_v20, %v11086_v4  ;;  %7743 = vmatmul.mubr.msk.f32.vlgmr.msra.gmra.mrb[88].mxu1 %vm180_vm0, %v5571_v20  ;;  %v11678_v4 = vld [vmem:[#allocation25_spill] sm:$0xff] }
0x1b06   :  { %6608 = vst.msk [vmem:[%s11487_s5 + $0x30] sm:$0xff] %vm180_vm0, %v6592_v58  ;;  %6611 = vst.msk [vmem:[%s11487_s5 + $0x48] sm:$0xff] %vm180_vm0, %v6595_v11  ;;  %8663 = vmatpush1.bf16.msra.mxu0 %v10334_v30  ;;  %8678 = vmatpush3.bf16.msra.mxu1 %v10461_v33 }
0x1b07   :  { %8665 = vmatprep.subr.bf16.mxu0 %v10340_v54  ;;  %8679 = vmatprep.subr.bf16.mxu1 %v11566_v51 }
0x1b08   :  { %5811 = vmatprep.mubr.f32.mxu0 %v11567_v6  ;;  %7761 = vmatprep.mubr.msk.f32.mxu1 %vm9183_vm1, %v11567_v6 }
0x1b0a   :  { %8667 = vmatpush1.bf16.msra.mxu0 %v10356_v1  ;;  %8681 = vmatpush3.bf16.msra.mxu1 %v10467_v60 }
0x1b0b   :  { %8669 = vmatprep.subr.bf16.mxu0 %v10359_v44  ;;  %8682 = vmatprep.subr.bf16.mxu1 %v11566_v51 }
0x1b0e   :  { %8671 = vmatpush1.bf16.msra.mxu0 %v10376_v35  ;;  %8684 = vmatpush3.bf16.msra.mxu1 %v10475_v40 }
0x1b0f   :  { %8673 = vmatprep.subr.bf16.mxu0 %v10379_v19  ;;  %8685 = vmatprep.subr.bf16.mxu1 %v11566_v51 }
0x1b12   :  { %8675 = vmatpush1.bf16.msra.mxu0 %v10396_v14  ;;  %8687 = vmatpush3.bf16.msra.mxu1 %v10481_v38 }
0x1b13   :  { %8689 = vmatprep.subr.bf16.mxu0 %v10315_v8  ;;  %8704 = vmatprep.subr.bf16.mxu1 %v11566_v51 }
0x1bd8   :  { %v5644_v26 = vpop.f32.mrb[112].mxu0  ;;  %v5715_v17 = vpop.f32.mrb[88].mxu1 }
0x1bd9   :  { %v5719_v22 = vadd.f32 %v5644_v26, %v11678_v4  ;;  %v5646_v27 = vpop.f32.mrb[113].mxu0  ;;  %v7744_v41 = vpop.f32.mrb[89].mxu1  ;;  %v5733_v56 = vadd.f32 %v10856_v50, %v5715_v17  ;;  %v11682_v4 = vsel %vm9578_vm4, %v10743_v63, %v10571_v3  ;;  %v11683_v3 = vsel %vm9477_vm2, %v10600_v52, %v10553_v34 }
0x1bda   :  { %v5720_v10 = vadd.f32 %v5646_v27, %v11679_v16 }
0x1bdb   :  { %v6794_v21 = vmul.f32 -1.442695, %v5719_v22 }
0x1bdc   :  { %v6795_v39 = vmul.f32 -1.442695, %v5720_v10 }
0x1bdd   :  { %9067 = vpow2.f32 %v6794_v21 }
0x1bde   :  { %9069 = vpow2.f32 %v6795_v39 }
0x1be7   :  { %v9068_v5 = vpop.eup %9067 }
0x1be8   :  { %v5724_v7 = vadd.f32 1.0, %v9068_v5  ;;  %v9070_v36 = vpop.eup %9069  ;;  %v11293_v5 = vld [vmem:[%s11486_s4 + $0x1] ss:$0 sm:$0xff] }
0x1be9   :  { %v5730_v12 = vadd.f32 1.0, %v9070_v36 }
0x1bea   :  { %9071 = vrcp.f32 %v5724_v7 }
0x1beb   :  { %9073 = vrcp.f32 %v5730_v12 }
0x1bf4   :  { %v9072_v53 = vpop.eup %9071 }
0x1bf5   :  { %v5734_v28 = vmul.f32 %v9072_v53, %v5733_v56  ;;  %v9074_v23 = vpop.eup %9073 }
0x1bf6   :  { %v5737_v59 = vsub.f32 1.0, %v9074_v23  ;;  %v5739_v32 = vmul.f32 %v9074_v23, %v5571_v20 }
0x1bf7   :  { %v5735_v47 = vadd.f32 %v5734_v28, %v11680_v62 }
0x1bf9   :  { %9075 = vtanh.f32 %v5735_v47 }
0x1c03   :  { %v9076_v29 = vpop.eup %9075 }
0x1c04   :  { %v5738_v2 = vmul.f32 %v9076_v29, %v5737_v59 }
0x1c06   :  { %v5740_v58 = vadd.f32 %v5739_v32, %v5738_v2 }
0x1c08   :  { %6796 = vmatmul.mubr.msk.f32.vlgmr.msra.gmra.mrb[114].mxu0 %vm180_vm0, %v5740_v58  ;;  %v6591_v50 = vsel %vm88_vm3, %v11048_v55, %v5740_v58  ;;  %v6596_v11 = vsel %vm88_vm3, %v5740_v58, %v11048_v55  ;;  %7762 = vmatmul.mubr.msk.f32.vlgmr.msra.gmra.mrb[90].mxu1 %vm180_vm0, %v5740_v58  ;;  %v11681_v55 = vld [vmem:[#allocation15_spill] sm:$0xff] }
0x1c09   :  { %6607 = vst.msk [vmem:[%s11487_s5 + $0x28] sm:$0xff] %vm180_vm0, %v6591_v50  ;;  %6612 = vst.msk [vmem:[%s11487_s5 + $0x50] sm:$0xff] %vm180_vm0, %v6596_v11  ;;  %8691 = vmatpush1.bf16.msra.mxu0 %v10334_v30  ;;  %8706 = vmatpush3.bf16.msra.mxu1 %v10461_v33  ;;  %v11685_v50 = vsel %vm9578_vm4, %v10765_v15, %v10559_v9  ;;  %v11686_v9 = vsel %vm9477_vm2, %v10629_v31, %v10538_v43 }
0x1c0a   :  { %8693 = vmatprep.subr.bf16.mxu0 %v10340_v54  ;;  %8707 = vmatprep.subr.bf16.mxu1 %v11566_v51 }
0x1c0b   :  { %5980 = vmatprep.mubr.f32.mxu0 %v11567_v6  ;;  %7780 = vmatprep.mubr.msk.f32.mxu1 %vm9183_vm1, %v11567_v6 }
0x1c0d   :  { %8695 = vmatpush1.bf16.msra.mxu0 %v10356_v1  ;;  %8709 = vmatpush3.bf16.msra.mxu1 %v10467_v60 }
0x1c0e   :  { %8697 = vmatprep.subr.bf16.mxu0 %v10359_v44  ;;  %8710 = vmatprep.subr.bf16.mxu1 %v11566_v51 }
0x1c11   :  { %8699 = vmatpush1.bf16.msra.mxu0 %v10376_v35  ;;  %8712 = vmatpush3.bf16.msra.mxu1 %v10475_v40 }
0x1c12   :  { %8701 = vmatprep.subr.bf16.mxu0 %v10379_v19  ;;  %8713 = vmatprep.subr.bf16.mxu1 %v11566_v51 }
0x1c15   :  { %8703 = vmatpush1.bf16.msra.mxu0 %v10396_v14  ;;  %8715 = vmatpush3.bf16.msra.mxu1 %v10481_v38 }
0x1c16   :  { %8717 = vmatprep.subr.bf16.mxu0 %v10315_v8  ;;  %8732 = vmatprep.subr.bf16.mxu1 %v11566_v51 }
0x1cdb   :  { %v5813_v57 = vpop.f32.mrb[114].mxu0  ;;  %v5884_v25 = vpop.f32.mrb[90].mxu1 }
0x1cdc   :  { %v5888_v20 = vadd.f32 %v5813_v57, %v11681_v55  ;;  %v5815_v26 = vpop.f32.mrb[115].mxu0  ;;  %v7763_v17 = vpop.f32.mrb[91].mxu1  ;;  %v5902_v7 = vadd.f32 %v11293_v5, %v5884_v25 }
0x1cdd   :  { %v5889_v22 = vadd.f32 %v5815_v26, %v11682_v4 }
0x1cde   :  { %v6798_v27 = vmul.f32 -1.442695, %v5888_v20 }
0x1cdf   :  { %v6799_v41 = vmul.f32 -1.442695, %v5889_v22 }
0x1ce0   :  { %9077 = vpow2.f32 %v6798_v27 }
0x1ce1   :  { %9079 = vpow2.f32 %v6799_v41 }
0x1cea   :  { %v9078_v16 = vpop.eup %9077 }
0x1ceb   :  { %v5893_v10 = vadd.f32 1.0, %v9078_v16  ;;  %v9080_v21 = vpop.eup %9079 }
0x1cec   :  { %v5899_v39 = vadd.f32 1.0, %v9080_v21 }
0x1ced   :  { %9081 = vrcp.f32 %v5893_v10 }
0x1cee   :  { %9083 = vrcp.f32 %v5899_v39 }
0x1cf7   :  { %v9082_v36 = vpop.eup %9081 }
0x1cf8   :  { %v5903_v12 = vmul.f32 %v9082_v36, %v5902_v7  ;;  %v9084_v56 = vpop.eup %9083 }
0x1cf9   :  { %v5906_v53 = vsub.f32 1.0, %v9084_v56  ;;  %v5908_v47 = vmul.f32 %v9084_v56, %v5740_v58 }
0x1cfa   :  { %v5904_v63 = vadd.f32 %v5903_v12, %v11683_v3 }
0x1cfc   :  { %9085 = vtanh.f32 %v5904_v63 }
0x1d06   :  { %v9086_v28 = vpop.eup %9085 }
0x1d07   :  { %v5907_v62 = vmul.f32 %v9086_v28, %v5906_v53  ;;  %v11688_v53 = vsel %vm9578_vm4, %v10787_v48, %v10547_v49  ;;  %v11689_v49 = vsel %vm9477_vm2, %v10626_v13, %v10541_v0 }
0x1d09   :  { %v5909_v23 = vadd.f32 %v5908_v47, %v5907_v62 }
0x1d0b   :  { %6800 = vmatmul.mubr.msk.f32.vlgmr.msra.gmra.mrb[116].mxu0 %vm180_vm0, %v5909_v23  ;;  %v6590_v59 = vsel %vm88_vm3, %v11010_v45, %v5909_v23  ;;  %v6597_v29 = vsel %vm88_vm3, %v5909_v23, %v11010_v45  ;;  %7781 = vmatmul.mubr.msk.f32.vlgmr.msra.gmra.mrb[92].mxu1 %vm180_vm0, %v5909_v23  ;;  %v11684_v45 = vld [vmem:[#allocation13_spill] sm:$0xff] }
0x1d0c   :  { %6606 = vst.msk [vmem:[%s11487_s5 + $0x20] sm:$0xff] %vm180_vm0, %v6590_v59  ;;  %6613 = vst.msk [vmem:[%s11487_s5 + $0x58] sm:$0xff] %vm180_vm0, %v6597_v29  ;;  %8719 = vmatpush1.bf16.msra.mxu0 %v10334_v30  ;;  %8734 = vmatpush3.bf16.msra.mxu1 %v10461_v33 }
0x1d0d   :  { %8721 = vmatprep.subr.bf16.mxu0 %v10340_v54  ;;  %8735 = vmatprep.subr.bf16.mxu1 %v11566_v51 }
0x1d0e   :  { %6149 = vmatprep.mubr.f32.mxu0 %v11567_v6  ;;  %7799 = vmatprep.mubr.msk.f32.mxu1 %vm9183_vm1, %v11567_v6 }
0x1d10   :  { %8723 = vmatpush1.bf16.msra.mxu0 %v10356_v1  ;;  %8737 = vmatpush3.bf16.msra.mxu1 %v10467_v60 }
0x1d11   :  { %8725 = vmatprep.subr.bf16.mxu0 %v10359_v44  ;;  %8738 = vmatprep.subr.bf16.mxu1 %v11566_v51 }
0x1d14   :  { %8727 = vmatpush1.bf16.msra.mxu0 %v10376_v35  ;;  %8740 = vmatpush3.bf16.msra.mxu1 %v10475_v40 }
0x1d15   :  { %8729 = vmatprep.subr.bf16.mxu0 %v10379_v19  ;;  %8741 = vmatprep.subr.bf16.mxu1 %v11566_v51 }
0x1d18   :  { %8731 = vmatpush1.bf16.msra.mxu0 %v10396_v14  ;;  %8743 = vmatpush3.bf16.msra.mxu1 %v10481_v38 }
0x1d19   :  { %8745 = vmatprep.subr.bf16.mxu0 %v10315_v8  ;;  %8760 = vmatprep.subr.bf16.mxu1 %v11566_v51 }
0x1dde   :  { %v5982_v34 = vpop.f32.mrb[116].mxu0  ;;  %v6053_v52 = vpop.f32.mrb[92].mxu1 }
0x1ddf   :  { %v6057_v2 = vadd.f32 %v5982_v34, %v11684_v45  ;;  %v5984_v32 = vpop.f32.mrb[117].mxu0  ;;  %v7782_v58 = vpop.f32.mrb[93].mxu1  ;;  %v6071_v4 = vadd.f32 %v11293_v5, %v6053_v52 }
0x1de0   :  { %v6058_v11 = vadd.f32 %v5984_v32, %v11685_v50 }
0x1de1   :  { %v6802_v57 = vmul.f32 -1.442695, %v6057_v2 }
0x1de2   :  { %v6803_v25 = vmul.f32 -1.442695, %v6058_v11 }
0x1de3   :  { %9087 = vpow2.f32 %v6802_v57 }
0x1de4   :  { %9089 = vpow2.f32 %v6803_v25 }
0x1ded   :  { %v9088_v55 = vpop.eup %9087 }
0x1dee   :  { %v6062_v20 = vadd.f32 1.0, %v9088_v55  ;;  %v9090_v26 = vpop.eup %9089 }
0x1def   :  { %v6068_v17 = vadd.f32 1.0, %v9090_v26 }
0x1df0   :  { %9091 = vrcp.f32 %v6062_v20 }
0x1df1   :  { %9093 = vrcp.f32 %v6068_v17  ;;  %v11693_v17 = vld [vmem:[#allocation22_spill] sm:$0xff] }
0x1dfa   :  { %v9092_v22 = vpop.eup %9091 }
0x1dfb   :  { %v6072_v27 = vmul.f32 %v9092_v22, %v6071_v4  ;;  %v9094_v41 = vpop.eup %9093  ;;  %v11694_v4 = vld [vmem:[#allocation17_spill] sm:$0xff] }
0x1dfc   :  { %v6075_v16 = vsub.f32 1.0, %v9094_v41  ;;  %v6077_v39 = vmul.f32 %v9094_v41, %v5909_v23 }
0x1dfd   :  { %v6073_v15 = vadd.f32 %v6072_v27, %v11686_v9 }
0x1dff   :  { %9095 = vtanh.f32 %v6073_v15 }
0x1e09   :  { %v9096_v10 = vpop.eup %9095 }
0x1e0a   :  { %v6076_v21 = vmul.f32 %v9096_v10, %v6075_v16 }
0x1e0c   :  { %v6078_v7 = vadd.f32 %v6077_v39, %v6076_v21  ;;  %v11696_v21 = vld [vmem:[#allocation32_spill] sm:$0xff] }
0x1e0e   :  { %6804 = vmatmul.mubr.msk.f32.vlgmr.msra.gmra.mrb[118].mxu0 %vm180_vm0, %v6078_v7  ;;  %v6589_v36 = vsel %vm88_vm3, %v10972_v42, %v6078_v7  ;;  %v6598_v12 = vsel %vm88_vm3, %v6078_v7, %v10972_v42  ;;  %7800 = vmatmul.mubr.msk.f32.vlgmr.msra.gmra.mrb[94].mxu1 %vm180_vm0, %v6078_v7  ;;  %v11687_v42 = vld [vmem:[#allocation10_spill] sm:$0xff] }
0x1e0f   :  { %6605 = vst.msk [vmem:[%s11487_s5 + $0x18] sm:$0xff] %vm180_vm0, %v6589_v36  ;;  %6614 = vst.msk [vmem:[%s11487_s5 + $0x60] sm:$0xff] %vm180_vm0, %v6598_v12  ;;  %8747 = vmatpush1.bf16.msra.mxu0 %v10334_v30  ;;  %8762 = vmatpush3.bf16.msra.mxu1 %v10461_v33 }
0x1e10   :  { %8749 = vmatprep.subr.bf16.mxu0 %v10340_v54  ;;  %8763 = vmatprep.subr.bf16.mxu1 %v11566_v51 }
0x1e11   :  { %6318 = vmatprep.mubr.f32.mxu0 %v11567_v6  ;;  %7818 = vmatprep.mubr.msk.f32.mxu1 %vm9183_vm1, %v11567_v6 }
0x1e13   :  { %8751 = vmatpush1.bf16.msra.mxu0 %v10356_v1  ;;  %8765 = vmatpush3.bf16.msra.mxu1 %v10467_v60 }
0x1e14   :  { %8753 = vmatprep.subr.bf16.mxu0 %v10359_v44  ;;  %8766 = vmatprep.subr.bf16.mxu1 %v11566_v51 }
0x1e17   :  { %8755 = vmatpush1.bf16.msra.mxu0 %v10376_v35  ;;  %8768 = vmatpush3.bf16.msra.mxu1 %v10475_v40 }
0x1e18   :  { %8757 = vmatprep.subr.bf16.mxu0 %v10379_v19  ;;  %8769 = vmatprep.subr.bf16.mxu1 %v11566_v51 }
0x1e1b   :  { %8759 = vmatpush1.bf16.msra.mxu0 %v10396_v14  ;;  %8771 = vmatpush3.bf16.msra.mxu1 %v10481_v38 }
0x1e1c   :  { %8773 = vmatprep.subr.bf16.mxu0 %v10315_v8  ;;  %8788 = vmatprep.subr.bf16.mxu1 %v11566_v51 }
0x1ee1   :  { %v6151_v43 = vpop.f32.mrb[118].mxu0  ;;  %v6222_v31 = vpop.f32.mrb[94].mxu1 }
0x1ee2   :  { %v6226_v3 = vadd.f32 %v6151_v43, %v11687_v42  ;;  %v6153_v63 = vpop.f32.mrb[119].mxu0  ;;  %v7801_v56 = vpop.f32.mrb[95].mxu1  ;;  %v6240_v34 = vadd.f32 %v11293_v5, %v6222_v31  ;;  %v11697_v43 = vld [vmem:[#allocation31_spill] sm:$0xff] }
0x1ee3   :  { %v6227_v28 = vadd.f32 %v6153_v63, %v11688_v53  ;;  %v11698_v63 = vld [vmem:[#allocation30_spill] sm:$0xff]  ;;  %v11699_v56 = vld [vmem:[#allocation29_spill] sm:$0xff] }
0x1ee4   :  { %v6806_v62 = vmul.f32 -1.442695, %v6226_v3  ;;  %v11700_v53 = vsel %vm9578_vm4, %v11698_v63, %v11699_v56 }
0x1ee5   :  { %v6807_v47 = vmul.f32 -1.442695, %v6227_v28 }
0x1ee6   :  { %9097 = vpow2.f32 %v6806_v62 }
0x1ee7   :  { %9099 = vpow2.f32 %v6807_v47 }
0x1ef0   :  { %v9098_v23 = vpop.eup %9097 }
0x1ef1   :  { %v6231_v8 = vadd.f32 1.0, %v9098_v23  ;;  %v9100_v59 = vpop.eup %9099 }
0x1ef2   :  { %v6237_v29 = vadd.f32 1.0, %v9100_v59 }
0x1ef3   :  { %9101 = vrcp.f32 %v6231_v8 }
0x1ef4   :  { %9103 = vrcp.f32 %v6237_v29 }
0x1efd   :  { %v9102_v52 = vpop.eup %9101 }
0x1efe   :  { %v6241_v45 = vmul.f32 %v9102_v52, %v6240_v34  ;;  %v9104_v2 = vpop.eup %9103 }
0x1eff   :  { %v6244_v32 = vsub.f32 1.0, %v9104_v2  ;;  %v6246_v11 = vmul.f32 %v9104_v2, %v6078_v7 }
0x1f00   :  { %v6242_v48 = vadd.f32 %v6241_v45, %v11689_v49  ;;  %v11702_v49 = vld [vmem:[#allocation19_spill] sm:$0xff] }
0x1f02   :  { %9105 = vtanh.f32 %v6242_v48  ;;  %v11703_v48 = vsel %vm9477_vm2, %v11701_v18, %v11702_v49 }
0x1f0c   :  { %v9106_v58 = vpop.eup %9105 }
0x1f0d   :  { %v6245_v50 = vmul.f32 %v9106_v58, %v6244_v32 }
0x1f0f   :  { %v6247_v57 = vadd.f32 %v6246_v11, %v6245_v50 }
0x1f11   :  { %6808 = vmatmul.mubr.msk.f32.vlgmr.msra.gmra.mrb[120].mxu0 %vm180_vm0, %v6247_v57  ;;  %v6588_v25 = vsel %vm88_vm3, %v10934_v61, %v6247_v57  ;;  %v6599_v55 = vsel %vm88_vm3, %v6247_v57, %v10934_v61  ;;  %7819 = vmatmul.mubr.msk.f32.vlgmr.msra.gmra.mrb[96].mxu1 %vm180_vm0, %v6247_v57 }
0x1f12   :  { %6604 = vst.msk [vmem:[%s11487_s5 + $0x10] sm:$0xff] %vm180_vm0, %v6588_v25  ;;  %6615 = vst.msk [vmem:[%s11487_s5 + $0x68] sm:$0xff] %vm180_vm0, %v6599_v55  ;;  %8775 = vmatpush1.bf16.msra.mxu0 %v10334_v30  ;;  %8790 = vmatpush3.bf16.msra.mxu1 %v10461_v33  ;;  %v11704_v55 = vld [vmem:[#allocation9_spill] sm:$0xff] }
0x1f13   :  { %8777 = vmatprep.subr.bf16.mxu0 %v10340_v54  ;;  %8791 = vmatprep.subr.bf16.mxu1 %v11566_v51  ;;  %v11690_v54 = vld [vmem:[#allocation28_spill] sm:$0xff] }
0x1f14   :  { %6487 = vmatprep.mubr.f32.mxu0 %v11567_v6  ;;  %7837 = vmatprep.mubr.msk.f32.mxu1 %vm9183_vm1, %v11567_v6 }
0x1f16   :  { %8779 = vmatpush1.bf16.msra.mxu0 %v10356_v1  ;;  %8793 = vmatpush3.bf16.msra.mxu1 %v10467_v60 }
0x1f17   :  { %8781 = vmatprep.subr.bf16.mxu0 %v10359_v44  ;;  %8794 = vmatprep.subr.bf16.mxu1 %v11566_v51 }
0x1f1a   :  { %8783 = vmatpush1.bf16.msra.mxu0 %v10376_v35  ;;  %8796 = vmatpush3.bf16.msra.mxu1 %v10475_v40  ;;  %v11691_v35 = vld [vmem:[#allocation14_spill] sm:$0xff] }
0x1f1b   :  { %8785 = vmatprep.subr.bf16.mxu0 %v10379_v19  ;;  %8797 = vmatprep.subr.bf16.mxu1 %v11566_v51  ;;  %v11692_v60 = vsel %vm9578_vm4, %v10809_v37, %v11691_v35  ;;  %v11695_v37 = vsel %vm9477_vm2, %v11693_v17, %v11694_v4 }
0x1f1e   :  { %8787 = vmatpush1.bf16.msra.mxu0 %v10396_v14  ;;  %8799 = vmatpush3.bf16.msra.mxu1 %v10481_v38 }
0x1fe4   :  { %v6320_v6 = vpop.f32.mrb[120].mxu0  ;;  %v6391_v30 = vpop.f32.mrb[96].mxu1 }
0x1fe5   :  { %v6395_v1 = vadd.f32 %v6320_v6, %v11690_v54  ;;  %v6322_v33 = vpop.f32.mrb[121].mxu0  ;;  %v7820_v44 = vpop.f32.mrb[97].mxu1  ;;  %v6409_v61 = vadd.f32 %v11293_v5, %v6391_v30 }
0x1fe6   :  { %v6396_v40 = vadd.f32 %v6322_v33, %v11692_v60 }
0x1fe7   :  { %v6810_v0 = vmul.f32 -1.442695, %v6395_v1 }
0x1fe8   :  { %v6811_v19 = vmul.f32 -1.442695, %v6396_v40 }
0x1fe9   :  { %9107 = vpow2.f32 %v6810_v0 }
0x1fea   :  { %9109 = vpow2.f32 %v6811_v19 }
0x1ff3   :  { %v9108_v51 = vpop.eup %9107 }
0x1ff4   :  { %v6400_v14 = vadd.f32 1.0, %v9108_v51  ;;  %v9110_v38 = vpop.eup %9109 }
0x1ff5   :  { %v6406_v13 = vadd.f32 1.0, %v9110_v38 }
0x1ff6   :  { %9111 = vrcp.f32 %v6400_v14 }
0x1ff7   :  { %9113 = vrcp.f32 %v6406_v13 }
0x2000   :  { %v9112_v20 = vpop.eup %9111 }
0x2001   :  { %v6410_v26 = vmul.f32 %v9112_v20, %v6409_v61  ;;  %v9114_v27 = vpop.eup %9113 }
0x2002   :  { %v6413_v9 = vsub.f32 1.0, %v9114_v27  ;;  %v6415_v16 = vmul.f32 %v9114_v27, %v6247_v57 }
0x2003   :  { %v6411_v22 = vadd.f32 %v6410_v26, %v11695_v37 }
0x2005   :  { %9115 = vtanh.f32 %v6411_v22 }
0x200f   :  { %v9116_v15 = vpop.eup %9115 }
0x2010   :  { %v6414_v41 = vmul.f32 %v9116_v15, %v6413_v9 }
0x2012   :  { %v6416_v10 = vadd.f32 %v6415_v16, %v6414_v41 }
0x2014   :  { %6812 = vmatmul.mubr.msk.f32.vlgmr.msra.gmra.mrb[122].mxu0 %vm180_vm0, %v6416_v10  ;;  %v6587_v39 = vsel %vm88_vm3, %v11696_v21, %v6416_v10  ;;  %v6600_v7 = vsel %vm88_vm3, %v6416_v10, %v11696_v21  ;;  %7838 = vmatmul.mubr.msk.f32.vlgmr.msra.gmra.mrb[98].mxu1 %vm180_vm0, %v6416_v10 }
0x2015   :  { %6603 = vst.msk [vmem:[%s11487_s5 + $0x8] sm:$0xff] %vm180_vm0, %v6587_v39  ;;  %6616 = vst.msk [vmem:[%s11487_s5 + $0x70] sm:$0xff] %vm180_vm0, %v6600_v7 }
0x20e7   :  { %v6489_v36 = vpop.f32.mrb[122].mxu0  ;;  %v6560_v12 = vpop.f32.mrb[98].mxu1 }
0x20e8   :  { %v6564_v31 = vadd.f32 %v6489_v36, %v11697_v43  ;;  %v6491_v42 = vpop.f32.mrb[123].mxu0  ;;  %v7839_v3 = vpop.f32.mrb[99].mxu1  ;;  %v6578_v34 = vadd.f32 %v11293_v5, %v6560_v12 }
0x20e9   :  { %v6565_v28 = vadd.f32 %v6491_v42, %v11700_v53 }
0x20ea   :  { %v6814_v62 = vmul.f32 -1.442695, %v6564_v31 }
0x20eb   :  { %v6815_v47 = vmul.f32 -1.442695, %v6565_v28 }
0x20ec   :  { %9117 = vpow2.f32 %v6814_v62 }
0x20ed   :  { %9119 = vpow2.f32 %v6815_v47 }
0x20f6   :  { %v9118_v23 = vpop.eup %9117 }
0x20f7   :  { %v6569_v8 = vadd.f32 1.0, %v9118_v23  ;;  %v9120_v59 = vpop.eup %9119 }
0x20f8   :  { %v6575_v29 = vadd.f32 1.0, %v9120_v59 }
0x20f9   :  { %9121 = vrcp.f32 %v6569_v8 }
0x20fa   :  { %9123 = vrcp.f32 %v6575_v29 }
0x2103   :  { %v9122_v52 = vpop.eup %9121 }
0x2104   :  { %v6579_v45 = vmul.f32 %v9122_v52, %v6578_v34  ;;  %v9124_v32 = vpop.eup %9123 }
0x2105   :  { %v6582_v58 = vsub.f32 1.0, %v9124_v32  ;;  %v6584_v57 = vmul.f32 %v9124_v32, %v6416_v10 }
0x2106   :  { %v6580_v2 = vadd.f32 %v6579_v45, %v11703_v48 }
0x2108   :  { %9125 = vtanh.f32 %v6580_v2 }
0x2112   :  { %v9126_v50 = vpop.eup %9125 }
0x2113   :  { %v6583_v11 = vmul.f32 %v9126_v50, %v6582_v58 }
0x2115   :  { %v6585_v25 = vadd.f32 %v6584_v57, %v6583_v11 }
0x2117   :  { %v6586_v5 = vsel %vm88_vm3, %v11704_v55, %v6585_v25  ;;  %v6601_v6 = vsel %vm88_vm3, %v6585_v25, %v11704_v55 }
0x2118   :  { %6602 = vst.msk [vmem:[%s11487_s5] sm:$0xff] %vm180_vm0, %v6586_v5  ;;  %6617 = vst.msk [vmem:[%s11487_s5 + $0x78] sm:$0xff] %vm180_vm0, %v6601_v6 }
0x2119   :  { %6622 = vsyncpa [#allocation4], 1 }
0x211a   :  { %6623 = vsyncpa [#allocation6], 1 }

</bundles_post_ra>
